<compile_context>
chip_gen: v7x
topology: tpu7x:2x2x1
jax: 0.10.0
libtpu: 0.0.40
codegen_flags: <defaults>
</compile_context>

<pallas_src>
import jax
import jax.numpy as jnp
from jax import lax
from jax.experimental import pallas as pl
from jax.experimental.pallas import tpu as pltpu

# ---------------- synthetic small CLIP-ViT config ----------------
B = 2
C = 3
IMG = 32            # stands in for 224
PATCH = 8           # stands in for 14
GRID = IMG // PATCH
N_PATCH = GRID * GRID          # 16
SEQ = N_PATCH + 1              # 17 (class token + patches)
SEQ_PAD = 24                   # padded to a multiple of 8 sublanes
WIDTH = 64                     # transformer width (stands in for 1024)
HEADS = 4
HEAD_DIM = WIDTH // HEADS      # 16
LAYERS = 2                     # stands in for 24
MLP_DIM = 4 * WIDTH
EMBED = 32                     # output embedding dim (stands in for 768)
CPP = C * PATCH * PATCH        # 192 features per patch
T = B * SEQ_PAD                # 48 padded tokens total
SCALE = 1.0 / (HEAD_DIM ** 0.5)

CLIP_MEAN = jnp.array([0.48145466, 0.4578275, 0.40821073], dtype=jnp.float32)
CLIP_STD = jnp.array([0.26862954, 0.26130258, 0.27577711], dtype=jnp.float32)


# ---------------- in-kernel helpers ----------------
def _ln(x, g, b, eps=1e-5):
    mu = jnp.mean(x, axis=-1, keepdims=True)
    xc = x - mu
    var = jnp.mean(xc * xc, axis=-1, keepdims=True)
    return xc * lax.rsqrt(var + eps) * g + b


# ---------------- Pallas kernels ----------------
def _embed_kernel(feat_ref, w_ref, add_ref, g_ref, b_ref, o_ref):
    # patch embedding (normalize folded into w/add) + class/pos emb + ln_pre
    tok = jnp.dot(feat_ref[...].astype(jnp.bfloat16), w_ref[...],
                  preferred_element_type=jnp.float32)
    x = tok + add_ref[...]
    o_ref[...] = _ln(x, g_ref[...], b_ref[...])


def _blocks_kernel(x0_ref, ln1g_ref, ln1b_ref, qkvw_ref, qkvb_ref,
                   outw_ref, outb_ref, ln2g_ref, ln2b_ref,
                   fcw_ref, fcb_ref, projw_ref, projb_ref,
                   lnpg_ref, lnpb_ref, vproj_ref,
                   o_ref, x_scr):
    layer = pl.program_id(0)

    @pl.when(layer == 0)
    def _():
        x_scr[...] = x0_ref[...]

    x = x_scr[...]                                        # [T, WIDTH] f32

    # ---------- multi-head self-attention sub-block ----------
    h = _ln(x, ln1g_ref[...], ln1b_ref[...])
    qkv = jnp.dot(h.astype(jnp.bfloat16), qkvw_ref[...],
                  preferred_element_type=jnp.float32) + qkvb_ref[...]

    # mask out padded key positions (SEQ..SEQ_PAD-1)
    kidx = lax.broadcasted_iota(jnp.int32, (1, 1, SEQ_PAD), 2)
    neg = jnp.where(kidx < SEQ, 0.0, -1e30).astype(jnp.float32)

    heads = []
    for hd in range(HEADS):                                # static unroll, lane slices
        q = qkv[:, hd * HEAD_DIM:(hd + 1) * HEAD_DIM].reshape(B, SEQ_PAD, HEAD_DIM)
        k = qkv[:, WIDTH + hd * HEAD_DIM:WIDTH + (hd + 1) * HEAD_DIM
                ].reshape(B, SEQ_PAD, HEAD_DIM)
        v = qkv[:, 2 * WIDTH + hd * HEAD_DIM:2 * WIDTH + (hd + 1) * HEAD_DIM
                ].reshape(B, SEQ_PAD, HEAD_DIM)
        s = jnp.einsum("bqd,bkd->bqk",
                       q.astype(jnp.bfloat16), k.astype(jnp.bfloat16),
                       preferred_element_type=jnp.float32) * SCALE + neg
        m = jnp.max(s, axis=-1, keepdims=True)
        p = jnp.exp(s - m)
        p = p * pl.reciprocal(jnp.sum(p, axis=-1, keepdims=True), approx=True)
        o_h = jnp.einsum("bqk,bkd->bqd",
                         p.astype(jnp.bfloat16), v.astype(jnp.bfloat16),
                         preferred_element_type=jnp.float32)
        heads.append(o_h)

    attn = jnp.concatenate(heads, axis=-1).reshape(T, WIDTH)   # heads stay packed
    attn = jnp.dot(attn.astype(jnp.bfloat16), outw_ref[...],
                   preferred_element_type=jnp.float32) + outb_ref[...]
    x = x + attn                                               # fused residual

    # ---------- MLP sub-block with QuickGELU ----------
    h = _ln(x, ln2g_ref[...], ln2b_ref[...])
    h = jnp.dot(h.astype(jnp.bfloat16), fcw_ref[...],
                preferred_element_type=jnp.float32) + fcb_ref[...]
    h = h * jax.nn.sigmoid(1.702 * h)                          # QuickGELU (f32)
    h = jnp.dot(h.astype(jnp.bfloat16), projw_ref[...],
                preferred_element_type=jnp.float32) + projb_ref[...]
    x = x + h                                                  # fused residual
    x_scr[...] = x

    # ---------- fused head: class token -> ln_post -> visual projection ----------
    @pl.when(layer == LAYERS - 1)
    def _():
        cls = jnp.concatenate(
            [x[b * SEQ_PAD:b * SEQ_PAD + 1, :] for b in range(B)], axis=0)
        cls = _ln(cls, lnpg_ref[...], lnpb_ref[...])
        o_ref[...] = jnp.dot(cls.astype(jnp.bfloat16), vproj_ref[...],
                             preferred_element_type=jnp.float32)


# ---------------- parameters (deterministic synthetic init) ----------------
def init_params(key):
    keys = iter(jax.random.split(key, 64))

    def nrm(shape, scale=0.02):
        return scale * jax.random.normal(next(keys), shape, dtype=jnp.float32)

    params = {
        "patch_w": nrm((CPP, WIDTH)),            # conv1 as matmul
        "class_emb": nrm((WIDTH,)),
        "pos_emb": nrm((SEQ, WIDTH)),
        "ln_pre_g": jnp.ones((WIDTH,), jnp.float32),
        "ln_pre_b": jnp.zeros((WIDTH,), jnp.float32),
        "ln_post_g": jnp.ones((WIDTH,), jnp.float32),
        "ln_post_b": jnp.zeros((WIDTH,), jnp.float32),
        "visual_proj": nrm((WIDTH, EMBED)),
        "blocks": [],
    }
    for _ in range(LAYERS):
        params["blocks"].append({
            "ln1_g": jnp.ones((WIDTH,), jnp.float32),
            "ln1_b": jnp.zeros((WIDTH,), jnp.float32),
            "qkv_w": nrm((WIDTH, 3 * WIDTH)),
            "qkv_b": jnp.zeros((3 * WIDTH,), jnp.float32),
            "out_w": nrm((WIDTH, WIDTH)),
            "out_b": jnp.zeros((WIDTH,), jnp.float32),
            "ln2_g": jnp.ones((WIDTH,), jnp.float32),
            "ln2_b": jnp.zeros((WIDTH,), jnp.float32),
            "fc_w": nrm((WIDTH, MLP_DIM)),
            "fc_b": jnp.zeros((MLP_DIM,), jnp.float32),
            "proj_w": nrm((MLP_DIM, WIDTH)),
            "proj_b": jnp.zeros((WIDTH,), jnp.float32),
        })
    return params


def prepare_params(p):
    """Fold the CLIP normalize into the patch weights, pad/stack/cast for kernels."""
    inv_std = 1.0 / CLIP_STD                                   # [C]
    scale_f = jnp.repeat(inv_std, PATCH * PATCH)               # per-feature 1/std
    shift_f = jnp.repeat(CLIP_MEAN * inv_std, PATCH * PATCH)   # per-feature mean/std
    w_fold = p["patch_w"] * scale_f[:, None]                   # [CPP, WIDTH]
    b_fold = -(shift_f[None, :] @ p["patch_w"])                # [1, WIDTH]

    # additive embedding: class row, folded bias on patch rows, +pos, pad rows = 0
    pos_pad = jnp.pad(p["pos_emb"], ((0, SEQ_PAD - SEQ), (0, 0)))
    add = jnp.zeros((SEQ_PAD, WIDTH), jnp.float32)
    add = add.at[0, :].set(p["class_emb"])
    add = add.at[1:SEQ, :].add(jnp.broadcast_to(b_fold, (N_PATCH, WIDTH)))
    add = add + pos_pad
    add_emb = jnp.tile(add, (B, 1))                            # [T, WIDTH]

    def stack(name):
        return jnp.stack([blk[name] for blk in p["blocks"]], axis=0)

    return {
        "w_fold": w_fold.astype(jnp.bfloat16),
        "add_emb": add_emb,
        "ln_pre_g": p["ln_pre_g"].reshape(1, WIDTH),
        "ln_pre_b": p["ln_pre_b"].reshape(1, WIDTH),
        "ln_post_g": p["ln_post_g"].reshape(1, WIDTH),
        "ln_post_b": p["ln_post_b"].reshape(1, WIDTH),
        "visual_proj": p["visual_proj"].astype(jnp.bfloat16),
        "ln1_g": stack("ln1_g").reshape(LAYERS, 1, WIDTH),
        "ln1_b": stack("ln1_b").reshape(LAYERS, 1, WIDTH),
        "qkv_w": stack("qkv_w").astype(jnp.bfloat16),          # [L, W, 3W]
        "qkv_b": stack("qkv_b").reshape(LAYERS, 1, 3 * WIDTH),
        "out_w": stack("out_w").astype(jnp.bfloat16),          # [L, W, W]
        "out_b": stack("out_b").reshape(LAYERS, 1, WIDTH),
        "ln2_g": stack("ln2_g").reshape(LAYERS, 1, WIDTH),
        "ln2_b": stack("ln2_b").reshape(LAYERS, 1, WIDTH),
        "fc_w": stack("fc_w").astype(jnp.bfloat16),            # [L, W, MLP]
        "fc_b": stack("fc_b").reshape(LAYERS, 1, MLP_DIM),
        "proj_w": stack("proj_w").astype(jnp.bfloat16),        # [L, MLP, W]
        "proj_b": stack("proj_b").reshape(LAYERS, 1, WIDTH),
    }


# ---------------- forward (CLIP encode_image semantics) ----------------
def encode_image(img, kp):
    # TODO(synk): Resize(224, bicubic) + CenterCrop(224) from the torchvision
    # preprocess have no clean Pallas equivalent; input is assumed pre-sized.
    # Normalize((mean),(std)) is folded into w_fold / add_emb (see prepare_params).

    # patch extraction: strided conv == unfold (pure layout glue) + in-kernel matmul
    x = img.reshape(B, C, GRID, PATCH, GRID, PATCH)
    pix = x.transpose(0, 2, 4, 1, 3, 5).reshape(B, N_PATCH, CPP)
    feat = jnp.pad(pix, ((0, 0), (1, SEQ_PAD - SEQ), (0, 0))).reshape(T, CPP)

    # ---- kernel 1: patch embed + class/pos emb + ln_pre ----
    x0 = pl.pallas_call(
        _embed_kernel,
        out_shape=jax.ShapeDtypeStruct((T, WIDTH), jnp.float32),
        grid=(1,),
        in_specs=[
            pl.BlockSpec((T, CPP), lambda i: (0, 0)),
            pl.BlockSpec((CPP, WIDTH), lambda i: (0, 0)),
            pl.BlockSpec((T, WIDTH), lambda i: (0, 0)),
            pl.BlockSpec((1, WIDTH), lambda i: (0, 0)),
            pl.BlockSpec((1, WIDTH), lambda i: (0, 0)),
        ],
        out_specs=pl.BlockSpec((T, WIDTH), lambda i: (0, 0)),
        compiler_params=pltpu.CompilerParams(dimension_semantics=("arbitrary",)),
    )(feat, kp["w_fold"], kp["add_emb"], kp["ln_pre_g"], kp["ln_pre_b"])

    # ---- kernel 2: all transformer blocks + ln_post + visual projection ----
    def _layer_spec(shape):
        nd = len(shape) - 1
        return pl.BlockSpec((None,) + tuple(shape[1:]),
                            lambda l, _nd=nd: (l,) + (0,) * _nd)

    def _const_spec(shape):
        nd = len(shape)
        return pl.BlockSpec(tuple(shape), lambda l, _nd=nd: (0,) * _nd)

    emb = pl.pallas_call(
        _blocks_kernel,
        out_shape=jax.ShapeDtypeStruct((B, EMBED), jnp.float32),
        grid=(LAYERS,),
        in_specs=[
            _const_spec((T, WIDTH)),
            _layer_spec(kp["ln1_g"].shape),
            _layer_spec(kp["ln1_b"].shape),
            _layer_spec(kp["qkv_w"].shape),
            _layer_spec(kp["qkv_b"].shape),
            _layer_spec(kp["out_w"].shape),
            _layer_spec(kp["out_b"].shape),
            _layer_spec(kp["ln2_g"].shape),
            _layer_spec(kp["ln2_b"].shape),
            _layer_spec(kp["fc_w"].shape),
            _layer_spec(kp["fc_b"].shape),
            _layer_spec(kp["proj_w"].shape),
            _layer_spec(kp["proj_b"].shape),
            _const_spec((1, WIDTH)),
            _const_spec((1, WIDTH)),
            _const_spec((WIDTH, EMBED)),
        ],
        out_specs=pl.BlockSpec((B, EMBED), lambda l: (0, 0)),
        scratch_shapes=[pltpu.VMEM((T, WIDTH), jnp.float32)],
        compiler_params=pltpu.CompilerParams(dimension_semantics=("arbitrary",)),
    )(x0,
      kp["ln1_g"], kp["ln1_b"], kp["qkv_w"], kp["qkv_b"],
      kp["out_w"], kp["out_b"], kp["ln2_g"], kp["ln2_b"],
      kp["fc_w"], kp["fc_b"], kp["proj_w"], kp["proj_b"],
      kp["ln_post_g"], kp["ln_post_b"], kp["visual_proj"])
    return emb


if __name__ == "__main__":
    key = jax.random.PRNGKey(0)
    pkey, ikey = jax.random.split(key)
    raw_params = init_params(pkey)
    kparams = prepare_params(raw_params)
    img = jax.random.uniform(ikey, (B, C, IMG, IMG), dtype=jnp.float32)

    fwd = jax.jit(encode_image)
    out = jax.block_until_ready(fwd(img, kparams))
    assert out.shape == (B, EMBED), out.shape
    assert jnp.all(jnp.isfinite(out))
    print("KERNEL_OK")
</pallas_src>

<mosaic_0001>
module attributes {stable_mosaic.version = 11 : i64} {
  func.func @_embed_kernel(%arg0: i32, %arg1: memref<48x192xf32, #tpu.memory_space<vmem>>, %arg2: memref<192x64xbf16, #tpu.memory_space<vmem>>, %arg3: memref<48x64xf32, #tpu.memory_space<vmem>>, %arg4: memref<1x64xf32, #tpu.memory_space<vmem>>, %arg5: memref<1x64xf32, #tpu.memory_space<vmem>>, %arg6: memref<48x64xf32, #tpu.memory_space<vmem>>) attributes {dimension_semantics = [#tpu.dimension_semantics<arbitrary>], iteration_bounds = array<i64: 1>, scalar_prefetch = 0 : i64, scratch_operands = 0 : i64, tpu.core_type = #tpu.core_type<tc>, window_params = [{pipeline_mode = #tpu.pipeline_mode<synchronous>, transform_indices = @transform_0, window_bounds = array<i64: 48, 192>}, {pipeline_mode = #tpu.pipeline_mode<synchronous>, transform_indices = @transform_1, window_bounds = array<i64: 192, 64>}, {pipeline_mode = #tpu.pipeline_mode<synchronous>, transform_indices = @transform_2, window_bounds = array<i64: 48, 64>}, {pipeline_mode = #tpu.pipeline_mode<synchronous>, transform_indices = @transform_3, window_bounds = array<i64: 1, 64>}, {pipeline_mode = #tpu.pipeline_mode<synchronous>, transform_indices = @transform_4, window_bounds = array<i64: 1, 64>}, {pipeline_mode = #tpu.pipeline_mode<synchronous>, transform_indices = @transform_5, window_bounds = array<i64: 48, 64>}]} {
    %c0 = arith.constant 0 : index
    %c0_0 = arith.constant 0 : index
    %0 = vector.load %arg1[%c0, %c0_0] : memref<48x192xf32, #tpu.memory_space<vmem>>, vector<48x192xf32>
    %1 = arith.truncf %0 : vector<48x192xf32> to vector<48x192xbf16>
    %c0_1 = arith.constant 0 : index
    %c0_2 = arith.constant 0 : index
    %2 = vector.load %arg2[%c0_1, %c0_2] : memref<192x64xbf16, #tpu.memory_space<vmem>>, vector<192x64xbf16>
    %cst = arith.constant dense<0.000000e+00> : vector<48x64xf32>
    %3 = tpu.matmul %1, %2, %cst {dimension_numbers = #tpu.dot_dimension_numbers<[1], [0], [0], [1], [0, 0, 1, 1], [], []>} : vector<48x192xbf16>, vector<192x64xbf16>, vector<48x64xf32> -> vector<48x64xf32>
    %c0_3 = arith.constant 0 : index
    %c0_4 = arith.constant 0 : index
    %4 = vector.load %arg3[%c0_3, %c0_4] : memref<48x64xf32, #tpu.memory_space<vmem>>, vector<48x64xf32>
    %5 = arith.addf %3, %4 : vector<48x64xf32>
    %c0_5 = arith.constant 0 : index
    %c0_6 = arith.constant 0 : index
    %6 = vector.load %arg4[%c0_5, %c0_6] : memref<1x64xf32, #tpu.memory_space<vmem>>, vector<1x64xf32>
    %c0_7 = arith.constant 0 : index
    %c0_8 = arith.constant 0 : index
    %7 = vector.load %arg5[%c0_7, %c0_8] : memref<1x64xf32, #tpu.memory_space<vmem>>, vector<1x64xf32>
    %cst_9 = arith.constant dense<0.000000e+00> : vector<48xf32>
    %8 = vector.multi_reduction <add>, %5, %cst_9 [1] : vector<48x64xf32> to vector<48xf32>
    %9 = vector.shape_cast %8 : vector<48xf32> to vector<48x1xf32>
    %cst_10 = arith.constant 6.400000e+01 : f32
    %10 = vector.broadcast %cst_10 : f32 to vector<48x1xf32>
    %11 = arith.divf %9, %10 : vector<48x1xf32>
    %12 = vector.broadcast %11 : vector<48x1xf32> to vector<48x64xf32>
    %13 = arith.subf %5, %12 : vector<48x64xf32>
    %14 = arith.mulf %13, %13 : vector<48x64xf32>
    %cst_11 = arith.constant dense<0.000000e+00> : vector<48xf32>
    %15 = vector.multi_reduction <add>, %14, %cst_11 [1] : vector<48x64xf32> to vector<48xf32>
    %16 = vector.shape_cast %15 : vector<48xf32> to vector<48x1xf32>
    %cst_12 = arith.constant 6.400000e+01 : f32
    %17 = vector.broadcast %cst_12 : f32 to vector<48x1xf32>
    %18 = arith.divf %16, %17 : vector<48x1xf32>
    %cst_13 = arith.constant 9.99999974E-6 : f32
    %19 = vector.broadcast %cst_13 : f32 to vector<48x1xf32>
    %20 = arith.addf %18, %19 : vector<48x1xf32>
    %21 = math.rsqrt %20 : vector<48x1xf32>
    %22 = vector.broadcast %21 : vector<48x1xf32> to vector<48x64xf32>
    %23 = arith.mulf %13, %22 : vector<48x64xf32>
    %24 = vector.broadcast %6 : vector<1x64xf32> to vector<48x64xf32>
    %25 = arith.mulf %23, %24 : vector<48x64xf32>
    %26 = vector.broadcast %7 : vector<1x64xf32> to vector<48x64xf32>
    %27 = arith.addf %25, %26 : vector<48x64xf32>
    %c0_14 = arith.constant 0 : index
    %c0_15 = arith.constant 0 : index
    %28 = vector.load %arg6[%c0_14, %c0_15] : memref<48x64xf32, #tpu.memory_space<vmem>>, vector<48x64xf32>
    tpu.vector_store %arg6[%c0_14, %c0_15], %27 {strides = array<i32>} : memref<48x64xf32, #tpu.memory_space<vmem>>, vector<48x64xf32>,
    return
  }
  func.func @transform_0(%arg0: i32) -> (i32, i32) {
    %c0_i32 = arith.constant 0 : i32
    %c0_i32_0 = arith.constant 0 : i32
    %c0_i32_1 = arith.constant 0 : i32
    return %c0_i32, %c0_i32_0 : i32, i32
  }
  func.func @transform_1(%arg0: i32) -> (i32, i32) {
    %c0_i32 = arith.constant 0 : i32
    %c0_i32_0 = arith.constant 0 : i32
    %c0_i32_1 = arith.constant 0 : i32
    return %c0_i32, %c0_i32_0 : i32, i32
  }
  func.func @transform_2(%arg0: i32) -> (i32, i32) {
    %c0_i32 = arith.constant 0 : i32
    %c0_i32_0 = arith.constant 0 : i32
    %c0_i32_1 = arith.constant 0 : i32
    return %c0_i32, %c0_i32_0 : i32, i32
  }
  func.func @transform_3(%arg0: i32) -> (i32, i32) {
    %c0_i32 = arith.constant 0 : i32
    %c0_i32_0 = arith.constant 0 : i32
    %c0_i32_1 = arith.constant 0 : i32
    return %c0_i32, %c0_i32_0 : i32, i32
  }
  func.func @transform_4(%arg0: i32) -> (i32, i32) {
    %c0_i32 = arith.constant 0 : i32
    %c0_i32_0 = arith.constant 0 : i32
    %c0_i32_1 = arith.constant 0 : i32
    return %c0_i32, %c0_i32_0 : i32, i32
  }
  func.func @transform_5(%arg0: i32) -> (i32, i32) {
    %c0_i32 = arith.constant 0 : i32
    %c0_i32_0 = arith.constant 0 : i32
    %c0_i32_1 = arith.constant 0 : i32
    return %c0_i32, %c0_i32_0 : i32, i32
  }
}

module attributes {stable_mosaic.version = 11 : i64} {
  func.func @_blocks_kernel(%arg0: i32, %arg1: memref<48x64xf32, #tpu.memory_space<vmem>>, %arg2: memref<1x1x64xf32, #tpu.memory_space<vmem>>, %arg3: memref<1x1x64xf32, #tpu.memory_space<vmem>>, %arg4: memref<1x64x192xbf16, #tpu.memory_space<vmem>>, %arg5: memref<1x1x192xf32, #tpu.memory_space<vmem>>, %arg6: memref<1x64x64xbf16, #tpu.memory_space<vmem>>, %arg7: memref<1x1x64xf32, #tpu.memory_space<vmem>>, %arg8: memref<1x1x64xf32, #tpu.memory_space<vmem>>, %arg9: memref<1x1x64xf32, #tpu.memory_space<vmem>>, %arg10: memref<1x64x256xbf16, #tpu.memory_space<vmem>>, %arg11: memref<1x1x256xf32, #tpu.memory_space<vmem>>, %arg12: memref<1x256x64xbf16, #tpu.memory_space<vmem>>, %arg13: memref<1x1x64xf32, #tpu.memory_space<vmem>>, %arg14: memref<1x64xf32, #tpu.memory_space<vmem>>, %arg15: memref<1x64xf32, #tpu.memory_space<vmem>>, %arg16: memref<64x32xbf16, #tpu.memory_space<vmem>>, %arg17: memref<2x32xf32, #tpu.memory_space<vmem>>, %arg18: memref<48x64xf32, #tpu.memory_space<vmem>>) attributes {dimension_semantics = [#tpu.dimension_semantics<arbitrary>], iteration_bounds = array<i64: 2>, scalar_prefetch = 0 : i64, scratch_operands = 1 : i64, tpu.core_type = #tpu.core_type<tc>, window_params = [{pipeline_mode = #tpu.pipeline_mode<synchronous>, transform_indices = @transform_0, window_bounds = array<i64: 48, 64>}, {transform_indices = @transform_1, window_bounds = array<i64: 1, 1, 64>}, {transform_indices = @transform_2, window_bounds = array<i64: 1, 1, 64>}, {transform_indices = @transform_3, window_bounds = array<i64: 1, 64, 192>}, {transform_indices = @transform_4, window_bounds = array<i64: 1, 1, 192>}, {transform_indices = @transform_5, window_bounds = array<i64: 1, 64, 64>}, {transform_indices = @transform_6, window_bounds = array<i64: 1, 1, 64>}, {transform_indices = @transform_7, window_bounds = array<i64: 1, 1, 64>}, {transform_indices = @transform_8, window_bounds = array<i64: 1, 1, 64>}, {transform_indices = @transform_9, window_bounds = array<i64: 1, 64, 256>}, {transform_indices = @transform_10, window_bounds = array<i64: 1, 1, 256>}, {transform_indices = @transform_11, window_bounds = array<i64: 1, 256, 64>}, {transform_indices = @transform_12, window_bounds = array<i64: 1, 1, 64>}, {pipeline_mode = #tpu.pipeline_mode<synchronous>, transform_indices = @transform_13, window_bounds = array<i64: 1, 64>}, {pipeline_mode = #tpu.pipeline_mode<synchronous>, transform_indices = @transform_14, window_bounds = array<i64: 1, 64>}, {pipeline_mode = #tpu.pipeline_mode<synchronous>, transform_indices = @transform_15, window_bounds = array<i64: 64, 32>}, {pipeline_mode = #tpu.pipeline_mode<synchronous>, transform_indices = @transform_16, window_bounds = array<i64: 2, 32>}]} {
    %c0_i32 = arith.constant 0 : i32
    %0 = arith.cmpi eq, %arg0, %c0_i32 : i32
    %1 = arith.extui %0 : i1 to i32
    %c0_i32_0 = arith.constant 0 : i32
    %2 = arith.cmpi ne, %1, %c0_i32_0 : i32
    scf.if %2 {
      %c0_78 = arith.constant 0 : index
      %c0_79 = arith.constant 0 : index
      %210 = vector.load %arg1[%c0_78, %c0_79] : memref<48x64xf32, #tpu.memory_space<vmem>>, vector<48x64xf32>
      %c0_80 = arith.constant 0 : index
      %c0_81 = arith.constant 0 : index
      %211 = vector.load %arg18[%c0_80, %c0_81] : memref<48x64xf32, #tpu.memory_space<vmem>>, vector<48x64xf32>
      tpu.vector_store %arg18[%c0_80, %c0_81], %210 {strides = array<i32>} : memref<48x64xf32, #tpu.memory_space<vmem>>, vector<48x64xf32>,
    } else {
    }
    %c0 = arith.constant 0 : index
    %c0_1 = arith.constant 0 : index
    %3 = vector.load %arg18[%c0, %c0_1] : memref<48x64xf32, #tpu.memory_space<vmem>>, vector<48x64xf32>
    %c0_2 = arith.constant 0 : index
    %c0_3 = arith.constant 0 : index
    %c0_4 = arith.constant 0 : index
    %4 = vector.load %arg2[%c0_2, %c0_3, %c0_4] : memref<1x1x64xf32, #tpu.memory_space<vmem>>, vector<1x1x64xf32>
    %5 = vector.shape_cast %4 : vector<1x1x64xf32> to vector<1x64xf32>
    %c0_5 = arith.constant 0 : index
    %c0_6 = arith.constant 0 : index
    %c0_7 = arith.constant 0 : index
    %6 = vector.load %arg3[%c0_5, %c0_6, %c0_7] : memref<1x1x64xf32, #tpu.memory_space<vmem>>, vector<1x1x64xf32>
    %7 = vector.shape_cast %6 : vector<1x1x64xf32> to vector<1x64xf32>
    %cst = arith.constant dense<0.000000e+00> : vector<48xf32>
    %8 = vector.multi_reduction <add>, %3, %cst [1] : vector<48x64xf32> to vector<48xf32>
    %9 = vector.shape_cast %8 : vector<48xf32> to vector<48x1xf32>
    %cst_8 = arith.constant 6.400000e+01 : f32
    %10 = vector.broadcast %cst_8 : f32 to vector<48x1xf32>
    %11 = arith.divf %9, %10 : vector<48x1xf32>
    %12 = vector.broadcast %11 : vector<48x1xf32> to vector<48x64xf32>
    %13 = arith.subf %3, %12 : vector<48x64xf32>
    %14 = arith.mulf %13, %13 : vector<48x64xf32>
    %cst_9 = arith.constant dense<0.000000e+00> : vector<48xf32>
    %15 = vector.multi_reduction <add>, %14, %cst_9 [1] : vector<48x64xf32> to vector<48xf32>
    %16 = vector.shape_cast %15 : vector<48xf32> to vector<48x1xf32>
    %cst_10 = arith.constant 6.400000e+01 : f32
    %17 = vector.broadcast %cst_10 : f32 to vector<48x1xf32>
    %18 = arith.divf %16, %17 : vector<48x1xf32>
    %cst_11 = arith.constant 9.99999974E-6 : f32
    %19 = vector.broadcast %cst_11 : f32 to vector<48x1xf32>
    %20 = arith.addf %18, %19 : vector<48x1xf32>
    %21 = math.rsqrt %20 : vector<48x1xf32>
    %22 = vector.broadcast %21 : vector<48x1xf32> to vector<48x64xf32>
    %23 = arith.mulf %13, %22 : vector<48x64xf32>
    %24 = vector.broadcast %5 : vector<1x64xf32> to vector<48x64xf32>
    %25 = arith.mulf %23, %24 : vector<48x64xf32>
    %26 = vector.broadcast %7 : vector<1x64xf32> to vector<48x64xf32>
    %27 = arith.addf %25, %26 : vector<48x64xf32>
    %28 = arith.truncf %27 : vector<48x64xf32> to vector<48x64xbf16>
    %c0_12 = arith.constant 0 : index
    %c0_13 = arith.constant 0 : index
    %c0_14 = arith.constant 0 : index
    %29 = vector.load %arg4[%c0_12, %c0_13, %c0_14] : memref<1x64x192xbf16, #tpu.memory_space<vmem>>, vector<1x64x192xbf16>
    %30 = vector.shape_cast %29 : vector<1x64x192xbf16> to vector<64x192xbf16>
    %cst_15 = arith.constant dense<0.000000e+00> : vector<48x192xf32>
    %31 = tpu.matmul %28, %30, %cst_15 {dimension_numbers = #tpu.dot_dimension_numbers<[1], [0], [0], [1], [0, 0, 1, 1], [], []>} : vector<48x64xbf16>, vector<64x192xbf16>, vector<48x192xf32> -> vector<48x192xf32>
    %c0_16 = arith.constant 0 : index
    %c0_17 = arith.constant 0 : index
    %c0_18 = arith.constant 0 : index
    %32 = vector.load %arg5[%c0_16, %c0_17, %c0_18] : memref<1x1x192xf32, #tpu.memory_space<vmem>>, vector<1x1x192xf32>
    %33 = vector.shape_cast %32 : vector<1x1x192xf32> to vector<1x192xf32>
    %34 = vector.broadcast %33 : vector<1x192xf32> to vector<48x192xf32>
    %35 = arith.addf %31, %34 : vector<48x192xf32>
    %36 = tpu.iota {dimensions = array<i32: 2>} : vector<1x1x24xi32>
    %c17_i32 = arith.constant 17 : i32
    %37 = vector.broadcast %c17_i32 : i32 to vector<1x1x24xi32>
    %38 = arith.cmpi slt, %36, %37 : vector<1x1x24xi32>
    %cst_19 = arith.constant 0.000000e+00 : f32
    %cst_20 = arith.constant -1.000000e+30 : f32
    %39 = vector.broadcast %cst_19 : f32 to vector<1x1x24xf32>
    %40 = vector.broadcast %cst_20 : f32 to vector<1x1x24xf32>
    %41 = arith.select %38, %39, %40 : vector<1x1x24xi1>, vector<1x1x24xf32>
    %42 = vector.extract_strided_slice %35 {offsets = [0, 0], sizes = [48, 16], strides = [1, 1]} : vector<48x192xf32> to vector<48x16xf32>
    %43 = vector.shape_cast %42 : vector<48x16xf32> to vector<2x24x16xf32>
    %44 = vector.extract_strided_slice %35 {offsets = [0, 64], sizes = [48, 16], strides = [1, 1]} : vector<48x192xf32> to vector<48x16xf32>
    %45 = vector.shape_cast %44 : vector<48x16xf32> to vector<2x24x16xf32>
    %46 = vector.extract_strided_slice %35 {offsets = [0, 128], sizes = [48, 16], strides = [1, 1]} : vector<48x192xf32> to vector<48x16xf32>
    %47 = vector.shape_cast %46 : vector<48x16xf32> to vector<2x24x16xf32>
    %48 = arith.truncf %43 : vector<2x24x16xf32> to vector<2x24x16xbf16>
    %49 = arith.truncf %45 : vector<2x24x16xf32> to vector<2x24x16xbf16>
    "tpu.trace_start"() <{level = 10 : i32, message = "bqd,bkd->bqk"}> : () -> ()
    %cst_21 = arith.constant dense<0.000000e+00> : vector<2x24x24xf32>
    %50 = tpu.matmul %48, %49, %cst_21 {dimension_numbers = #tpu.dot_dimension_numbers<[2], [2], [1], [1], [0, 0, 0, 1, 1, 1], [0], [0]>} : vector<2x24x16xbf16>, vector<2x24x16xbf16>, vector<2x24x24xf32> -> vector<2x24x24xf32>
    "tpu.trace_stop"() : () -> ()
    %cst_22 = arith.constant 2.500000e-01 : f32
    %51 = vector.broadcast %cst_22 : f32 to vector<2x24x24xf32>
    %52 = arith.mulf %50, %51 : vector<2x24x24xf32>
    %53 = vector.broadcast %41 : vector<1x1x24xf32> to vector<2x24x24xf32>
    %54 = arith.addf %52, %53 : vector<2x24x24xf32>
    %cst_23 = arith.constant dense<0xFF800000> : vector<2x24xf32>
    %55 = vector.multi_reduction <maximumf>, %54, %cst_23 [2] : vector<2x24x24xf32> to vector<2x24xf32>
    %56 = vector.shape_cast %55 : vector<2x24xf32> to vector<2x24x1xf32>
    %57 = vector.broadcast %56 : vector<2x24x1xf32> to vector<2x24x24xf32>
    %58 = arith.subf %54, %57 : vector<2x24x24xf32>
    %59 = math.exp %58 : vector<2x24x24xf32>
    %cst_24 = arith.constant dense<0.000000e+00> : vector<2x24xf32>
    %60 = vector.multi_reduction <add>, %59, %cst_24 [2] : vector<2x24x24xf32> to vector<2x24xf32>
    %61 = vector.shape_cast %60 : vector<2x24xf32> to vector<2x24x1xf32>
    %62 = tpu.reciprocal %61 {approx = true} : vector<2x24x1xf32> -> vector<2x24x1xf32>
    %63 = vector.broadcast %62 : vector<2x24x1xf32> to vector<2x24x24xf32>
    %64 = arith.mulf %59, %63 : vector<2x24x24xf32>
    %65 = arith.truncf %64 : vector<2x24x24xf32> to vector<2x24x24xbf16>
    %66 = arith.truncf %47 : vector<2x24x16xf32> to vector<2x24x16xbf16>
    "tpu.trace_start"() <{level = 10 : i32, message = "bqk,bkd->bqd"}> : () -> ()
    %cst_25 = arith.constant dense<0.000000e+00> : vector<2x24x16xf32>
    %67 = tpu.matmul %65, %66, %cst_25 {dimension_numbers = #tpu.dot_dimension_numbers<[2], [1], [1], [2], [0, 0, 0, 1, 1, 2], [0], [0]>} : vector<2x24x24xbf16>, vector<2x24x16xbf16>, vector<2x24x16xf32> -> vector<2x24x16xf32>
    "tpu.trace_stop"() : () -> ()
    %68 = vector.extract_strided_slice %35 {offsets = [0, 16], sizes = [48, 16], strides = [1, 1]} : vector<48x192xf32> to vector<48x16xf32>
    %69 = vector.shape_cast %68 : vector<48x16xf32> to vector<2x24x16xf32>
    %70 = vector.extract_strided_slice %35 {offsets = [0, 80], sizes = [48, 16], strides = [1, 1]} : vector<48x192xf32> to vector<48x16xf32>
    %71 = vector.shape_cast %70 : vector<48x16xf32> to vector<2x24x16xf32>
    %72 = vector.extract_strided_slice %35 {offsets = [0, 144], sizes = [48, 16], strides = [1, 1]} : vector<48x192xf32> to vector<48x16xf32>
    %73 = vector.shape_cast %72 : vector<48x16xf32> to vector<2x24x16xf32>
    %74 = arith.truncf %69 : vector<2x24x16xf32> to vector<2x24x16xbf16>
    %75 = arith.truncf %71 : vector<2x24x16xf32> to vector<2x24x16xbf16>
    "tpu.trace_start"() <{level = 10 : i32, message = "bqd,bkd->bqk"}> : () -> ()
    %cst_26 = arith.constant dense<0.000000e+00> : vector<2x24x24xf32>
    %76 = tpu.matmul %74, %75, %cst_26 {dimension_numbers = #tpu.dot_dimension_numbers<[2], [2], [1], [1], [0, 0, 0, 1, 1, 1], [0], [0]>} : vector<2x24x16xbf16>, vector<2x24x16xbf16>, vector<2x24x24xf32> -> vector<2x24x24xf32>
    "tpu.trace_stop"() : () -> ()
    %cst_27 = arith.constant 2.500000e-01 : f32
    %77 = vector.broadcast %cst_27 : f32 to vector<2x24x24xf32>
    %78 = arith.mulf %76, %77 : vector<2x24x24xf32>
    %79 = vector.broadcast %41 : vector<1x1x24xf32> to vector<2x24x24xf32>
    %80 = arith.addf %78, %79 : vector<2x24x24xf32>
    %cst_28 = arith.constant dense<0xFF800000> : vector<2x24xf32>
    %81 = vector.multi_reduction <maximumf>, %80, %cst_28 [2] : vector<2x24x24xf32> to vector<2x24xf32>
    %82 = vector.shape_cast %81 : vector<2x24xf32> to vector<2x24x1xf32>
    %83 = vector.broadcast %82 : vector<2x24x1xf32> to vector<2x24x24xf32>
    %84 = arith.subf %80, %83 : vector<2x24x24xf32>
    %85 = math.exp %84 : vector<2x24x24xf32>
    %cst_29 = arith.constant dense<0.000000e+00> : vector<2x24xf32>
    %86 = vector.multi_reduction <add>, %85, %cst_29 [2] : vector<2x24x24xf32> to vector<2x24xf32>
    %87 = vector.shape_cast %86 : vector<2x24xf32> to vector<2x24x1xf32>
    %88 = tpu.reciprocal %87 {approx = true} : vector<2x24x1xf32> -> vector<2x24x1xf32>
    %89 = vector.broadcast %88 : vector<2x24x1xf32> to vector<2x24x24xf32>
    %90 = arith.mulf %85, %89 : vector<2x24x24xf32>
    %91 = arith.truncf %90 : vector<2x24x24xf32> to vector<2x24x24xbf16>
    %92 = arith.truncf %73 : vector<2x24x16xf32> to vector<2x24x16xbf16>
    "tpu.trace_start"() <{level = 10 : i32, message = "bqk,bkd->bqd"}> : () -> ()
    %cst_30 = arith.constant dense<0.000000e+00> : vector<2x24x16xf32>
    %93 = tpu.matmul %91, %92, %cst_30 {dimension_numbers = #tpu.dot_dimension_numbers<[2], [1], [1], [2], [0, 0, 0, 1, 1, 2], [0], [0]>} : vector<2x24x24xbf16>, vector<2x24x16xbf16>, vector<2x24x16xf32> -> vector<2x24x16xf32>
    "tpu.trace_stop"() : () -> ()
    %94 = vector.extract_strided_slice %35 {offsets = [0, 32], sizes = [48, 16], strides = [1, 1]} : vector<48x192xf32> to vector<48x16xf32>
    %95 = vector.shape_cast %94 : vector<48x16xf32> to vector<2x24x16xf32>
    %96 = vector.extract_strided_slice %35 {offsets = [0, 96], sizes = [48, 16], strides = [1, 1]} : vector<48x192xf32> to vector<48x16xf32>
    %97 = vector.shape_cast %96 : vector<48x16xf32> to vector<2x24x16xf32>
    %98 = vector.extract_strided_slice %35 {offsets = [0, 160], sizes = [48, 16], strides = [1, 1]} : vector<48x192xf32> to vector<48x16xf32>
    %99 = vector.shape_cast %98 : vector<48x16xf32> to vector<2x24x16xf32>
    %100 = arith.truncf %95 : vector<2x24x16xf32> to vector<2x24x16xbf16>
    %101 = arith.truncf %97 : vector<2x24x16xf32> to vector<2x24x16xbf16>
    "tpu.trace_start"() <{level = 10 : i32, message = "bqd,bkd->bqk"}> : () -> ()
    %cst_31 = arith.constant dense<0.000000e+00> : vector<2x24x24xf32>
    %102 = tpu.matmul %100, %101, %cst_31 {dimension_numbers = #tpu.dot_dimension_numbers<[2], [2], [1], [1], [0, 0, 0, 1, 1, 1], [0], [0]>} : vector<2x24x16xbf16>, vector<2x24x16xbf16>, vector<2x24x24xf32> -> vector<2x24x24xf32>
    "tpu.trace_stop"() : () -> ()
    %cst_32 = arith.constant 2.500000e-01 : f32
    %103 = vector.broadcast %cst_32 : f32 to vector<2x24x24xf32>
    %104 = arith.mulf %102, %103 : vector<2x24x24xf32>
    %105 = vector.broadcast %41 : vector<1x1x24xf32> to vector<2x24x24xf32>
    %106 = arith.addf %104, %105 : vector<2x24x24xf32>
    %cst_33 = arith.constant dense<0xFF800000> : vector<2x24xf32>
    %107 = vector.multi_reduction <maximumf>, %106, %cst_33 [2] : vector<2x24x24xf32> to vector<2x24xf32>
    %108 = vector.shape_cast %107 : vector<2x24xf32> to vector<2x24x1xf32>
    %109 = vector.broadcast %108 : vector<2x24x1xf32> to vector<2x24x24xf32>
    %110 = arith.subf %106, %109 : vector<2x24x24xf32>
    %111 = math.exp %110 : vector<2x24x24xf32>
    %cst_34 = arith.constant dense<0.000000e+00> : vector<2x24xf32>
    %112 = vector.multi_reduction <add>, %111, %cst_34 [2] : vector<2x24x24xf32> to vector<2x24xf32>
    %113 = vector.shape_cast %112 : vector<2x24xf32> to vector<2x24x1xf32>
    %114 = tpu.reciprocal %113 {approx = true} : vector<2x24x1xf32> -> vector<2x24x1xf32>
    %115 = vector.broadcast %114 : vector<2x24x1xf32> to vector<2x24x24xf32>
    %116 = arith.mulf %111, %115 : vector<2x24x24xf32>
    %117 = arith.truncf %116 : vector<2x24x24xf32> to vector<2x24x24xbf16>
    %118 = arith.truncf %99 : vector<2x24x16xf32> to vector<2x24x16xbf16>
    "tpu.trace_start"() <{level = 10 : i32, message = "bqk,bkd->bqd"}> : () -> ()
    %cst_35 = arith.constant dense<0.000000e+00> : vector<2x24x16xf32>
    %119 = tpu.matmul %117, %118, %cst_35 {dimension_numbers = #tpu.dot_dimension_numbers<[2], [1], [1], [2], [0, 0, 0, 1, 1, 2], [0], [0]>} : vector<2x24x24xbf16>, vector<2x24x16xbf16>, vector<2x24x16xf32> -> vector<2x24x16xf32>
    "tpu.trace_stop"() : () -> ()
    %120 = vector.extract_strided_slice %35 {offsets = [0, 48], sizes = [48, 16], strides = [1, 1]} : vector<48x192xf32> to vector<48x16xf32>
    %121 = vector.shape_cast %120 : vector<48x16xf32> to vector<2x24x16xf32>
    %122 = vector.extract_strided_slice %35 {offsets = [0, 112], sizes = [48, 16], strides = [1, 1]} : vector<48x192xf32> to vector<48x16xf32>
    %123 = vector.shape_cast %122 : vector<48x16xf32> to vector<2x24x16xf32>
    %124 = vector.extract_strided_slice %35 {offsets = [0, 176], sizes = [48, 16], strides = [1, 1]} : vector<48x192xf32> to vector<48x16xf32>
    %125 = vector.shape_cast %124 : vector<48x16xf32> to vector<2x24x16xf32>
    %126 = arith.truncf %121 : vector<2x24x16xf32> to vector<2x24x16xbf16>
    %127 = arith.truncf %123 : vector<2x24x16xf32> to vector<2x24x16xbf16>
    "tpu.trace_start"() <{level = 10 : i32, message = "bqd,bkd->bqk"}> : () -> ()
    %cst_36 = arith.constant dense<0.000000e+00> : vector<2x24x24xf32>
    %128 = tpu.matmul %126, %127, %cst_36 {dimension_numbers = #tpu.dot_dimension_numbers<[2], [2], [1], [1], [0, 0, 0, 1, 1, 1], [0], [0]>} : vector<2x24x16xbf16>, vector<2x24x16xbf16>, vector<2x24x24xf32> -> vector<2x24x24xf32>
    "tpu.trace_stop"() : () -> ()
    %cst_37 = arith.constant 2.500000e-01 : f32
    %129 = vector.broadcast %cst_37 : f32 to vector<2x24x24xf32>
    %130 = arith.mulf %128, %129 : vector<2x24x24xf32>
    %131 = vector.broadcast %41 : vector<1x1x24xf32> to vector<2x24x24xf32>
    %132 = arith.addf %130, %131 : vector<2x24x24xf32>
    %cst_38 = arith.constant dense<0xFF800000> : vector<2x24xf32>
    %133 = vector.multi_reduction <maximumf>, %132, %cst_38 [2] : vector<2x24x24xf32> to vector<2x24xf32>
    %134 = vector.shape_cast %133 : vector<2x24xf32> to vector<2x24x1xf32>
    %135 = vector.broadcast %134 : vector<2x24x1xf32> to vector<2x24x24xf32>
    %136 = arith.subf %132, %135 : vector<2x24x24xf32>
    %137 = math.exp %136 : vector<2x24x24xf32>
    %cst_39 = arith.constant dense<0.000000e+00> : vector<2x24xf32>
    %138 = vector.multi_reduction <add>, %137, %cst_39 [2] : vector<2x24x24xf32> to vector<2x24xf32>
    %139 = vector.shape_cast %138 : vector<2x24xf32> to vector<2x24x1xf32>
    %140 = tpu.reciprocal %139 {approx = true} : vector<2x24x1xf32> -> vector<2x24x1xf32>
    %141 = vector.broadcast %140 : vector<2x24x1xf32> to vector<2x24x24xf32>
    %142 = arith.mulf %137, %141 : vector<2x24x24xf32>
    %143 = arith.truncf %142 : vector<2x24x24xf32> to vector<2x24x24xbf16>
    %144 = arith.truncf %125 : vector<2x24x16xf32> to vector<2x24x16xbf16>
    "tpu.trace_start"() <{level = 10 : i32, message = "bqk,bkd->bqd"}> : () -> ()
    %cst_40 = arith.constant dense<0.000000e+00> : vector<2x24x16xf32>
    %145 = tpu.matmul %143, %144, %cst_40 {dimension_numbers = #tpu.dot_dimension_numbers<[2], [1], [1], [2], [0, 0, 0, 1, 1, 2], [0], [0]>} : vector<2x24x24xbf16>, vector<2x24x16xbf16>, vector<2x24x16xf32> -> vector<2x24x16xf32>
    "tpu.trace_stop"() : () -> ()
    %146 = tpu.concatenate %67, %93, %119, %145 in 2 : vector<2x24x16xf32>, vector<2x24x16xf32>, vector<2x24x16xf32>, vector<2x24x16xf32> -> vector<2x24x64xf32>
    %147 = vector.shape_cast %146 : vector<2x24x64xf32> to vector<48x64xf32>
    %148 = arith.truncf %147 : vector<48x64xf32> to vector<48x64xbf16>
    %c0_41 = arith.constant 0 : index
    %c0_42 = arith.constant 0 : index
    %c0_43 = arith.constant 0 : index
    %149 = vector.load %arg6[%c0_41, %c0_42, %c0_43] : memref<1x64x64xbf16, #tpu.memory_space<vmem>>, vector<1x64x64xbf16>
    %150 = vector.shape_cast %149 : vector<1x64x64xbf16> to vector<64x64xbf16>
    %cst_44 = arith.constant dense<0.000000e+00> : vector<48x64xf32>
    %151 = tpu.matmul %148, %150, %cst_44 {dimension_numbers = #tpu.dot_dimension_numbers<[1], [0], [0], [1], [0, 0, 1, 1], [], []>} : vector<48x64xbf16>, vector<64x64xbf16>, vector<48x64xf32> -> vector<48x64xf32>
    %c0_45 = arith.constant 0 : index
    %c0_46 = arith.constant 0 : index
    %c0_47 = arith.constant 0 : index
    %152 = vector.load %arg7[%c0_45, %c0_46, %c0_47] : memref<1x1x64xf32, #tpu.memory_space<vmem>>, vector<1x1x64xf32>
    %153 = vector.shape_cast %152 : vector<1x1x64xf32> to vector<1x64xf32>
    %154 = vector.broadcast %153 : vector<1x64xf32> to vector<48x64xf32>
    %155 = arith.addf %151, %154 : vector<48x64xf32>
    %156 = arith.addf %3, %155 : vector<48x64xf32>
    %c0_48 = arith.constant 0 : index
    %c0_49 = arith.constant 0 : index
    %c0_50 = arith.constant 0 : index
    %157 = vector.load %arg8[%c0_48, %c0_49, %c0_50] : memref<1x1x64xf32, #tpu.memory_space<vmem>>, vector<1x1x64xf32>
    %158 = vector.shape_cast %157 : vector<1x1x64xf32> to vector<1x64xf32>
    %c0_51 = arith.constant 0 : index
    %c0_52 = arith.constant 0 : index
    %c0_53 = arith.constant 0 : index
    %159 = vector.load %arg9[%c0_51, %c0_52, %c0_53] : memref<1x1x64xf32, #tpu.memory_space<vmem>>, vector<1x1x64xf32>
    %160 = vector.shape_cast %159 : vector<1x1x64xf32> to vector<1x64xf32>
    %cst_54 = arith.constant dense<0.000000e+00> : vector<48xf32>
    %161 = vector.multi_reduction <add>, %156, %cst_54 [1] : vector<48x64xf32> to vector<48xf32>
    %162 = vector.shape_cast %161 : vector<48xf32> to vector<48x1xf32>
    %cst_55 = arith.constant 6.400000e+01 : f32
    %163 = vector.broadcast %cst_55 : f32 to vector<48x1xf32>
    %164 = arith.divf %162, %163 : vector<48x1xf32>
    %165 = vector.broadcast %164 : vector<48x1xf32> to vector<48x64xf32>
    %166 = arith.subf %156, %165 : vector<48x64xf32>
    %167 = arith.mulf %166, %166 : vector<48x64xf32>
    %cst_56 = arith.constant dense<0.000000e+00> : vector<48xf32>
    %168 = vector.multi_reduction <add>, %167, %cst_56 [1] : vector<48x64xf32> to vector<48xf32>
    %169 = vector.shape_cast %168 : vector<48xf32> to vector<48x1xf32>
    %cst_57 = arith.constant 6.400000e+01 : f32
    %170 = vector.broadcast %cst_57 : f32 to vector<48x1xf32>
    %171 = arith.divf %169, %170 : vector<48x1xf32>
    %cst_58 = arith.constant 9.99999974E-6 : f32
    %172 = vector.broadcast %cst_58 : f32 to vector<48x1xf32>
    %173 = arith.addf %171, %172 : vector<48x1xf32>
    %174 = math.rsqrt %173 : vector<48x1xf32>
    %175 = vector.broadcast %174 : vector<48x1xf32> to vector<48x64xf32>
    %176 = arith.mulf %166, %175 : vector<48x64xf32>
    %177 = vector.broadcast %158 : vector<1x64xf32> to vector<48x64xf32>
    %178 = arith.mulf %176, %177 : vector<48x64xf32>
    %179 = vector.broadcast %160 : vector<1x64xf32> to vector<48x64xf32>
    %180 = arith.addf %178, %179 : vector<48x64xf32>
    %181 = arith.truncf %180 : vector<48x64xf32> to vector<48x64xbf16>
    %c0_59 = arith.constant 0 : index
    %c0_60 = arith.constant 0 : index
    %c0_61 = arith.constant 0 : index
    %182 = vector.load %arg10[%c0_59, %c0_60, %c0_61] : memref<1x64x256xbf16, #tpu.memory_space<vmem>>, vector<1x64x256xbf16>
    %183 = vector.shape_cast %182 : vector<1x64x256xbf16> to vector<64x256xbf16>
    %cst_62 = arith.constant dense<0.000000e+00> : vector<48x256xf32>
    %184 = tpu.matmul %181, %183, %cst_62 {dimension_numbers = #tpu.dot_dimension_numbers<[1], [0], [0], [1], [0, 0, 1, 1], [], []>} : vector<48x64xbf16>, vector<64x256xbf16>, vector<48x256xf32> -> vector<48x256xf32>
    %c0_63 = arith.constant 0 : index
    %c0_64 = arith.constant 0 : index
    %c0_65 = arith.constant 0 : index
    %185 = vector.load %arg11[%c0_63, %c0_64, %c0_65] : memref<1x1x256xf32, #tpu.memory_space<vmem>>, vector<1x1x256xf32>
    %186 = vector.shape_cast %185 : vector<1x1x256xf32> to vector<1x256xf32>
    %187 = vector.broadcast %186 : vector<1x256xf32> to vector<48x256xf32>
    %188 = arith.addf %184, %187 : vector<48x256xf32>
    %cst_66 = arith.constant 1.702000e+00 : f32
    %189 = vector.broadcast %cst_66 : f32 to vector<48x256xf32>
    %190 = arith.mulf %189, %188 : vector<48x256xf32>
    %191 = arith.negf %190 : vector<48x256xf32>
    %192 = math.exp %191 : vector<48x256xf32>
    %cst_67 = arith.constant 1.000000e+00 : f32
    %193 = vector.broadcast %cst_67 : f32 to vector<48x256xf32>
    %194 = arith.addf %193, %192 : vector<48x256xf32>
    %195 = arith.divf %193, %194 : vector<48x256xf32>
    %196 = arith.mulf %188, %195 : vector<48x256xf32>
    %197 = arith.truncf %196 : vector<48x256xf32> to vector<48x256xbf16>
    %c0_68 = arith.constant 0 : index
    %c0_69 = arith.constant 0 : index
    %c0_70 = arith.constant 0 : index
    %198 = vector.load %arg12[%c0_68, %c0_69, %c0_70] : memref<1x256x64xbf16, #tpu.memory_space<vmem>>, vector<1x256x64xbf16>
    %199 = vector.shape_cast %198 : vector<1x256x64xbf16> to vector<256x64xbf16>
    %cst_71 = arith.constant dense<0.000000e+00> : vector<48x64xf32>
    %200 = tpu.matmul %197, %199, %cst_71 {dimension_numbers = #tpu.dot_dimension_numbers<[1], [0], [0], [1], [0, 0, 1, 1], [], []>} : vector<48x256xbf16>, vector<256x64xbf16>, vector<48x64xf32> -> vector<48x64xf32>
    %c0_72 = arith.constant 0 : index
    %c0_73 = arith.constant 0 : index
    %c0_74 = arith.constant 0 : index
    %201 = vector.load %arg13[%c0_72, %c0_73, %c0_74] : memref<1x1x64xf32, #tpu.memory_space<vmem>>, vector<1x1x64xf32>
    %202 = vector.shape_cast %201 : vector<1x1x64xf32> to vector<1x64xf32>
    %203 = vector.broadcast %202 : vector<1x64xf32> to vector<48x64xf32>
    %204 = arith.addf %200, %203 : vector<48x64xf32>
    %205 = arith.addf %156, %204 : vector<48x64xf32>
    %c0_75 = arith.constant 0 : index
    %c0_76 = arith.constant 0 : index
    %206 = vector.load %arg18[%c0_75, %c0_76] : memref<48x64xf32, #tpu.memory_space<vmem>>, vector<48x64xf32>
    tpu.vector_store %arg18[%c0_75, %c0_76], %205 {strides = array<i32>} : memref<48x64xf32, #tpu.memory_space<vmem>>, vector<48x64xf32>,
    %c1_i32 = arith.constant 1 : i32
    %207 = arith.cmpi eq, %arg0, %c1_i32 : i32
    %208 = arith.extui %207 : i1 to i32
    %c0_i32_77 = arith.constant 0 : i32
    %209 = arith.cmpi ne, %208, %c0_i32_77 : i32
    scf.if %209 {
      %210 = vector.extract_strided_slice %205 {offsets = [0, 0], sizes = [1, 64], strides = [1, 1]} : vector<48x64xf32> to vector<1x64xf32>
      %211 = vector.extract_strided_slice %205 {offsets = [24, 0], sizes = [1, 64], strides = [1, 1]} : vector<48x64xf32> to vector<1x64xf32>
      %212 = tpu.concatenate %210, %211 in 0 : vector<1x64xf32>, vector<1x64xf32> -> vector<2x64xf32>
      %c0_78 = arith.constant 0 : index
      %c0_79 = arith.constant 0 : index
      %213 = vector.load %arg14[%c0_78, %c0_79] : memref<1x64xf32, #tpu.memory_space<vmem>>, vector<1x64xf32>
      %c0_80 = arith.constant 0 : index
      %c0_81 = arith.constant 0 : index
      %214 = vector.load %arg15[%c0_80, %c0_81] : memref<1x64xf32, #tpu.memory_space<vmem>>, vector<1x64xf32>
      %cst_82 = arith.constant dense<0.000000e+00> : vector<2xf32>
      %215 = vector.multi_reduction <add>, %212, %cst_82 [1] : vector<2x64xf32> to vector<2xf32>
      %216 = vector.shape_cast %215 : vector<2xf32> to vector<2x1xf32>
      %cst_83 = arith.constant 6.400000e+01 : f32
      %217 = vector.broadcast %cst_83 : f32 to vector<2x1xf32>
      %218 = arith.divf %216, %217 : vector<2x1xf32>
      %219 = vector.broadcast %218 : vector<2x1xf32> to vector<2x64xf32>
      %220 = arith.subf %212, %219 : vector<2x64xf32>
      %221 = arith.mulf %220, %220 : vector<2x64xf32>
      %cst_84 = arith.constant dense<0.000000e+00> : vector<2xf32>
      %222 = vector.multi_reduction <add>, %221, %cst_84 [1] : vector<2x64xf32> to vector<2xf32>
      %223 = vector.shape_cast %222 : vector<2xf32> to vector<2x1xf32>
      %cst_85 = arith.constant 6.400000e+01 : f32
      %224 = vector.broadcast %cst_85 : f32 to vector<2x1xf32>
      %225 = arith.divf %223, %224 : vector<2x1xf32>
      %cst_86 = arith.constant 9.99999974E-6 : f32
      %226 = vector.broadcast %cst_86 : f32 to vector<2x1xf32>
      %227 = arith.addf %225, %226 : vector<2x1xf32>
      %228 = math.rsqrt %227 : vector<2x1xf32>
      %229 = vector.broadcast %228 : vector<2x1xf32> to vector<2x64xf32>
      %230 = arith.mulf %220, %229 : vector<2x64xf32>
      %231 = vector.broadcast %213 : vector<1x64xf32> to vector<2x64xf32>
      %232 = arith.mulf %230, %231 : vector<2x64xf32>
      %233 = vector.broadcast %214 : vector<1x64xf32> to vector<2x64xf32>
      %234 = arith.addf %232, %233 : vector<2x64xf32>
      %235 = arith.truncf %234 : vector<2x64xf32> to vector<2x64xbf16>
      %c0_87 = arith.constant 0 : index
      %c0_88 = arith.constant 0 : index
      %236 = vector.load %arg16[%c0_87, %c0_88] : memref<64x32xbf16, #tpu.memory_space<vmem>>, vector<64x32xbf16>
      %cst_89 = arith.constant dense<0.000000e+00> : vector<2x32xf32>
      %237 = tpu.matmul %235, %236, %cst_89 {dimension_numbers = #tpu.dot_dimension_numbers<[1], [0], [0], [1], [0, 0, 1, 1], [], []>} : vector<2x64xbf16>, vector<64x32xbf16>, vector<2x32xf32> -> vector<2x32xf32>
      %c0_90 = arith.constant 0 : index
      %c0_91 = arith.constant 0 : index
      %238 = vector.load %arg17[%c0_90, %c0_91] : memref<2x32xf32, #tpu.memory_space<vmem>>, vector<2x32xf32>
      tpu.vector_store %arg17[%c0_90, %c0_91], %237 {strides = array<i32>} : memref<2x32xf32, #tpu.memory_space<vmem>>, vector<2x32xf32>,
    } else {
    }
    return
  }
  func.func @transform_0(%arg0: i32) -> (i32, i32) {
    %c0_i32 = arith.constant 0 : i32
    %c0_i32_0 = arith.constant 0 : i32
    %c0_i32_1 = arith.constant 0 : i32
    return %c0_i32, %c0_i32_0 : i32, i32
  }
  func.func @transform_1(%arg0: i32) -> (i32, i32, i32) {
    %c0_i32 = arith.constant 0 : i32
    %c0_i32_0 = arith.constant 0 : i32
    %c0_i32_1 = arith.constant 0 : i32
    return %arg0, %c0_i32, %c0_i32_0 : i32, i32, i32
  }
  func.func @transform_2(%arg0: i32) -> (i32, i32, i32) {
    %c0_i32 = arith.constant 0 : i32
    %c0_i32_0 = arith.constant 0 : i32
    %c0_i32_1 = arith.constant 0 : i32
    return %arg0, %c0_i32, %c0_i32_0 : i32, i32, i32
  }
  func.func @transform_3(%arg0: i32) -> (i32, i32, i32) {
    %c0_i32 = arith.constant 0 : i32
    %c0_i32_0 = arith.constant 0 : i32
    %c0_i32_1 = arith.constant 0 : i32
    return %arg0, %c0_i32, %c0_i32_0 : i32, i32, i32
  }
  func.func @transform_4(%arg0: i32) -> (i32, i32, i32) {
    %c0_i32 = arith.constant 0 : i32
    %c0_i32_0 = arith.constant 0 : i32
    %c0_i32_1 = arith.constant 0 : i32
    return %arg0, %c0_i32, %c0_i32_0 : i32, i32, i32
  }
  func.func @transform_5(%arg0: i32) -> (i32, i32, i32) {
    %c0_i32 = arith.constant 0 : i32
    %c0_i32_0 = arith.constant 0 : i32
    %c0_i32_1 = arith.constant 0 : i32
    return %arg0, %c0_i32, %c0_i32_0 : i32, i32, i32
  }
  func.func @transform_6(%arg0: i32) -> (i32, i32, i32) {
    %c0_i32 = arith.constant 0 : i32
    %c0_i32_0 = arith.constant 0 : i32
    %c0_i32_1 = arith.constant 0 : i32
    return %arg0, %c0_i32, %c0_i32_0 : i32, i32, i32
  }
  func.func @transform_7(%arg0: i32) -> (i32, i32, i32) {
    %c0_i32 = arith.constant 0 : i32
    %c0_i32_0 = arith.constant 0 : i32
    %c0_i32_1 = arith.constant 0 : i32
    return %arg0, %c0_i32, %c0_i32_0 : i32, i32, i32
  }
  func.func @transform_8(%arg0: i32) -> (i32, i32, i32) {
    %c0_i32 = arith.constant 0 : i32
    %c0_i32_0 = arith.constant 0 : i32
    %c0_i32_1 = arith.constant 0 : i32
    return %arg0, %c0_i32, %c0_i32_0 : i32, i32, i32
  }
  func.func @transform_9(%arg0: i32) -> (i32, i32, i32) {
    %c0_i32 = arith.constant 0 : i32
    %c0_i32_0 = arith.constant 0 : i32
    %c0_i32_1 = arith.constant 0 : i32
    return %arg0, %c0_i32, %c0_i32_0 : i32, i32, i32
  }
  func.func @transform_10(%arg0: i32) -> (i32, i32, i32) {
    %c0_i32 = arith.constant 0 : i32
    %c0_i32_0 = arith.constant 0 : i32
    %c0_i32_1 = arith.constant 0 : i32
    return %arg0, %c0_i32, %c0_i32_0 : i32, i32, i32
  }
  func.func @transform_11(%arg0: i32) -> (i32, i32, i32) {
    %c0_i32 = arith.constant 0 : i32
    %c0_i32_0 = arith.constant 0 : i32
    %c0_i32_1 = arith.constant 0 : i32
    return %arg0, %c0_i32, %c0_i32_0 : i32, i32, i32
  }
  func.func @transform_12(%arg0: i32) -> (i32, i32, i32) {
    %c0_i32 = arith.constant 0 : i32
    %c0_i32_0 = arith.constant 0 : i32
    %c0_i32_1 = arith.constant 0 : i32
    return %arg0, %c0_i32, %c0_i32_0 : i32, i32, i32
  }
  func.func @transform_13(%arg0: i32) -> (i32, i32) {
    %c0_i32 = arith.constant 0 : i32
    %c0_i32_0 = arith.constant 0 : i32
    %c0_i32_1 = arith.constant 0 : i32
    return %c0_i32, %c0_i32_0 : i32, i32
  }
  func.func @transform_14(%arg0: i32) -> (i32, i32) {
    %c0_i32 = arith.constant 0 : i32
    %c0_i32_0 = arith.constant 0 : i32
    %c0_i32_1 = arith.constant 0 : i32
    return %c0_i32, %c0_i32_0 : i32, i32
  }
  func.func @transform_15(%arg0: i32) -> (i32, i32) {
    %c0_i32 = arith.constant 0 : i32
    %c0_i32_0 = arith.constant 0 : i32
    %c0_i32_1 = arith.constant 0 : i32
    return %c0_i32, %c0_i32_0 : i32, i32
  }
  func.func @transform_16(%arg0: i32) -> (i32, i32) {
    %c0_i32 = arith.constant 0 : i32
    %c0_i32_0 = arith.constant 0 : i32
    %c0_i32_1 = arith.constant 0 : i32
    return %c0_i32, %c0_i32_0 : i32, i32
  }
}

</mosaic_0001>

<bundles_post_ra>
// kernel: encode_image.2
= control target key start
LH: loop header
LB: loop body
LE: loop exit
PB: predicated region body
PF: predicated region fallthrough
CT: control target
= control target key end

     0   :  { %v389_v0 = vmov 0   ;;  %vm141_vm0 = vcmask 523264   ;;  %s589_s1 = inlined_call_operand.vmem [shape: bf16[192,64], index: 1, kind: input, shape index: {}]   ;;  %s590_s0 = inlined_call_operand.vmem [shape: f32[48,192], index: 0, kind: input, shape index: {}]   ;;  %s591_s2 = inlined_call_operand.vmem [shape: f32[48,64], index: 2, kind: input, shape index: {}]   ;;  %s592_s3 = inlined_call_operand.vmem [shape: f32[1,64], index: 3, kind: input, shape index: {}]   ;;  %s593_s4 = inlined_call_operand.vmem [shape: f32[1,64], index: 4, kind: input, shape index: {}]   ;;  %s594_s5 = inlined_call_operand.vmem [shape: f32[48,64], index: 5, kind: output, shape index: {}]  }
   0x1   :  { %151 = vmatprep.subr.bf16.mxu0 %v389_v0  ;;  %340 = vmatprep.subr.bf16.mxu1 %v389_v0  ;;  %v365_v1 = vld [vmem:[%s589_s1] sm:$0xff]   ;;  %v366_v2 = vld [vmem:[%s589_s1 + $0x8] sm:$0xff]   ;;  %v367_v3 = vld [vmem:[%s589_s1 + $0x10] sm:$0xff]  }
   0x2   :  { %152 = vmatpush1.bf16.msra.mxu0 %v365_v1  ;;  %352 = vmatpush1.bf16.msra.mxu1 %v365_v1  ;;  %v368_v4 = vld [vmem:[%s589_s1 + $0x18] sm:$0xff]   ;;  %v22_v5 = vld [vmem:[%s590_s0 + $0x8] sm:$0xff]  ;;  %v369_v10 = vld [vmem:[%s589_s1 + $0x20] sm:$0xff]  }
   0x3   :  { %153 = vmatprep.subr.bf16.mxu0 %v389_v0  ;;  %341 = vmatprep.subr.bf16.mxu1 %v389_v0  ;;  %v24_v6 = vld [vmem:[%s590_s0 + $0x18] sm:$0xff]  ;;  %v26_v7 = vld [vmem:[%s590_s0 + $0x28] sm:$0xff]  ;;  %v371_v13 = vld [vmem:[%s589_s1 + $0x30] sm:$0xff]  }
   0x4   :  { %v34_v8 = vpack.c.bf16 %v24_v6, %v22_v5  ;;  %v28_v9 = vld [vmem:[%s590_s0 + $0x38] sm:$0xff]  ;;  %v370_v12 = vld [vmem:[%s589_s1 + $0x28] sm:$0xff]   ;;  %v373_v15 = vld [vmem:[%s589_s1 + $0x40] sm:$0xff]  }
   0x5   :  { %v36_v11 = vpack.c.bf16 %v28_v9, %v26_v7  ;;  %v372_v14 = vld [vmem:[%s589_s1 + $0x38] sm:$0xff]   ;;  %v374_v16 = vld [vmem:[%s589_s1 + $0x48] sm:$0xff]   ;;  %v375_v17 = vld [vmem:[%s589_s1 + $0x50] sm:$0xff]  }
   0x6   :  { %154 = vmatpush1.bf16.msra.mxu0 %v366_v2  ;;  %353 = vmatpush1.bf16.msra.mxu1 %v366_v2  ;;  %v376_v18 = vld [vmem:[%s589_s1 + $0x58] sm:$0xff]   ;;  %v21_v19 = vld [vmem:[%s590_s0] sm:$0xff]  ;;  %v23_v20 = vld [vmem:[%s590_s0 + $0x10] sm:$0xff] }
   0x7   :  { %155 = vmatprep.subr.bf16.mxu0 %v389_v0  ;;  %342 = vmatprep.subr.bf16.mxu1 %v389_v0  ;;  %v25_v21 = vld [vmem:[%s590_s0 + $0x20] sm:$0xff]  ;;  %v27_v22 = vld [vmem:[%s590_s0 + $0x30] sm:$0xff]  ;;  %v30_v23 = vld [vmem:[%s590_s0 + $0x48] sm:$0xff]  ;;  %v33_v25 = vpack.c.bf16 %v23_v20, %v21_v19 }
   0x8   :  { %335 = vmatprep.mubr.msk.bf16.mxu0 %vm141_vm0, %v34_v8  ;;  %336 = vmatprep.mubr.msk.bf16.mxu1 %vm141_vm0, %v36_v11  ;;  %v32_v24 = vld [vmem:[%s590_s0 + $0x58] sm:$0xff]  ;;  %v35_v26 = vpack.c.bf16 %v27_v22, %v25_v21  ;;  %v29_v28 = vld [vmem:[%s590_s0 + $0x40] sm:$0xff]  ;;  %v31_v29 = vld [vmem:[%s590_s0 + $0x50] sm:$0xff] }
   0x9   :  { %v38_v27 = vpack.c.bf16 %v32_v24, %v30_v23  ;;  %v37_v30 = vpack.c.bf16 %v31_v29, %v29_v28  ;;  %v63_v31 = vld [vmem:[%s591_s2] sm:$0xff]  ;;  %v65_v32 = vld [vmem:[%s591_s2 + $0x10] sm:$0xff]  ;;  %v64_v35 = vld [vmem:[%s591_s2 + $0x8] sm:$0xff] }
   0xa   :  { %156 = vmatpush1.bf16.msra.mxu0 %v367_v3  ;;  %354 = vmatpush1.bf16.msra.mxu1 %v367_v3  ;;  %v66_v36 = vld [vmem:[%s591_s2 + $0x18] sm:$0xff]  ;;  %v67_v49 = vld [vmem:[%s591_s2 + $0x20] sm:$0xff]  ;;  %v68_v53 = vld [vmem:[%s591_s2 + $0x28] sm:$0xff] }
   0xb   :  { %157 = vmatprep.subr.bf16.mxu0 %v389_v0  ;;  %343 = vmatprep.subr.bf16.mxu1 %v389_v0 }
   0xe   :  { %158 = vmatpush1.bf16.msra.mxu0 %v368_v4  ;;  %355 = vmatpush1.bf16.msra.mxu1 %v368_v4 }
   0xf   :  { %159 = vmatprep.subr.bf16.mxu0 %v389_v0  ;;  %344 = vmatprep.subr.bf16.mxu1 %v389_v0 }
  0x12   :  { %160 = vmatpush1.bf16.msra.mxu0 %v369_v10  ;;  %356 = vmatpush1.bf16.msra.mxu1 %v369_v10 }
  0x13   :  { %161 = vmatprep.subr.bf16.mxu0 %v389_v0  ;;  %345 = vmatprep.subr.bf16.mxu1 %v389_v0 }
  0x16   :  { %162 = vmatpush1.bf16.msra.mxu0 %v370_v12  ;;  %357 = vmatpush1.bf16.msra.mxu1 %v370_v12 }
  0x17   :  { %163 = vmatprep.subr.bf16.mxu0 %v389_v0  ;;  %346 = vmatprep.subr.bf16.mxu1 %v389_v0 }
  0x1a   :  { %164 = vmatpush1.bf16.msra.mxu0 %v371_v13  ;;  %358 = vmatpush1.bf16.msra.mxu1 %v371_v13 }
  0x1b   :  { %165 = vmatprep.subr.bf16.mxu0 %v389_v0  ;;  %347 = vmatprep.subr.bf16.mxu1 %v389_v0 }
  0x1e   :  { %166 = vmatpush1.bf16.msra.mxu0 %v372_v14  ;;  %359 = vmatpush1.bf16.msra.mxu1 %v372_v14 }
  0x1f   :  { %167 = vmatprep.subr.bf16.mxu0 %v389_v0  ;;  %348 = vmatprep.subr.bf16.mxu1 %v389_v0 }
  0x22   :  { %168 = vmatpush1.bf16.msra.mxu0 %v373_v15  ;;  %360 = vmatpush1.bf16.msra.mxu1 %v373_v15 }
  0x23   :  { %169 = vmatprep.subr.bf16.mxu0 %v389_v0  ;;  %349 = vmatprep.subr.bf16.mxu1 %v389_v0 }
  0x26   :  { %170 = vmatpush1.bf16.msra.mxu0 %v374_v16  ;;  %361 = vmatpush1.bf16.msra.mxu1 %v374_v16 }
  0x27   :  { %171 = vmatprep.subr.bf16.mxu0 %v389_v0  ;;  %350 = vmatprep.subr.bf16.mxu1 %v389_v0 }
  0x2a   :  { %172 = vmatpush1.bf16.msra.mxu0 %v375_v17  ;;  %362 = vmatpush1.bf16.msra.mxu1 %v375_v17 }
  0x2b   :  { %173 = vmatprep.subr.bf16.mxu0 %v389_v0  ;;  %351 = vmatprep.subr.bf16.mxu1 %v389_v0 }
  0x2e   :  { %174 = vmatpush1.bf16.msra.mxu0 %v376_v18  ;;  %363 = vmatpush1.bf16.msra.mxu1 %v376_v18 }
  0x31   :  { %184 = vmatmul.mubr.bf16.vlgmr.msra.gmra.mrb[0].mxu0 %v33_v25  ;;  %192 = vmatmul.mubr.bf16.vlgmr.msra.gmra.mrb[0].mxu1 %v35_v26 }
  0x32   :  { %337 = vmatprep.mubr.msk.bf16.mxu1 %vm141_vm0, %v38_v27 }
  0x39   :  { %200 = vmatmul.mubr.bf16.gmra.mrb[4].mxu1 %v37_v30 }
 0x104   :  { %v185_v33 = vpop.f32.mrb[0].mxu0  ;;  %v193_v34 = vpop.f32.mrb[0].mxu1 }
 0x105   :  { %v186_v37 = vadd.f32 %v185_v33, %v63_v31  ;;  %v194_v38 = vadd.f32 %v193_v34, %v65_v32  ;;  %v187_v39 = vpop.f32.mrb[1].mxu0  ;;  %v195_v40 = vpop.f32.mrb[1].mxu1 }
 0x106   :  { %v188_v41 = vpop.f32.mrb[2].mxu0  ;;  %v196_v42 = vpop.f32.mrb[2].mxu1 }
 0x107   :  { %v189_v43 = vadd.f32 %v188_v41, %v64_v35  ;;  %v197_v44 = vadd.f32 %v196_v42, %v66_v36  ;;  %v190_v45 = vpop.f32.mrb[3].mxu0  ;;  %v198_v46 = vpop.f32.mrb[3].mxu1  ;;  %v216_v47 = vsel %vm141_vm0, %v194_v38, 0.0  ;;  %v210_v48 = vsel %vm141_vm0, %v186_v37, 0.0 }
 0x108   :  { %217 = vadd.xlane.f32.xlu1 %v216_v47  ;;  %211 = vadd.xlane.f32.xlu0 %v210_v48  ;;  %v338_v45 = vld [vmem:[%s592_s3] ss:$0 sm:$0xff] }
 0x109   :  { %v219_v50 = vsel %vm141_vm0, %v197_v44, 0.0  ;;  %v213_v51 = vsel %vm141_vm0, %v189_v43, 0.0  ;;  %v339_v48 = vld [vmem:[%s593_s4] ss:$0 sm:$0xff] }
 0x10c   :  { %v201_v52 = vpop.f32.mrb[4].mxu1  ;;  %220 = vadd.xlane.f32.xlu1 %v219_v50  ;;  %214 = vadd.xlane.f32.xlu0 %v213_v51 }
 0x10d   :  { %v202_v54 = vadd.f32 %v201_v52, %v67_v49  ;;  %v203_v55 = vpop.f32.mrb[5].mxu1 }
 0x10e   :  { %v204_v56 = vpop.f32.mrb[6].mxu1 }
 0x10f   :  { %v205_v57 = vadd.f32 %v204_v56, %v68_v53  ;;  %v206_v58 = vpop.f32.mrb[7].mxu1  ;;  %v222_v59 = vsel %vm141_vm0, %v202_v54, 0.0 }
 0x110   :  { %223 = vadd.xlane.f32.xlu0 %v222_v59 }
 0x111   :  { %v225_v60 = vsel %vm141_vm0, %v205_v57, 0.0 }
 0x112   :  { %226 = vadd.xlane.f32.xlu1 %v225_v60 }
 0x195   :  { %v218_v61 = vpop.xlane.xlu1 %217  ;;  %v212_v62 = vpop.xlane.xlu0 %211 }
 0x196   :  { %v231_v63 = vmul.f32 0.015625, %v218_v61  ;;  %v229_v0 = vmul.f32 0.015625, %v212_v62 }
 0x198   :  { %v543_v1 = vsub.f32 %v194_v38, %v231_v63  ;;  %v235_v2 = vsub.f32 %v186_v37, %v229_v0 }
 0x199   :  { %v221_v3 = vpop.xlane.xlu1 %220  ;;  %v215_v4 = vpop.xlane.xlu0 %214 }
 0x19a   :  { %v232_v5 = vmul.f32 0.015625, %v221_v3  ;;  %v230_v6 = vmul.f32 0.015625, %v215_v4  ;;  %v241_v7 = vmul.f32 %v235_v2, %v235_v2  ;;  %v243_v8 = vmul.f32 %v543_v1, %v543_v1 }
 0x19c   :  { %v547_v9 = vsub.f32 %v197_v44, %v232_v5  ;;  %v236_v10 = vsub.f32 %v189_v43, %v230_v6  ;;  %v247_v11 = vsel %vm141_vm0, %v241_v7, 0.0  ;;  %v253_v16 = vsel %vm141_vm0, %v243_v8, 0.0 }
 0x19d   :  { %248 = vadd.xlane.f32.xlu0 %v247_v11  ;;  %v224_v12 = vpop.xlane.xlu0 %223 }
 0x19e   :  { %v233_v13 = vmul.f32 0.015625, %v224_v12  ;;  %v242_v14 = vmul.f32 %v236_v10, %v236_v10  ;;  %v244_v20 = vmul.f32 %v547_v9, %v547_v9 }
 0x19f   :  { %v227_v15 = vpop.xlane.xlu1 %226 }
 0x1a0   :  { %v239_v17 = vsub.f32 %v202_v54, %v233_v13  ;;  %v234_v18 = vmul.f32 0.015625, %v227_v15  ;;  %v250_v19 = vsel %vm141_vm0, %v242_v14, 0.0  ;;  %v256_v23 = vsel %vm141_vm0, %v244_v20, 0.0 }
 0x1a1   :  { %254 = vadd.xlane.f32.xlu0 %v253_v16  ;;  %251 = vadd.xlane.f32.xlu1 %v250_v19 }
 0x1a2   :  { %v240_v21 = vsub.f32 %v205_v57, %v234_v18  ;;  %v245_v22 = vmul.f32 %v239_v17, %v239_v17 }
 0x1a4   :  { %v259_v24 = vsel %vm141_vm0, %v245_v22, 0.0  ;;  %v246_v25 = vmul.f32 %v240_v21, %v240_v21 }
 0x1a5   :  { %257 = vadd.xlane.f32.xlu1 %v256_v23  ;;  %260 = vadd.xlane.f32.xlu0 %v259_v24 }
 0x1a6   :  { %v262_v26 = vsel %vm141_vm0, %v246_v25, 0.0 }
 0x1a9   :  { %263 = vadd.xlane.f32.xlu1 %v262_v26 }
 0x22a   :  { %v249_v27 = vpop.xlane.xlu0 %248 }
 0x22b   :  { %v265_v28 = vmul.f32 0.015625, %v249_v27 }
 0x22d   :  { %v271_v29 = vadd.f32 1e-05, %v265_v28 }
 0x22e   :  { %v252_v30 = vpop.xlane.xlu1 %251  ;;  %v255_v31 = vpop.xlane.xlu0 %254 }
 0x22f   :  { %377 = vrsqrt.f32 %v271_v29  ;;  %v266_v32 = vmul.f32 0.015625, %v252_v30  ;;  %v267_v33 = vmul.f32 0.015625, %v255_v31 }
 0x231   :  { %v272_v34 = vadd.f32 1e-05, %v266_v32  ;;  %v273_v35 = vadd.f32 1e-05, %v267_v33 }
 0x232   :  { %v258_v36 = vpop.xlane.xlu1 %257  ;;  %v261_v37 = vpop.xlane.xlu0 %260 }
 0x233   :  { %379 = vrsqrt.f32 %v272_v34  ;;  %v268_v38 = vmul.f32 0.015625, %v258_v36  ;;  %v269_v39 = vmul.f32 0.015625, %v261_v37 }
 0x234   :  { %381 = vrsqrt.f32 %v273_v35 }
 0x235   :  { %v274_v40 = vadd.f32 1e-05, %v268_v38  ;;  %v275_v41 = vadd.f32 1e-05, %v269_v39 }
 0x236   :  { %v264_v42 = vpop.xlane.xlu1 %263 }
 0x237   :  { %383 = vrsqrt.f32 %v274_v40  ;;  %v270_v43 = vmul.f32 0.015625, %v264_v42 }
 0x238   :  { %385 = vrsqrt.f32 %v275_v41 }
 0x239   :  { %v378_v44 = vpop.eup %377  ;;  %v276_v46 = vadd.f32 1e-05, %v270_v43 }
 0x23a   :  { %v283_v47 = vmul.f32 %v378_v44, %v235_v2 }
 0x23b   :  { %387 = vrsqrt.f32 %v276_v46 }
 0x23c   :  { %v295_v49 = vmul.f32 %v338_v45, %v283_v47 }
 0x23d   :  { %v380_v50 = vpop.eup %379 }
 0x23e   :  { %v382_v51 = vpop.eup %381  ;;  %v307_v52 = vadd.f32 %v339_v48, %v295_v49  ;;  %v284_v53 = vmul.f32 %v380_v50, %v236_v10 }
 0x23f   :  { %v285_v54 = vmul.f32 %v382_v51, %v543_v1 }
 0x240   :  { %313 = vst.msk [vmem:[%s594_s5] sm:$0xff] %vm141_vm0, %v307_v52  ;;  %v296_v55 = vmul.f32 %v338_v45, %v284_v53 }
 0x241   :  { %v384_v56 = vpop.eup %383  ;;  %v297_v57 = vmul.f32 %v338_v45, %v285_v54 }
 0x242   :  { %v386_v58 = vpop.eup %385  ;;  %v308_v59 = vadd.f32 %v339_v48, %v296_v55  ;;  %v286_v60 = vmul.f32 %v384_v56, %v547_v9 }
 0x243   :  { %v309_v61 = vadd.f32 %v339_v48, %v297_v57  ;;  %v287_v62 = vmul.f32 %v386_v58, %v239_v17 }
 0x244   :  { %314 = vst.msk [vmem:[%s594_s5 + $0x8] sm:$0xff] %vm141_vm0, %v308_v59  ;;  %v298_v63 = vmul.f32 %v338_v45, %v286_v60 }
 0x245   :  { %v388_v0 = vpop.eup %387  ;;  %315 = vst.msk [vmem:[%s594_s5 + $0x10] sm:$0xff] %vm141_vm0, %v309_v61  ;;  %v299_v1 = vmul.f32 %v338_v45, %v287_v62 }
 0x246   :  { %v310_v2 = vadd.f32 %v339_v48, %v298_v63  ;;  %v288_v3 = vmul.f32 %v388_v0, %v240_v21 }
 0x247   :  { %v311_v4 = vadd.f32 %v339_v48, %v299_v1 }
 0x248   :  { %316 = vst.msk [vmem:[%s594_s5 + $0x18] sm:$0xff] %vm141_vm0, %v310_v2  ;;  %v300_v5 = vmul.f32 %v338_v45, %v288_v3 }
 0x249   :  { %317 = vst.msk [vmem:[%s594_s5 + $0x20] sm:$0xff] %vm141_vm0, %v311_v4 }
 0x24a   :  { %v312_v6 = vadd.f32 %v339_v48, %v300_v5 }
 0x24c   :  { %318 = vst.msk [vmem:[%s594_s5 + $0x28] sm:$0xff] %vm141_vm0, %v312_v6 }

// kernel: encode_image.3
= control target key start
LH: loop header
LB: loop body
LE: loop exit
PB: predicated region body
PF: predicated region fallthrough
CT: control target
= control target key end

     0   :  { %s4999_s0 = inlined_call_operand.vmem [shape: f32[48,64], index: 0, kind: input, shape index: {}]   ;;  %s5000_s1 = inlined_call_operand.vmem [shape: f32[2,1,64], index: 1, kind: input, shape index: {}]   ;;  %s5001_s2 = inlined_call_operand.vmem [shape: f32[2,1,64], index: 2, kind: input, shape index: {}]   ;;  %s5002_s3 = inlined_call_operand.vmem [shape: bf16[2,64,192], index: 3, kind: input, shape index: {}]   ;;  %s5003_s4 = inlined_call_operand.vmem [shape: f32[2,1,192], index: 4, kind: input, shape index: {}]   ;;  %s5004_s5 = inlined_call_operand.vmem [shape: bf16[2,64,64], index: 5, kind: input, shape index: {}]   ;;  %s5005_s6 = inlined_call_operand.vmem [shape: f32[2,1,64], index: 6, kind: input, shape index: {}]   ;;  %s5006_s7 = inlined_call_operand.vmem [shape: f32[2,1,64], index: 7, kind: input, shape index: {}]   ;;  %s5007_s8 = inlined_call_operand.vmem [shape: f32[2,1,64], index: 8, kind: input, shape index: {}]   ;;  %s5008_s9 = inlined_call_operand.vmem [shape: bf16[2,64,256], index: 9, kind: input, shape index: {}]   ;;  %s5009_s10 = inlined_call_operand.vmem [shape: f32[2,1,256], index: 10, kind: input, shape index: {}]   ;;  %s5010_s11 = inlined_call_operand.vmem [shape: bf16[2,256,64], index: 11, kind: input, shape index: {}]   ;;  %s5011_s12 = inlined_call_operand.vmem [shape: f32[2,1,64], index: 12, kind: input, shape index: {}]   ;;  %s5012_s13 = inlined_call_operand.vmem [shape: f32[1,64], index: 13, kind: input, shape index: {}]   ;;  %s5013_s14 = inlined_call_operand.vmem [shape: f32[1,64], index: 14, kind: input, shape index: {}]   ;;  %s5014_s15 = inlined_call_operand.vmem [shape: bf16[64,32], index: 15, kind: input, shape index: {}]   ;;  %s5015_s16 = inlined_call_operand.hbm [shape: f32[2,32], index: 16, kind: output, shape index: {}]  }
   0x1   :  { %5020 = sst [smem:[#allocation8_spill]] %s4999_s0 }
   0x2   :  { %5021 = sst [smem:[#allocation9_spill]] %s5002_s3 }
   0x3   :  { %5022 = sst [smem:[#allocation10_spill]] %s5003_s4 }
   0x4   :  { %5023 = sst [smem:[#allocation11_spill]] %s5012_s13 }
   0x5   :  { %5024 = sst [smem:[#allocation12_spill]] %s5013_s14 }
   0x6   :  { %5025 = sst [smem:[#allocation13_spill]] %s5014_s15 }
   0x7   :  { %5026 = sst [smem:[#allocation14_spill]] %s5015_s16 }
   0x8   :  { %21 = vsyncpa [#allocation4], 0  ;;  %s4214_s21 = smov 0  }
   0x9 LB: > { %5027 = sst [smem:[#allocation6_spill]] %s4113_s21  ;;  %s4220_s22 = sadd.s32 4294967295, %s4113_s21   ;;  %s4113_s21 = sphi %s4214_s21, %s27_s21  }
   0xa   : > { %p3355_p0 = scmp.ge.s32.totalorder %s4113_s21, 1  ;;  %p554_p1 = scmp.lt.s32.totalorder %s4113_s21, 3 }
   0xc   : > { %p555_p2 = pnand %p3355_p0, %p554_p1 }
   0xe   : > { %558 = sbr.rel (%p555_p2) target bundleno = 4917 (0x1335), region = 84 }
  0x15   : > { %p640_p3 = scmp.lt.s32.totalorder %s4220_s22, 1  ;;  %s5028_s3 = sld [smem:[#allocation9_spill]] }
  0x16   : > { %s5029_s4 = sld [smem:[#allocation10_spill]]  ;;  %p3366_p4 = scmp.ne.s32.totalorder %s4220_s22, 0 }
  0x17   : > { %s4226_s23 = scalar_select %p640_p3, %s4220_s22, 1 }
  0x18   : > { %s5031_s18 = sld [smem:[#allocation8_spill]] (!%p3366_p4)  ;;  %vm697_vm0 = vcmask (!%p3366_p4), 523264  }
  0x19   : > { %s3474_s30 = sshll.u32 %s4226_s23, 6  ;;  %s3358_s0 = sshll.u32 %s4226_s23, 1 }
  0x1a   : > { %s3475_s21 = sshll.u32 %s4226_s23, 5  ;;  %s668_s20 = scalar_lea.vmem %s5007_s8, %s4226_s23 }
  0x1b   : > { %s4241_s19 = scalar_lea.vmem %s5028_s3, %s3474_s30  ;;  %s4256_s28 = scalar_lea.vmem %s5004_s5, %s3475_s21 }
  0x1c   : > { %s4246_s25 = scalar_lea.vmem %s5029_s4, %s3358_s0  ;;  %s4274_s26 = scalar_lea.vmem %s5009_s10, %s3358_s0 }
  0x1d   : > { %5030 = sst [smem:[#allocation7_spill]] %s4246_s25  ;;  %s4269_s25 = scalar_lea.vmem %s5008_s9, %s3474_s30 }
  0x1e   : > { %s3477_s13 = sshll.u32 %s4226_s23, 7  ;;  %s685_s3 = scalar_lea.vmem %s5011_s12, %s4226_s23  ;;  %v691_v0 = vld [vmem:[%s5031_s18] sm:$0xff] (!%p3366_p4)  ;;  %v692_v1 = vld [vmem:[%s5031_s18 + $0x8] sm:$0xff] (!%p3366_p4)  ;;  %v693_v2 = vld [vmem:[%s5031_s18 + $0x10] sm:$0xff] (!%p3366_p4) }
  0x1f   : > { %s4280_s15 = scalar_lea.vmem %s5010_s11, %s3477_s13  ;;  %690 = sbr.rel (%p3366_p4) target bundleno = 38 (0x26), region = 88  ;;  %698 = vst.msk [vmem:[#allocation2] sm:$0xff] (!%p3366_p4), %vm697_vm0, %v691_v0  ;;  %699 = vst.msk [vmem:[#allocation2 + $0x8] sm:$0xff] (!%p3366_p4), %vm697_vm0, %v692_v1  ;;  %v694_v3 = vld [vmem:[%s5031_s18 + $0x18] sm:$0xff] (!%p3366_p4)  ;;  %v695_v4 = vld [vmem:[%s5031_s18 + $0x20] sm:$0xff] (!%p3366_p4) }
  0x20   : > { %700 = vst.msk [vmem:[#allocation2 + $0x10] sm:$0xff] (!%p3366_p4), %vm697_vm0, %v693_v2  ;;  %v696_v5 = vld [vmem:[%s5031_s18 + $0x28] sm:$0xff] (!%p3366_p4)  ;;  %701 = vst.msk [vmem:[#allocation2 + $0x18] sm:$0xff] (!%p3366_p4), %vm697_vm0, %v694_v3 }
  0x21   : > { %702 = vst.msk [vmem:[#allocation2 + $0x20] sm:$0xff] (!%p3366_p4), %vm697_vm0, %v695_v4  ;;  %703 = vst.msk [vmem:[#allocation2 + $0x28] sm:$0xff] (!%p3366_p4), %vm697_vm0, %v696_v5 }
  0x26 PF: > { %v704_v6 = vld [vmem:[#allocation2] sm:$0xff]  ;;  %vm712_vm1 = vcmask 523264   ;;  %v705_v8 = vld [vmem:[#allocation2 + $0x8] sm:$0xff]  ;;  %v3856_v50 = vld [vmem:[%s4241_s19 + $0x14] ss:$8 sps:$4 sm:$0xff]   ;;  %v4115_v55 = vmov 0   ;;  %s5032_s0 = scalar_lea.vmem %s5000_s1, %s4226_s23  ;;  %s5033_s16 = scalar_lea.vmem %s5001_s2, %s4226_s23 }
  0x27   : > { %v706_v7 = vld [vmem:[#allocation2 + $0x10] sm:$0xff]  ;;  %v713_v9 = vsel %vm712_vm1, %v704_v6, 0.0  ;;  %v707_v11 = vld [vmem:[#allocation2 + $0x18] sm:$0xff]  ;;  %v716_v14 = vsel %vm712_vm1, %v705_v8, 0.0  ;;  %v3853_v48 = vld [vmem:[%s4241_s19 + $0x4] ss:$8 sps:$4 sm:$0xff]   ;;  %920 = vmatprep.mubr.bf16.mxu0 %v4115_v55  ;;  %930 = vmatprep.mubr.bf16.mxu1 %v4115_v55  ;;  %s5035_s24 = scalar_lea.vmem %s5005_s6, %s4226_s23 }
  0x28   : > { %v719_v10 = vsel %vm712_vm1, %v706_v7, 0.0  ;;  %714 = vadd.xlane.f32.xlu0 %v713_v9  ;;  %v708_v12 = vld [vmem:[#allocation2 + $0x20] sm:$0xff]  ;;  %v709_v13 = vld [vmem:[#allocation2 + $0x28] sm:$0xff]  ;;  %v722_v15 = vsel %vm712_vm1, %v707_v11, 0.0  ;;  %888 = vmatprep.subr.bf16.mxu0 %v3853_v48  ;;  %v3858_v51 = vld [vmem:[%s4241_s19 + $0x10] ss:$8 sps:$4 sm:$0xff]  }
  0x29   : > { %720 = vadd.xlane.f32.xlu1 %v719_v10  ;;  %v725_v16 = vsel %vm712_vm1, %v708_v12, 0.0  ;;  %v728_v17 = vsel %vm712_vm1, %v709_v13, 0.0  ;;  %v3855_v49 = vld [vmem:[%s4241_s19] ss:$8 sps:$4 sm:$0xff]   ;;  %3748 = vmatprep.subr.bf16.mxu1 %v3853_v48  ;;  %v3859_v52 = vld [vmem:[%s4241_s19 + $0x24] ss:$8 sps:$4 sm:$0xff]  }
  0x2a   : > { %889 = vmatpush1.bf16.msra.mxu0 %v3855_v49  ;;  %3752 = vmatpush1.bf16.msra.mxu1 %v3855_v49  ;;  %v3861_v53 = vld [vmem:[%s4241_s19 + $0x20] ss:$8 sps:$4 sm:$0xff]   ;;  %v3862_v54 = vld [vmem:[%s4241_s19 + $0x34] ss:$8 sps:$4 sm:$0xff]   ;;  %v3864_v56 = vld [vmem:[%s4241_s19 + $0x30] ss:$8 sps:$4 sm:$0xff]  }
  0x2b   : > { %890 = vmatprep.subr.bf16.mxu0 %v3856_v50  ;;  %3749 = vmatprep.subr.bf16.mxu1 %v3856_v50  ;;  %s5034_s17 = sld [smem:[#allocation7_spill]]  ;;  %vm965_vm2 = vcmask 130048   ;;  %s4116_s13 = smov 64   ;;  %vm1185_vm3 = vcmask 1043456   ;;  %vm1104_vm5 = vcmask 195584   ;;  %vm4125_vm6 = vmmov 0  }
  0x2c   : > { %717 = vadd.xlane.f32.xlu0 %v716_v14  ;;  %s4118_s21 = smov 48   ;;  %s4119_s27 = smov 112   ;;  %vm2402_vm7 = vcmask 261120   ;;  %vm2409_vm8 = vcmask 392192  }
  0x2d   : > { %723 = vadd.xlane.f32.xlu1 %v722_v15  ;;  %s4120_s29 = smov 32   ;;  %s4121_s4 = smov 96  }
  0x2e   : > { %891 = vmatpush1.bf16.msra.mxu0 %v3858_v51  ;;  %3753 = vmatpush1.bf16.msra.mxu1 %v3858_v51  ;;  %s4122_s19 = smov 16   ;;  %s4123_s30 = smov 80  }
  0x2f   : > { %892 = vmatprep.subr.bf16.mxu0 %v3859_v52  ;;  %3750 = vmatprep.subr.bf16.mxu1 %v3859_v52  ;;  %p3462_p5 = scmp.ne.s32.totalorder %s4220_s22, 1 }
  0x30   : > { %726 = vadd.xlane.f32.xlu0 %v725_v16  ;;  %vm3082_vm9 = vcmask (!%p3462_p5), 1040384   ;;  %vm3086_vm10 = vcmask (!%p3462_p5), 517120   ;;  %vm4127_vm11 = vmmov (!%p3462_p5), 0   ;;  %vm3190_vm12 = vcmask (!%p3462_p5), 254976  }
  0x31   : > { %729 = vadd.xlane.f32.xlu1 %v728_v17 }
  0x32   : > { %893 = vmatpush1.bf16.msra.mxu0 %v3861_v53  ;;  %3754 = vmatpush1.bf16.msra.mxu1 %v3861_v53 }
  0x33   : > { %894 = vmatprep.subr.bf16.mxu0 %v3862_v54  ;;  %3751 = vmatprep.subr.bf16.mxu1 %v3862_v54 }
  0x36   : > { %895 = vmatpush1.bf16.msra.mxu0 %v3864_v56  ;;  %3755 = vmatpush1.bf16.msra.mxu1 %v3864_v56 }
  0xb5   : > { %v715_v18 = vpop.xlane.xlu0 %714 }
  0xb6   : > { %v721_v19 = vpop.xlane.xlu1 %720  ;;  %v732_v20 = vmul.f32 0.015625, %v715_v18  ;;  %v3368_v18 = vld [vmem:[%s5033_s16] ss:$0 sm:$0xff]  ;;  %s5036_s16 = scalar_lea.vmem %s5006_s7, %s4226_s23 }
  0xb7   : > { %v734_v21 = vmul.f32 0.015625, %v721_v19 }
  0xb8   : > { %v4311_v22 = vsub.f32 %v704_v6, %v732_v20 }
  0xb9   : > { %v4313_v23 = vsub.f32 %v706_v7, %v734_v21  ;;  %v718_v24 = vpop.xlane.xlu0 %717 }
  0xba   : > { %v724_v25 = vpop.xlane.xlu1 %723  ;;  %v733_v26 = vmul.f32 0.015625, %v718_v24  ;;  %v744_v28 = vmul.f32 %v4311_v22, %v4311_v22 }
  0xbb   : > { %v735_v27 = vmul.f32 0.015625, %v724_v25  ;;  %v746_v29 = vmul.f32 %v4313_v23, %v4313_v23 }
  0xbc   : > { %v4319_v30 = vsub.f32 %v705_v8, %v733_v26  ;;  %v750_v32 = vsel %vm712_vm1, %v744_v28, 0.0 }
  0xbd   : > { %v4321_v31 = vsub.f32 %v707_v11, %v735_v27  ;;  %751 = vadd.xlane.f32.xlu0 %v750_v32  ;;  %v727_v33 = vpop.xlane.xlu0 %726  ;;  %v756_v35 = vsel %vm712_vm1, %v746_v29, 0.0 }
  0xbe   : > { %v730_v34 = vpop.xlane.xlu1 %729  ;;  %v736_v36 = vmul.f32 0.015625, %v727_v33  ;;  %v745_v38 = vmul.f32 %v4319_v30, %v4319_v30 }
  0xbf   : > { %v737_v37 = vmul.f32 0.015625, %v730_v34  ;;  %v747_v39 = vmul.f32 %v4321_v31, %v4321_v31 }
  0xc0   : > { %v4329_v40 = vsub.f32 %v708_v12, %v736_v36  ;;  %v753_v42 = vsel %vm712_vm1, %v745_v38, 0.0 }
  0xc1   : > { %v4331_v41 = vsub.f32 %v709_v13, %v737_v37  ;;  %757 = vadd.xlane.f32.xlu0 %v756_v35  ;;  %754 = vadd.xlane.f32.xlu1 %v753_v42  ;;  %v759_v43 = vsel %vm712_vm1, %v747_v39, 0.0  ;;  %v3367_v13 = vld [vmem:[%s5032_s0] ss:$0 sm:$0xff]  ;;  %v829_v42 = vlaneseq }
  0xc2   : > { %v748_v44 = vmul.f32 %v4329_v40, %v4329_v40 }
  0xc3   : > { %v749_v45 = vmul.f32 %v4331_v41, %v4331_v41 }
  0xc4   : > { %v762_v46 = vsel %vm712_vm1, %v748_v44, 0.0  ;;  %v827_v44 = vld [vmem:[%s5034_s17] sm:$0x3] }
  0xc5   : > { %760 = vadd.xlane.f32.xlu1 %v759_v43  ;;  %763 = vadd.xlane.f32.xlu0 %v762_v46  ;;  %v765_v47 = vsel %vm712_vm1, %v749_v45, 0.0  ;;  %v4372_v43 = vshrl.u32 %v829_v42, 7 }
  0xc9   : > { %766 = vadd.xlane.f32.xlu1 %v765_v47 }
 0x14a   : > { %v752_v57 = vpop.xlane.xlu0 %751 }
 0x14b   : > { %v768_v58 = vmul.f32 0.015625, %v752_v57 }
 0x14d   : > { %v774_v59 = vadd.f32 1e-05, %v768_v58 }
 0x14e   : > { %v755_v60 = vpop.xlane.xlu1 %754  ;;  %v758_v61 = vpop.xlane.xlu0 %757 }
 0x14f   : > { %3897 = vrsqrt.f32 %v774_v59  ;;  %v769_v62 = vmul.f32 0.015625, %v755_v60  ;;  %v770_v63 = vmul.f32 0.015625, %v758_v61 }
 0x151   : > { %v775_v0 = vadd.f32 1e-05, %v769_v62  ;;  %v776_v1 = vadd.f32 1e-05, %v770_v63 }
 0x152   : > { %v761_v2 = vpop.xlane.xlu1 %760  ;;  %v764_v3 = vpop.xlane.xlu0 %763 }
 0x153   : > { %3899 = vrsqrt.f32 %v775_v0  ;;  %v771_v4 = vmul.f32 0.015625, %v761_v2  ;;  %v772_v5 = vmul.f32 0.015625, %v764_v3 }
 0x154   : > { %3901 = vrsqrt.f32 %v776_v1 }
 0x155   : > { %v777_v6 = vadd.f32 1e-05, %v771_v4  ;;  %v778_v7 = vadd.f32 1e-05, %v772_v5 }
 0x156   : > { %v767_v8 = vpop.xlane.xlu1 %766 }
 0x157   : > { %3903 = vrsqrt.f32 %v777_v6  ;;  %v773_v9 = vmul.f32 0.015625, %v767_v8 }
 0x158   : > { %3905 = vrsqrt.f32 %v778_v7 }
 0x159   : > { %v3898_v10 = vpop.eup %3897  ;;  %v779_v11 = vadd.f32 1e-05, %v773_v9 }
 0x15a   : > { %v786_v12 = vmul.f32 %v3898_v10, %v4311_v22 }
 0x15b   : > { %3907 = vrsqrt.f32 %v779_v11 }
 0x15c   : > { %v798_v17 = vmul.f32 %v3367_v13, %v786_v12 }
 0x15d   : > { %v3900_v14 = vpop.eup %3899 }
 0x15e   : > { %v3902_v15 = vpop.eup %3901  ;;  %v787_v16 = vmul.f32 %v3900_v14, %v4319_v30  ;;  %v810_v22 = vadd.f32 %v3368_v18, %v798_v17 }
 0x15f   : > { %v788_v19 = vmul.f32 %v3902_v15, %v4313_v23 }
 0x160   : > { %v799_v20 = vmul.f32 %v3367_v13, %v787_v16 }
 0x161   : > { %v3904_v21 = vpop.eup %3903  ;;  %v800_v26 = vmul.f32 %v3367_v13, %v788_v19 }
 0x162   : > { %v811_v24 = vadd.f32 %v3368_v18, %v799_v20  ;;  %v789_v25 = vmul.f32 %v3904_v21, %v4321_v31  ;;  %v3906_v27 = vpop.eup %3905 }
 0x163   : > { %v812_v30 = vadd.f32 %v3368_v18, %v800_v26  ;;  %v790_v34 = vmul.f32 %v3906_v27, %v4329_v40  ;;  %v831_v40 = vsub.s32 0, %v4372_v43  ;;  %v952_v27 = vand.u32 127, %v829_v42 }
 0x164   : > { %v816_v28 = vpack.c.bf16 %v811_v24, %v810_v22  ;;  %v801_v29 = vmul.f32 %v3367_v13, %v789_v25 }
 0x165   : > { %v3908_v32 = vpop.eup %3907  ;;  %v802_v37 = vmul.f32 %v3367_v13, %v790_v34  ;;  %v832_v45 = vrot.slane %v827_v44, %v831_v40  ;;  %vm953_vm4 = vcmp.lt.s32.totalorder %v952_v27, 17 }
 0x166   : > { %3377 = vmatmul.mubr.msk.bf16.vlgmr.msra.gmra.mrb[0].mxu0 %vm712_vm1, %v816_v28  ;;  %v813_v33 = vadd.f32 %v3368_v18, %v801_v29  ;;  %v791_v23 = vmul.f32 %v3908_v32, %v4331_v41  ;;  %v835_v41 = vsub.s32 1, %v4372_v43  ;;  %v4117_v29 = vmov -1e+30  }
 0x167   : > { %v814_v38 = vadd.f32 %v3368_v18, %v802_v37  ;;  %v4430_v32 = vsel %vm953_vm4, 0.0, %v4117_v29 }
 0x168   : > { %v817_v35 = vpack.c.bf16 %v813_v33, %v812_v30  ;;  %v803_v36 = vmul.f32 %v3367_v13, %v791_v23  ;;  %v836_v47 = vrot.slane %v827_v44, %v835_v41 }
 0x16a   : > { %3378 = vmatmul.mubr.msk.bf16.vlgmr.msra.gmra.mrb[0].mxu1 %vm712_vm1, %v817_v35  ;;  %v815_v31 = vadd.f32 %v3368_v18, %v803_v36 }
 0x16b   : > { %940 = vmatprep.mubr.bf16.mxu1 %v4115_v55 }
 0x16c   : > { %v818_v39 = vpack.c.bf16 %v815_v31, %v814_v38 }
 0x172   : > { %3379 = vmatmul.mubr.msk.bf16.gmra.mrb[4].mxu1 %vm712_vm1, %v818_v39 }
 0x239   : > { %v922_v46 = vpop.f32.mrb[0].mxu0 }
 0x23a   : > { %v924_v48 = vpop.f32.mrb[1].mxu0  ;;  %v923_v50 = vadd.f32 %v922_v46, %v832_v45 }
 0x23b   : > { %v926_v49 = vpop.f32.mrb[2].mxu0  ;;  %v925_v53 = vadd.f32 %v924_v48, %v836_v47 }
 0x23c   : > { %v927_v51 = vadd.f32 %v926_v49, %v832_v45  ;;  %v928_v52 = vpop.f32.mrb[3].mxu0 }
 0x23d   : > { %v929_v54 = vadd.f32 %v928_v52, %v836_v47  ;;  %v932_v56 = vpop.f32.mrb[0].mxu1 }
 0x23e   : > { %v4381_v57 = vpack.c.bf16 %v927_v51, %v923_v50  ;;  %v933_v58 = vadd.f32 %v932_v56, %v832_v45  ;;  %v934_v59 = vpop.f32.mrb[1].mxu1 }
 0x23f   : > { %v4383_v60 = vpack.c.bf16 %v929_v54, %v925_v53  ;;  %v935_v61 = vadd.f32 %v934_v59, %v836_v47  ;;  %v936_v62 = vpop.f32.mrb[2].mxu1 }
 0x240   : > { %v4385_v63 = vpack.c.bf16 %v933_v58, %v933_v58  ;;  %961 = vrot.lane.b32.xlu0 %v4381_v57, %s4116_s13  ;;  %v938_v0 = vpop.f32.mrb[3].mxu1  ;;  %3592 = vmatprep.mubr.msk.bf16.mxu1 %vm965_vm2, %v4381_v57  ;;  %v937_v5 = vadd.f32 %v936_v62, %v832_v45 }
 0x241   : > { %v4390_v1 = vpack.c.bf16 %v935_v61, %v935_v61  ;;  %v939_v2 = vadd.f32 %v938_v0, %v836_v47  ;;  %3604 = vmatprep.subr.bf16.mxu0 %v4383_v60 }
 0x242   : > { %3605 = vmatpush3.bf16.msra.mxu0 %v4383_v60  ;;  %963 = vrot.lane.b32.xlu1 %v4385_v63, %s4116_s13 }
 0x243   : > { %3760 = vmatprep.subr.msk.bf16.mxu0 %vm1185_vm3, %v4390_v1  ;;  %v1187_v4 = vsel %vm1185_vm3, %v4390_v1, 0 }
 0x245   : > { %v942_v3 = vpop.f32.mrb[4].mxu1 }
 0x246   : > { %v943_v6 = vadd.f32 %v942_v3, %v832_v45  ;;  %v944_v7 = vpop.f32.mrb[5].mxu1  ;;  %3607 = vmatpush3.bf16.msra.mxu0 %v1187_v4 }
 0x247   : > { %v945_v8 = vadd.f32 %v944_v7, %v836_v47  ;;  %v946_v9 = vpop.f32.mrb[6].mxu1 }
 0x248   : > { %v4399_v10 = vpack.c.bf16 %v943_v6, %v937_v5  ;;  %v947_v11 = vadd.f32 %v946_v9, %v832_v45  ;;  %v948_v12 = vpop.f32.mrb[7].mxu1 }
 0x249   : > { %v4401_v13 = vpack.c.bf16 %v945_v8, %v939_v2  ;;  %v949_v14 = vadd.f32 %v948_v12, %v836_v47 }
 0x24a   : > { %1028 = vrot.lane.b32.xlu1 %v4399_v10, %s4116_s13  ;;  %v4404_v15 = vpack.c.bf16 %v947_v11, %v947_v11 }
 0x24b   : > { %v4420_v25 = vpack.c.bf16 %v949_v14, %v949_v14 }
 0x24d   : > { %v1244_v26 = vsel %vm1185_vm3, %v4420_v25, 0 }
 0x24e   : > { %1030 = vrot.lane.b32.xlu1 %v4404_v15, %s4116_s13 }
 0x2b2   : > { %v962_v16 = vpop.permute.xlu0 %961 }
 0x2b3   : > { %3756 = vmatprep.subr.msk.bf16.mxu1 %vm965_vm2, %v962_v16  ;;  %v973_v17 = vsel %vm965_vm2, %v962_v16, 0 }
 0x2b4   : > { %v964_v18 = vpop.permute.xlu1 %963  ;;  %3589 = vmatpush3.bf16.xpose.msra.mxu1 %v973_v17 }
 0x2b5   : > { %3757 = vmatprep.subr.msk.bf16.mxu1 %vm965_vm2, %v964_v18  ;;  %v976_v19 = vsel %vm965_vm2, %v964_v18, 0 }
 0x2bc   : > { %v1029_v20 = vpop.permute.xlu1 %1028  ;;  %3591 = vmatpush3.bf16.xpose.msra.mxu1 %v976_v19 }
 0x2bd   : > { %3758 = vmatprep.subr.msk.bf16.mxu1 %vm965_vm2, %v1029_v20  ;;  %v1039_v21 = vsel %vm965_vm2, %v1029_v20, 0 }
 0x2c0   : > { %v1031_v22 = vpop.permute.xlu1 %1030 }
 0x2c1   : > { %v1042_v24 = vsel %vm965_vm2, %v1031_v22, 0 }
 0x2c3   : > { %3593 = vmatmul.mubr.msk.bf16.vlgmr.msra.gmra.mrb[8].mxu1 %vm965_vm2, %v4385_v63 }
 0x2c4   : > { %3597 = vmatpush3.bf16.xpose.msra.mxu1 %v1039_v21  ;;  %3600 = vmatprep.mubr.msk.bf16.mxu1 %vm965_vm2, %v4399_v10 }
 0x2c5   : > { %3759 = vmatprep.subr.msk.bf16.mxu1 %vm965_vm2, %v1031_v22 }
 0x2cc   : > { %3599 = vmatpush3.bf16.xpose.msra.mxu1 %v1042_v24 }
 0x2cd   : > { %3612 = vmatprep.subr.bf16.mxu1 %v4401_v13 }
 0x2d3   : > { %3601 = vmatmul.mubr.msk.bf16.vlgmr.msra.gmra.mrb[12].mxu1 %vm965_vm2, %v4404_v15 }
 0x2d4   : > { %3613 = vmatpush3.bf16.msra.mxu1 %v4401_v13 }
 0x2d5   : > { %3761 = vmatprep.subr.msk.bf16.mxu1 %vm1185_vm3, %v4420_v25 }
 0x2d8   : > { %3615 = vmatpush3.bf16.msra.mxu1 %v1244_v26 }
 0x396   : > { %v3594_v28 = vpop.f32.mrb[8].mxu1 }
 0x397   : > { %v1012_v30 = vpop.f32.mrb[9].mxu1  ;;  %v1094_v33 = vmul.f32 0.25, %v3594_v28 }
 0x398   : > { %v1092_v34 = vmul.f32 0.25, %v1012_v30  ;;  %v3595_v23 = vpop.f32.mrb[10].mxu1 }
 0x399   : > { %v1015_v35 = vpop.f32.mrb[11].mxu1  ;;  %v1100_v39 = vadd.f32 %v1094_v33, %v4430_v32 }
 0x39a   : > { %v1093_v36 = vmul.f32 0.25, %v1015_v35  ;;  %v1098_v37 = vadd.f32 %v1092_v34, %v4430_v32 }
 0x39b   : > { %v1111_v44 = vsel %vm1104_vm5, %v1100_v39, -inf }
 0x39c   : > { %v1105_v31 = vsel %vm1104_vm5, %v1098_v37, -inf  ;;  %v1099_v38 = vadd.f32 %v1093_v36, %v4430_v32 }
 0x39d   : > { %1106 = vmax.xlane.f32.xlu0 %v1105_v31 }
 0x39e   : > { %v1108_v42 = vsel %vm1104_vm5, %v1099_v38, -inf }
 0x39f   : > { %1109 = vmax.xlane.f32.xlu1 %v1108_v42 }
 0x3a1   : > { %1112 = vmax.xlane.f32.xlu0 %v1111_v44 }
 0x3a6   : > { %v3602_v45 = vpop.f32.mrb[12].mxu1 }
 0x3a7   : > { %v1097_v46 = vmul.f32 0.25, %v3602_v45  ;;  %v1078_v47 = vpop.f32.mrb[13].mxu1 }
 0x3a8   : > { %v1095_v48 = vmul.f32 0.25, %v1078_v47  ;;  %v3603_v49 = vpop.f32.mrb[14].mxu1 }
 0x3a9   : > { %v1081_v50 = vpop.f32.mrb[15].mxu1  ;;  %v1103_v51 = vadd.f32 %v1097_v46, %v4430_v32 }
 0x3aa   : > { %v1096_v52 = vmul.f32 0.25, %v1081_v50  ;;  %v1101_v53 = vadd.f32 %v1095_v48, %v4430_v32 }
 0x3ab   : > { %v1120_v54 = vsel %vm1104_vm5, %v1103_v51, -inf }
 0x3ac   : > { %1121 = vmax.xlane.f32.xlu1 %v1120_v54  ;;  %v1114_v56 = vsel %vm1104_vm5, %v1101_v53, -inf  ;;  %v1102_v58 = vadd.f32 %v1096_v52, %v4430_v32 }
 0x3ad   : > { %1115 = vmax.xlane.f32.xlu0 %v1114_v56 }
 0x3ae   : > { %v1117_v59 = vsel %vm1104_vm5, %v1102_v58, -inf }
 0x3b1   : > { %1118 = vmax.xlane.f32.xlu0 %v1117_v59 }
 0x42a   : > { %v1107_v61 = vpop.xlane.xlu0 %1106 }
 0x42b   : > { %v1123_v0 = vsub.f32 %v1098_v37, %v1107_v61 }
 0x42c   : > { %v1110_v62 = vpop.xlane.xlu1 %1109 }
 0x42d   : > { %v1124_v2 = vsub.f32 %v1099_v38, %v1110_v62  ;;  %v1129_v6 = vmul.f32 1.442695, %v1123_v0 }
 0x42e   : > { %v1113_v3 = vpop.xlane.xlu0 %1112 }
 0x42f   : > { %v1131_v4 = vmul.f32 1.442695, %v1124_v2  ;;  %v1125_v5 = vsub.f32 %v1100_v39, %v1113_v3 }
 0x431   : > { %3909 = vpow2.f32 %v1131_v4  ;;  %v1133_v7 = vmul.f32 1.442695, %v1125_v5 }
 0x433   : > { %3911 = vpow2.f32 %v1133_v7 }
 0x434   : > { %3913 = vpow2.f32 %v1129_v6 }
 0x439   : > { %v1122_v8 = vpop.xlane.xlu1 %1121 }
 0x43a   : > { %v1128_v9 = vsub.f32 %v1103_v51, %v1122_v8  ;;  %v1116_v11 = vpop.xlane.xlu0 %1115 }
 0x43b   : > { %v3910_v12 = vpop.eup %3909  ;;  %v1126_v14 = vsub.f32 %v1101_v53, %v1116_v11 }
 0x43c   : > { %v1139_v16 = vmul.f32 1.442695, %v1128_v9  ;;  %v1144_v17 = vsel %vm1104_vm5, %v3910_v12, 0.0 }
 0x43d   : > { %v3912_v18 = vpop.eup %3911  ;;  %v1135_v19 = vmul.f32 1.442695, %v1126_v14  ;;  %1145 = vadd.xlane.f32.xlu1 %v1144_v17 }
 0x43e   : > { %3915 = vpow2.f32 %v1139_v16  ;;  %v1119_v20 = vpop.xlane.xlu0 %1118  ;;  %v1147_v21 = vsel %vm1104_vm5, %v3912_v18, 0.0  ;;  %v3914_v22 = vpop.eup %3913 }
 0x43f   : > { %v1127_v24 = vsub.f32 %v1102_v58, %v1119_v20  ;;  %1148 = vadd.xlane.f32.xlu0 %v1147_v21  ;;  %3917 = vpow2.f32 %v1135_v19  ;;  %v1141_v27 = vsel %vm1104_vm5, %v3914_v22, 0.0 }
 0x441   : > { %v1137_v26 = vmul.f32 1.442695, %v1127_v24 }
 0x443   : > { %3919 = vpow2.f32 %v1137_v26  ;;  %1142 = vadd.xlane.f32.xlu0 %v1141_v27 }
 0x448   : > { %v3916_v28 = vpop.eup %3915 }
 0x449   : > { %v1156_v29 = vsel %vm1104_vm5, %v3916_v28, 0.0  ;;  %v3918_v30 = vpop.eup %3917 }
 0x44a   : > { %1157 = vadd.xlane.f32.xlu1 %v1156_v29  ;;  %v1150_v34 = vsel %vm1104_vm5, %v3918_v30, 0.0 }
 0x44d   : > { %v3920_v33 = vpop.eup %3919 }
 0x44e   : > { %1151 = vadd.xlane.f32.xlu1 %v1150_v34  ;;  %v1153_v23 = vsel %vm1104_vm5, %v3920_v33, 0.0 }
 0x44f   : > { %1154 = vadd.xlane.f32.xlu0 %v1153_v23 }
 0x45f   : > { %1300 = vrot.lane.b32.xlu1 %v4385_v63, %s4118_s21 }
 0x463   : > { %1366 = vrot.lane.b32.xlu1 %v4399_v10, %s4118_s21 }
 0x465   : > { %1298 = vrot.lane.b32.xlu0 %v4381_v57, %s4118_s21 }
 0x467   : > { %1294 = vrot.lane.b32.xlu1 %v4381_v57, %s4119_s27 }
 0x469   : > { %1296 = vrot.lane.b32.xlu0 %v4385_v63, %s4119_s27 }
 0x46b   : > { %1368 = vrot.lane.b32.xlu1 %v4404_v15, %s4118_s21 }
 0x46d   : > { %1362 = vrot.lane.b32.xlu0 %v4399_v10, %s4119_s27 }
 0x46f   : > { %1364 = vrot.lane.b32.xlu1 %v4404_v15, %s4119_s27 }
 0x4ca   : > { %v1146_v35 = vpop.xlane.xlu1 %1145 }
 0x4cc   : > { %v1149_v36 = vpop.xlane.xlu0 %1148 }
 0x4cd   : > { %3921 = vrcp.f32 %v1149_v36 }
 0x4ce   : > { %3923 = vrcp.f32 %v1146_v35 }
 0x4d0   : > { %v1143_v37 = vpop.xlane.xlu0 %1142 }
 0x4d1   : > { %3925 = vrcp.f32 %v1143_v37 }
 0x4d7   : > { %v1158_v31 = vpop.xlane.xlu1 %1157  ;;  %v3922_v38 = vpop.eup %3921 }
 0x4d8   : > { %v3924_v39 = vpop.eup %3923  ;;  %3927 = vrcp.f32 %v1158_v31  ;;  %v1167_v45 = vmul.f32 %v3922_v38, %v3912_v18 }
 0x4d9   : > { %v1166_v48 = vmul.f32 %v3924_v39, %v3910_v12 }
 0x4da   : > { %v1172_v51 = vpack.c.bf16 %v1167_v45, %v1167_v45 }
 0x4db   : > { %v3926_v42 = vpop.eup %3925  ;;  %v1152_v44 = vpop.xlane.xlu1 %1151 }
 0x4dc   : > { %3929 = vrcp.f32 %v1152_v44  ;;  %v1155_v46 = vpop.xlane.xlu0 %1154  ;;  %v1165_v47 = vmul.f32 %v3926_v42, %v3914_v22 }
 0x4dd   : > { %3931 = vrcp.f32 %v1155_v46 }
 0x4de   : > { %v1171_v49 = vpack.c.bf16 %v1166_v48, %v1165_v47 }
 0x4df   : > { %v1301_v50 = vpop.permute.xlu1 %1300 }
 0x4e0   : > { %3608 = vmatprep.mubr.msk.bf16.mxu0 %vm1104_vm5, %v1171_v49  ;;  %v1299_v52 = vpop.permute.xlu0 %1298  ;;  %v1312_v4 = vsel %vm965_vm2, %v1301_v50, 0 }
 0x4e1   : > { %v1309_v53 = vsel %vm965_vm2, %v1299_v52, 0  ;;  %3609 = vmatmul.mubr.msk.bf16.vlgmr.msra.gmra.mrb[4].mxu0 %vm1104_vm5, %v1172_v51  ;;  %3762 = vmatprep.subr.msk.bf16.mxu0 %vm965_vm2, %v1299_v52 }
 0x4e2   : > { %3621 = vmatpush3.bf16.xpose.msra.mxu0 %v1309_v53  ;;  %v3928_v56 = vpop.eup %3927 }
 0x4e3   : > { %v1367_v54 = vpop.permute.xlu1 %1366  ;;  %3763 = vmatprep.subr.msk.bf16.mxu0 %vm965_vm2, %v1301_v50  ;;  %v1170_v61 = vmul.f32 %v3928_v56, %v3916_v28 }
 0x4e4   : > { %3764 = vmatprep.subr.msk.bf16.mxu1 %vm965_vm2, %v1367_v54  ;;  %v1297_v62 = vpop.permute.xlu0 %1296  ;;  %v1377_v7 = vsel %vm965_vm2, %v1367_v54, 0 }
 0x4e5   : > { %v1174_v6 = vpack.c.bf16 %v1170_v61, %v1170_v61 }
 0x4e6   : > { %v3930_v58 = vpop.eup %3929 }
 0x4e7   : > { %v3932_v59 = vpop.eup %3931  ;;  %v1295_v0 = vpop.permute.xlu1 %1294  ;;  %v1168_v2 = vmul.f32 %v3930_v58, %v3918_v30 }
 0x4e8   : > { %3624 = vmatprep.mubr.msk.bf16.mxu0 %vm965_vm2, %v1295_v0  ;;  %v1169_v3 = vmul.f32 %v3932_v59, %v3920_v33  ;;  %v1363_v8 = vpop.permute.xlu0 %1362 }
 0x4ea   : > { %3623 = vmatpush3.bf16.xpose.msra.mxu0 %v1312_v4  ;;  %v1173_v5 = vpack.c.bf16 %v1169_v3, %v1168_v2 }
 0x4eb   : > { %v1369_v9 = vpop.permute.xlu1 %1368 }
 0x4ec   : > { %3616 = vmatprep.mubr.msk.bf16.mxu1 %vm1104_vm5, %v1173_v5  ;;  %v1380_v11 = vsel %vm965_vm2, %v1369_v9, 0 }
 0x4ed   : > { %3617 = vmatmul.mubr.msk.bf16.vlgmr.msra.gmra.mrb[16].mxu1 %vm1104_vm5, %v1174_v6 }
 0x4ee   : > { %3629 = vmatpush3.bf16.xpose.msra.mxu1 %v1377_v7  ;;  %3632 = vmatprep.mubr.msk.bf16.mxu1 %vm965_vm2, %v1363_v8 }
 0x4ef   : > { %3765 = vmatprep.subr.msk.bf16.mxu1 %vm965_vm2, %v1369_v9  ;;  %v1365_v12 = vpop.permute.xlu1 %1364 }
 0x4f1   : > { %3625 = vmatmul.mubr.msk.bf16.vlgmr.msra.gmra.mrb[8].mxu0 %vm965_vm2, %v1297_v62 }
 0x4f6   : > { %3631 = vmatpush3.bf16.xpose.msra.mxu1 %v1380_v11 }
 0x4fd   : > { %3633 = vmatmul.mubr.msk.bf16.vlgmr.msra.gmra.mrb[20].mxu1 %vm965_vm2, %v1365_v12 }
 0x5b4   : > { %v4482_v14 = vpop.f32.mrb[4].mxu0 }
 0x5b5   : > { %v4484_v16 = vpop.f32.mrb[5].mxu0 }
 0x5b6   : > { %v3611_v17 = vpop.f32.mrb[6].mxu0 }
 0x5b7   : > { %v4486_v18 = vpop.f32.mrb[7].mxu0 }
 0x5c0   : > { %v4488_v19 = vpop.f32.mrb[16].mxu1 }
 0x5c1   : > { %v4490_v20 = vpop.f32.mrb[17].mxu1 }
 0x5c2   : > { %v3619_v21 = vpop.f32.mrb[18].mxu1 }
 0x5c3   : > { %v4492_v22 = vpop.f32.mrb[19].mxu1 }
 0x5c4   : > { %v3626_v24 = vpop.f32.mrb[8].mxu0 }
 0x5c5   : > { %v1348_v26 = vpop.f32.mrb[9].mxu0  ;;  %v1432_v27 = vmul.f32 0.25, %v3626_v24 }
 0x5c6   : > { %v1430_v28 = vmul.f32 0.25, %v1348_v26  ;;  %v3627_v29 = vpop.f32.mrb[10].mxu0 }
 0x5c7   : > { %v1351_v30 = vpop.f32.mrb[11].mxu0  ;;  %v1438_v36 = vadd.f32 %v1432_v27, %v4430_v32 }
 0x5c8   : > { %v1431_v33 = vmul.f32 0.25, %v1351_v30  ;;  %v1436_v34 = vadd.f32 %v1430_v28, %v4430_v32 }
 0x5c9   : > { %v1448_v31 = vsel %vm1104_vm5, %v1438_v36, -inf }
 0x5ca   : > { %v1442_v23 = vsel %vm1104_vm5, %v1436_v34, -inf  ;;  %v1437_v35 = vadd.f32 %v1431_v33, %v4430_v32 }
 0x5cb   : > { %1443 = vmax.xlane.f32.xlu0 %v1442_v23 }
 0x5cc   : > { %v1445_v37 = vsel %vm1104_vm5, %v1437_v35, -inf }
 0x5cd   : > { %1446 = vmax.xlane.f32.xlu1 %v1445_v37 }
 0x5cf   : > { %1449 = vmax.xlane.f32.xlu0 %v1448_v31 }
 0x5d0   : > { %v3634_v38 = vpop.f32.mrb[20].mxu1 }
 0x5d1   : > { %v1435_v39 = vmul.f32 0.25, %v3634_v38  ;;  %v1416_v42 = vpop.f32.mrb[21].mxu1 }
 0x5d2   : > { %v1433_v44 = vmul.f32 0.25, %v1416_v42  ;;  %v3635_v45 = vpop.f32.mrb[22].mxu1 }
 0x5d3   : > { %v1419_v46 = vpop.f32.mrb[23].mxu1  ;;  %v1441_v47 = vadd.f32 %v1435_v39, %v4430_v32 }
 0x5d4   : > { %v1434_v48 = vmul.f32 0.25, %v1419_v46  ;;  %v1439_v49 = vadd.f32 %v1433_v44, %v4430_v32 }
 0x5d5   : > { %v1457_v50 = vsel %vm1104_vm5, %v1441_v47, -inf }
 0x5d6   : > { %1458 = vmax.xlane.f32.xlu1 %v1457_v50  ;;  %v1451_v51 = vsel %vm1104_vm5, %v1439_v49, -inf  ;;  %v4505_v52 = vadd.f32 %v1434_v48, %v4430_v32 }
 0x5d7   : > { %1452 = vmax.xlane.f32.xlu0 %v1451_v51 }
 0x5d8   : > { %v1454_v53 = vsel %vm1104_vm5, %v4505_v52, -inf }
 0x5db   : > { %1455 = vmax.xlane.f32.xlu0 %v1454_v53 }
 0x5e7   : > { %1516 = vrot.lane.b32.xlu1 %v4390_v1, %s4119_s27 }
 0x5eb   : > { %1578 = vrot.lane.b32.xlu1 %v4401_v13, %s4119_s27 }
 0x5ef   : > { %1644 = vrot.lane.b32.xlu1 %v4381_v57, %s4120_s29 }
 0x5f1   : > { %1514 = vrot.lane.b32.xlu0 %v4383_v60, %s4119_s27 }
 0x5f3   : > { %1646 = vrot.lane.b32.xlu1 %v4385_v63, %s4120_s29 }
 0x658   : > { %v1444_v54 = vpop.xlane.xlu0 %1443 }
 0x659   : > { %v1460_v59 = vsub.f32 %v1436_v34, %v1444_v54 }
 0x65a   : > { %v1447_v56 = vpop.xlane.xlu1 %1446 }
 0x65b   : > { %v1461_v58 = vsub.f32 %v1437_v35, %v1447_v56  ;;  %v1466_v3 = vmul.f32 1.442695, %v1460_v59 }
 0x65c   : > { %v1450_v61 = vpop.xlane.xlu0 %1449 }
 0x65d   : > { %v1468_v62 = vmul.f32 1.442695, %v1461_v58  ;;  %v1462_v0 = vsub.f32 %v1438_v36, %v1450_v61 }
 0x65f   : > { %3933 = vpow2.f32 %v1468_v62  ;;  %v1470_v2 = vmul.f32 1.442695, %v1462_v0 }
 0x661   : > { %3935 = vpow2.f32 %v1470_v2 }
 0x662   : > { %3937 = vpow2.f32 %v1466_v3 }
 0x663   : > { %v1459_v4 = vpop.xlane.xlu1 %1458 }
 0x664   : > { %v1465_v5 = vsub.f32 %v1441_v47, %v1459_v4  ;;  %v1453_v6 = vpop.xlane.xlu0 %1452 }
 0x665   : > { %v1463_v7 = vsub.f32 %v1439_v49, %v1453_v6 }
 0x666   : > { %v1476_v8 = vmul.f32 1.442695, %v1465_v5 }
 0x667   : > { %v1472_v9 = vmul.f32 1.442695, %v1463_v7  ;;  %v1517_v11 = vpop.permute.xlu1 %1516 }
 0x668   : > { %3939 = vpow2.f32 %v1476_v8  ;;  %v1456_v12 = vpop.xlane.xlu0 %1455  ;;  %v1526_v30 = vsel %vm1185_vm3, %v1517_v11, 0 }
 0x669   : > { %v3934_v17 = vpop.eup %3933  ;;  %3941 = vpow2.f32 %v1472_v9  ;;  %v1464_v31 = vsub.f32 %v4505_v52, %v1456_v12 }
 0x66a   : > { %v1481_v21 = vsel %vm1104_vm5, %v3934_v17, 0.0 }
 0x66b   : > { %v3936_v24 = vpop.eup %3935  ;;  %v1579_v26 = vpop.permute.xlu1 %1578  ;;  %1482 = vadd.xlane.f32.xlu1 %v1481_v21  ;;  %v1474_v38 = vmul.f32 1.442695, %v1464_v31 }
 0x66c   : > { %3644 = vmatprep.subr.bf16.mxu1 %v1579_v26  ;;  %v1515_v27 = vpop.permute.xlu0 %1514  ;;  %v1484_v28 = vsel %vm1104_vm5, %v3936_v24, 0.0  ;;  %v3938_v29 = vpop.eup %3937 }
 0x66d   : > { %3636 = vmatprep.subr.bf16.mxu0 %v1515_v27  ;;  %3645 = vmatpush3.bf16.msra.mxu1 %v1579_v26  ;;  %v1478_v33 = vsel %vm1104_vm5, %v3938_v29, 0.0  ;;  %3943 = vpow2.f32 %v1474_v38 }
 0x66e   : > { %1485 = vadd.xlane.f32.xlu0 %v1484_v28  ;;  %3637 = vmatpush3.bf16.msra.mxu0 %v1515_v27 }
 0x66f   : > { %3766 = vmatprep.subr.msk.bf16.mxu0 %vm1185_vm3, %v1517_v11  ;;  %v1645_v23 = vpop.permute.xlu1 %1644 }
 0x670   : > { %v1655_v0 = vsel %vm965_vm2, %v1645_v23, 0 }
 0x672   : > { %v4524_v34 = vpop.eup %3939  ;;  %1479 = vadd.xlane.f32.xlu0 %v1478_v33  ;;  %3639 = vmatpush3.bf16.msra.mxu0 %v1526_v30 }
 0x673   : > { %3768 = vmatprep.subr.msk.bf16.mxu0 %vm965_vm2, %v1645_v23  ;;  %v1493_v35 = vsel %vm1104_vm5, %v4524_v34, 0.0  ;;  %v3942_v36 = vpop.eup %3941  ;;  %v1647_v44 = vpop.permute.xlu1 %1646 }
 0x674   : > { %1494 = vadd.xlane.f32.xlu1 %v1493_v35  ;;  %v1487_v37 = vsel %vm1104_vm5, %v3942_v36, 0.0  ;;  %v1658_v3 = vsel %vm965_vm2, %v1647_v44, 0 }
 0x677   : > { %v3944_v39 = vpop.eup %3943 }
 0x678   : > { %1488 = vadd.xlane.f32.xlu1 %v1487_v37  ;;  %v1490_v42 = vsel %vm1104_vm5, %v3944_v39, 0.0 }
 0x688   : > { %1580 = vrot.lane.b32.xlu0 %v4420_v25, %s4119_s27 }
 0x689   : > { %1640 = vrot.lane.b32.xlu1 %v4381_v57, %s4121_s4 }
 0x68d   : > { %1714 = vrot.lane.b32.xlu1 %v4404_v15, %s4120_s29 }
 0x691   : > { %1710 = vrot.lane.b32.xlu1 %v4404_v15, %s4121_s4 }
 0x6a7   : > { %1491 = vadd.xlane.f32.xlu0 %v1490_v42 }
 0x6bd   : > { %1712 = vrot.lane.b32.xlu0 %v4399_v10, %s4120_s29 }
 0x6c1   : > { %1642 = vrot.lane.b32.xlu0 %v4385_v63, %s4121_s4 }
 0x6c5   : > { %1708 = vrot.lane.b32.xlu0 %v4399_v10, %s4121_s4 }
 0x6f8   : > { %v1483_v45 = vpop.xlane.xlu1 %1482 }
 0x6fb   : > { %v1486_v46 = vpop.xlane.xlu0 %1485 }
 0x6fc   : > { %3945 = vrcp.f32 %v1486_v46 }
 0x6fd   : > { %3947 = vrcp.f32 %v1483_v45 }
 0x6ff   : > { %v1480_v47 = vpop.xlane.xlu0 %1479 }
 0x700   : > { %3949 = vrcp.f32 %v1480_v47 }
 0x701   : > { %v1495_v49 = vpop.xlane.xlu1 %1494 }
 0x702   : > { %3951 = vrcp.f32 %v1495_v49 }
 0x703   : > { %v1581_v48 = vpop.permute.xlu0 %1580 }
 0x704   : > { %v1590_v50 = vsel %vm1185_vm3, %v1581_v48, 0  ;;  %3767 = vmatprep.subr.msk.bf16.mxu1 %vm1185_vm3, %v1581_v48 }
 0x705   : > { %3647 = vmatpush3.bf16.msra.mxu1 %v1590_v50  ;;  %v1489_v56 = vpop.xlane.xlu1 %1488 }
 0x706   : > { %v3946_v51 = vpop.eup %3945  ;;  %3953 = vrcp.f32 %v1489_v56 }
 0x707   : > { %v3948_v52 = vpop.eup %3947  ;;  %v1504_v54 = vmul.f32 %v3946_v51, %v3936_v24 }
 0x708   : > { %v1503_v59 = vmul.f32 %v3948_v52, %v3934_v17 }
 0x709   : > { %v1509_v62 = vpack.c.bf16 %v1504_v54, %v1504_v54  ;;  %v1641_v2 = vpop.permute.xlu1 %1640 }
 0x70a   : > { %v3950_v53 = vpop.eup %3949 }
 0x70b   : > { %v1502_v58 = vmul.f32 %v3950_v53, %v3938_v29 }
 0x70c   : > { %v3952_v6 = vpop.eup %3951 }
 0x70d   : > { %v1508_v61 = vpack.c.bf16 %v1503_v59, %v1502_v58  ;;  %v1507_v11 = vmul.f32 %v3952_v6, %v4524_v34  ;;  %v1715_v28 = vpop.permute.xlu1 %1714 }
 0x70e   : > { %v1726_v29 = vsel %vm965_vm2, %v1715_v28, 0 }
 0x70f   : > { %3640 = vmatprep.mubr.msk.bf16.mxu0 %vm1104_vm5, %v1508_v61  ;;  %v1511_v24 = vpack.c.bf16 %v1507_v11, %v1507_v11 }
 0x710   : > { %3641 = vmatmul.mubr.msk.bf16.vlgmr.msra.gmra.mrb[12].mxu0 %vm1104_vm5, %v1509_v62  ;;  %v3954_v8 = vpop.eup %3953 }
 0x711   : > { %3653 = vmatpush3.bf16.xpose.msra.mxu0 %v1655_v0  ;;  %3656 = vmatprep.mubr.msk.bf16.mxu0 %vm965_vm2, %v1641_v2  ;;  %v1505_v12 = vmul.f32 %v3954_v8, %v3942_v36  ;;  %v1711_v30 = vpop.permute.xlu1 %1710 }
 0x712   : > { %3769 = vmatprep.subr.msk.bf16.mxu0 %vm965_vm2, %v1647_v44 }
 0x719   : > { %3655 = vmatpush3.bf16.xpose.msra.mxu0 %v1658_v3 }
 0x734   : > { %v1492_v4 = vpop.xlane.xlu0 %1491 }
 0x735   : > { %3955 = vrcp.f32 %v1492_v4 }
 0x738   : > { %v1713_v5 = vpop.permute.xlu0 %1712 }
 0x739   : > { %3770 = vmatprep.subr.msk.bf16.mxu1 %vm965_vm2, %v1713_v5  ;;  %v1723_v26 = vsel %vm965_vm2, %v1713_v5, 0 }
 0x73c   : > { %v1643_v7 = vpop.permute.xlu0 %1642 }
 0x73d   : > { %3657 = vmatmul.mubr.msk.bf16.vlgmr.msra.gmra.mrb[16].mxu0 %vm965_vm2, %v1643_v7 }
 0x73f   : > { %v3956_v9 = vpop.eup %3955 }
 0x740   : > { %v1506_v17 = vmul.f32 %v3956_v9, %v3944_v39  ;;  %v1709_v27 = vpop.permute.xlu0 %1708 }
 0x742   : > { %v1510_v21 = vpack.c.bf16 %v1506_v17, %v1505_v12 }
 0x744   : > { %3648 = vmatprep.mubr.msk.bf16.mxu1 %vm1104_vm5, %v1510_v21 }
 0x745   : > { %3649 = vmatmul.mubr.msk.bf16.vlgmr.msra.gmra.mrb[24].mxu1 %vm1104_vm5, %v1511_v24 }
 0x746   : > { %3661 = vmatpush3.bf16.xpose.msra.mxu1 %v1723_v26  ;;  %3664 = vmatprep.mubr.msk.bf16.mxu1 %vm965_vm2, %v1709_v27 }
 0x747   : > { %3771 = vmatprep.subr.msk.bf16.mxu1 %vm965_vm2, %v1715_v28 }
 0x74e   : > { %3663 = vmatpush3.bf16.xpose.msra.mxu1 %v1726_v29 }
 0x755   : > { %3665 = vmatmul.mubr.msk.bf16.vlgmr.msra.gmra.mrb[28].mxu1 %vm965_vm2, %v1711_v30 }
 0x7e3   : > { %v4564_v33 = vpop.f32.mrb[12].mxu0 }
 0x7e4   : > { %v4566_v34 = vpop.f32.mrb[13].mxu0 }
 0x7e5   : > { %v3643_v23 = vpop.f32.mrb[14].mxu0 }
 0x7e6   : > { %v4568_v35 = vpop.f32.mrb[15].mxu0 }
 0x7e7   : > { %v3808_v36 = vpack.i.bf16 %v4568_v35, %v4566_v34 }
 0x810   : > { %v3658_v37 = vpop.f32.mrb[16].mxu0 }
 0x811   : > { %v1694_v31 = vpop.f32.mrb[17].mxu0  ;;  %v1778_v38 = vmul.f32 0.25, %v3658_v37 }
 0x812   : > { %v1776_v39 = vmul.f32 0.25, %v1694_v31  ;;  %v3659_v42 = vpop.f32.mrb[18].mxu0 }
 0x813   : > { %v1697_v44 = vpop.f32.mrb[19].mxu0  ;;  %v1784_v49 = vadd.f32 %v1778_v38, %v4430_v32 }
 0x814   : > { %v1777_v45 = vmul.f32 0.25, %v1697_v44  ;;  %v1782_v46 = vadd.f32 %v1776_v39, %v4430_v32 }
 0x815   : > { %v1794_v56 = vsel %vm1104_vm5, %v1784_v49, -inf }
 0x816   : > { %v1788_v47 = vsel %vm1104_vm5, %v1782_v46, -inf  ;;  %v1783_v48 = vadd.f32 %v1777_v45, %v4430_v32 }
 0x817   : > { %1789 = vmax.xlane.f32.xlu0 %v1788_v47 }
 0x818   : > { %v4576_v50 = vpop.f32.mrb[24].mxu1  ;;  %v1791_v51 = vsel %vm1104_vm5, %v1783_v48, -inf }
 0x819   : > { %v4579_v52 = vpop.f32.mrb[25].mxu1  ;;  %1792 = vmax.xlane.f32.xlu1 %v1791_v51 }
 0x81a   : > { %v3823_v53 = vpack.i.bf16 %v4579_v52, %v4564_v33  ;;  %v3651_v54 = vpop.f32.mrb[26].mxu1 }
 0x81b   : > { %v4584_v58 = vpop.f32.mrb[27].mxu1  ;;  %1795 = vmax.xlane.f32.xlu0 %v1794_v56 }
 0x81c   : > { %v3838_v59 = vpack.i.bf16 %v4576_v50, %v4584_v58 }
 0x828   : > { %v3666_v61 = vpop.f32.mrb[28].mxu1 }
 0x829   : > { %v1781_v62 = vmul.f32 0.25, %v3666_v61  ;;  %v1762_v0 = vpop.f32.mrb[29].mxu1 }
 0x82a   : > { %v1779_v2 = vmul.f32 0.25, %v1762_v0  ;;  %v3667_v3 = vpop.f32.mrb[30].mxu1 }
 0x82b   : > { %v1765_v4 = vpop.f32.mrb[31].mxu1  ;;  %v1787_v5 = vadd.f32 %v1781_v62, %v4430_v32 }
 0x82c   : > { %v1780_v6 = vmul.f32 0.25, %v1765_v4  ;;  %v1785_v7 = vadd.f32 %v1779_v2, %v4430_v32 }
 0x82d   : > { %v1803_v8 = vsel %vm1104_vm5, %v1787_v5, -inf }
 0x82e   : > { %1804 = vmax.xlane.f32.xlu1 %v1803_v8  ;;  %v1797_v9 = vsel %vm1104_vm5, %v1785_v7, -inf  ;;  %v1786_v11 = vadd.f32 %v1780_v6, %v4430_v32 }
 0x82f   : > { %1798 = vmax.xlane.f32.xlu0 %v1797_v9 }
 0x830   : > { %v1800_v12 = vsel %vm1104_vm5, %v1786_v11, -inf }
 0x833   : > { %1801 = vmax.xlane.f32.xlu0 %v1800_v12 }
 0x83f   : > { %1860 = vrot.lane.b32.xlu1 %v4390_v1, %s4121_s4 }
 0x843   : > { %1920 = vrot.lane.b32.xlu1 %v4401_v13, %s4121_s4 }
 0x847   : > { %1986 = vrot.lane.b32.xlu1 %v4381_v57, %s4122_s19 }
 0x849   : > { %1858 = vrot.lane.b32.xlu0 %v4383_v60, %s4121_s4 }
 0x84b   : > { %1988 = vrot.lane.b32.xlu1 %v4385_v63, %s4122_s19 }
 0x8a4   : > { %v1790_v17 = vpop.xlane.xlu0 %1789 }
 0x8a5   : > { %v1806_v24 = vsub.f32 %v1782_v46, %v1790_v17 }
 0x8a6   : > { %v1793_v21 = vpop.xlane.xlu1 %1792 }
 0x8a7   : > { %v1807_v26 = vsub.f32 %v1783_v48, %v1793_v21  ;;  %v1812_v30 = vmul.f32 1.442695, %v1806_v24 }
 0x8a8   : > { %v1796_v27 = vpop.xlane.xlu0 %1795 }
 0x8a9   : > { %v1814_v28 = vmul.f32 1.442695, %v1807_v26  ;;  %v1808_v29 = vsub.f32 %v1784_v49, %v1796_v27 }
 0x8ab   : > { %3957 = vpow2.f32 %v1814_v28  ;;  %v1816_v23 = vmul.f32 1.442695, %v1808_v29 }
 0x8ad   : > { %3959 = vpow2.f32 %v1816_v23 }
 0x8ae   : > { %3961 = vpow2.f32 %v1812_v30 }
 0x8b5   : > { %v4604_v37 = vpop.eup %3957 }
 0x8b6   : > { %v1827_v31 = vsel %vm1104_vm5, %v4604_v37, 0.0 }
 0x8b7   : > { %v3960_v38 = vpop.eup %3959  ;;  %1828 = vadd.xlane.f32.xlu1 %v1827_v31 }
 0x8b8   : > { %v1830_v39 = vsel %vm1104_vm5, %v3960_v38, 0.0  ;;  %v3962_v42 = vpop.eup %3961 }
 0x8b9   : > { %1831 = vadd.xlane.f32.xlu0 %v1830_v39  ;;  %v1824_v47 = vsel %vm1104_vm5, %v3962_v42, 0.0 }
 0x8bb   : > { %v1805_v44 = vpop.xlane.xlu1 %1804 }
 0x8bc   : > { %v1811_v45 = vsub.f32 %v1787_v5, %v1805_v44  ;;  %v1799_v46 = vpop.xlane.xlu0 %1798 }
 0x8bd   : > { %v1809_v48 = vsub.f32 %v1785_v7, %v1799_v46  ;;  %1825 = vadd.xlane.f32.xlu0 %v1824_v47 }
 0x8be   : > { %v1822_v49 = vmul.f32 1.442695, %v1811_v45 }
 0x8bf   : > { %v1818_v51 = vmul.f32 1.442695, %v1809_v48  ;;  %v1861_v54 = vpop.permute.xlu1 %1860 }
 0x8c0   : > { %3963 = vpow2.f32 %v1822_v49  ;;  %v1802_v56 = vpop.xlane.xlu0 %1801  ;;  %v1870_v0 = vsel %vm1185_vm3, %v1861_v54, 0 }
 0x8c1   : > { %3965 = vpow2.f32 %v1818_v51  ;;  %v1810_v7 = vsub.f32 %v1786_v11, %v1802_v56 }
 0x8c3   : > { %v1921_v61 = vpop.permute.xlu1 %1920  ;;  %v1820_v8 = vmul.f32 1.442695, %v1810_v7 }
 0x8c4   : > { %3676 = vmatprep.subr.bf16.mxu1 %v1921_v61  ;;  %v1859_v62 = vpop.permute.xlu0 %1858 }
 0x8c5   : > { %3668 = vmatprep.subr.bf16.mxu0 %v1859_v62  ;;  %3677 = vmatpush3.bf16.msra.mxu1 %v1921_v61  ;;  %3967 = vpow2.f32 %v1820_v8 }
 0x8c6   : > { %3669 = vmatpush3.bf16.msra.mxu0 %v1859_v62 }
 0x8c7   : > { %3772 = vmatprep.subr.msk.bf16.mxu0 %vm1185_vm3, %v1861_v54  ;;  %v1987_v3 = vpop.permute.xlu1 %1986 }
 0x8c8   : > { %v1997_v39 = vsel %vm965_vm2, %v1987_v3, 0 }
 0x8ca   : > { %v4612_v2 = vpop.eup %3963  ;;  %3671 = vmatpush3.bf16.msra.mxu0 %v1870_v0 }
 0x8cb   : > { %3774 = vmatprep.subr.msk.bf16.mxu0 %vm965_vm2, %v1987_v3  ;;  %v1839_v4 = vsel %vm1104_vm5, %v4612_v2, 0.0  ;;  %v3966_v5 = vpop.eup %3965 }
 0x8cc   : > { %1840 = vadd.xlane.f32.xlu1 %v1839_v4  ;;  %v1833_v6 = vsel %vm1104_vm5, %v3966_v5, 0.0 }
 0x8cf   : > { %v3968_v9 = vpop.eup %3967 }
 0x8d0   : > { %1834 = vadd.xlane.f32.xlu1 %v1833_v6  ;;  %v1836_v12 = vsel %vm1104_vm5, %v3968_v9, 0.0 }
 0x8d3   : > { %1922 = vrot.lane.b32.xlu0 %v4420_v25, %s4121_s4 }
 0x8e1   : > { %1982 = vrot.lane.b32.xlu1 %v4381_v57, %s4123_s30  ;;  %v1989_v57 = vpop.permute.xlu1 %1988 }
 0x8e5   : > { %2056 = vrot.lane.b32.xlu1 %v4404_v15, %s4122_s19 }
 0x8e9   : > { %2052 = vrot.lane.b32.xlu1 %v4404_v15, %s4123_s30 }
 0x8f2   : > { %1837 = vadd.xlane.f32.xlu0 %v1836_v12 }
 0x908   : > { %2054 = vrot.lane.b32.xlu0 %v4399_v10, %s4122_s19 }
 0x90c   : > { %1984 = vrot.lane.b32.xlu0 %v4385_v63, %s4123_s30 }
 0x910   : > { %2050 = vrot.lane.b32.xlu0 %v4399_v10, %s4123_s30 }
 0x944   : > { %v1829_v11 = vpop.xlane.xlu1 %1828 }
 0x946   : > { %v1832_v17 = vpop.xlane.xlu0 %1831 }
 0x947   : > { %3969 = vrcp.f32 %v1832_v17 }
 0x948   : > { %3971 = vrcp.f32 %v1829_v11 }
 0x94a   : > { %v1826_v21 = vpop.xlane.xlu0 %1825 }
 0x94b   : > { %3973 = vrcp.f32 %v1826_v21 }
 0x94e   : > { %v1923_v15 = vpop.permute.xlu0 %1922 }
 0x94f   : > { %v1932_v24 = vsel %vm1185_vm3, %v1923_v15, 0  ;;  %3773 = vmatprep.subr.msk.bf16.mxu1 %vm1185_vm3, %v1923_v15 }
 0x950   : > { %3679 = vmatpush3.bf16.msra.mxu1 %v1932_v24 }
 0x951   : > { %v3970_v26 = vpop.eup %3969 }
 0x952   : > { %v3972_v27 = vpop.eup %3971  ;;  %v1850_v63 = vmul.f32 %v3970_v26, %v3960_v38  ;;  %v2000_v38 = vsel %vm965_vm2, %v1989_v57, 0 }
 0x953   : > { %v1849_v10 = vmul.f32 %v3972_v27, %v4604_v37 }
 0x954   : > { %v1855_v31 = vpack.c.bf16 %v1850_v63, %v1850_v63 }
 0x955   : > { %v3974_v28 = vpop.eup %3973 }
 0x956   : > { %v1848_v29 = vmul.f32 %v3974_v28, %v3962_v42 }
 0x958   : > { %v1854_v30 = vpack.c.bf16 %v1849_v10, %v1848_v29 }
 0x959   : > { %v1841_v23 = vpop.xlane.xlu1 %1840 }
 0x95a   : > { %3672 = vmatprep.mubr.msk.bf16.mxu0 %vm1104_vm5, %v1854_v30  ;;  %3975 = vrcp.f32 %v1841_v23 }
 0x95b   : > { %3673 = vmatmul.mubr.msk.bf16.vlgmr.msra.gmra.mrb[20].mxu0 %vm1104_vm5, %v1855_v31 }
 0x95c   : > { %3685 = vmatpush3.bf16.xpose.msra.mxu0 %v1997_v39 }
 0x95d   : > { %v1835_v44 = vpop.xlane.xlu1 %1834  ;;  %3775 = vmatprep.subr.msk.bf16.mxu0 %vm965_vm2, %v1989_v57 }
 0x95e   : > { %3977 = vrcp.f32 %v1835_v44 }
 0x961   : > { %v1983_v45 = vpop.permute.xlu1 %1982 }
 0x962   : > { %3688 = vmatprep.mubr.msk.bf16.mxu0 %vm965_vm2, %v1983_v45 }
 0x964   : > { %3687 = vmatpush3.bf16.xpose.msra.mxu0 %v2000_v38  ;;  %v3976_v46 = vpop.eup %3975 }
 0x965   : > { %v1853_v51 = vmul.f32 %v3976_v46, %v4612_v2  ;;  %v2057_v4 = vpop.permute.xlu1 %2056 }
 0x966   : > { %v2068_v6 = vsel %vm965_vm2, %v2057_v4, 0 }
 0x967   : > { %v1857_v62 = vpack.c.bf16 %v1853_v51, %v1853_v51 }
 0x968   : > { %v3978_v48 = vpop.eup %3977 }
 0x969   : > { %v1851_v54 = vmul.f32 %v3978_v48, %v3966_v5  ;;  %v2053_v2 = vpop.permute.xlu1 %2052 }
 0x97f   : > { %v1838_v37 = vpop.xlane.xlu0 %1837 }
 0x980   : > { %3979 = vrcp.f32 %v1838_v37 }
 0x983   : > { %v2055_v42 = vpop.permute.xlu0 %2054 }
 0x984   : > { %3776 = vmatprep.subr.msk.bf16.mxu1 %vm965_vm2, %v2055_v42  ;;  %v2065_v0 = vsel %vm965_vm2, %v2055_v42, 0 }
 0x987   : > { %v1985_v47 = vpop.permute.xlu0 %1984 }
 0x988   : > { %3689 = vmatmul.mubr.msk.bf16.vlgmr.msra.gmra.mrb[24].mxu0 %vm965_vm2, %v1985_v47 }
 0x98a   : > { %v3980_v49 = vpop.eup %3979 }
 0x98b   : > { %v1852_v56 = vmul.f32 %v3980_v49, %v3968_v9  ;;  %v2051_v3 = vpop.permute.xlu0 %2050 }
 0x98d   : > { %v1856_v61 = vpack.c.bf16 %v1852_v56, %v1851_v54 }
 0x98f   : > { %3680 = vmatprep.mubr.msk.bf16.mxu1 %vm1104_vm5, %v1856_v61 }
 0x990   : > { %3681 = vmatmul.mubr.msk.bf16.vlgmr.msra.gmra.mrb[32].mxu1 %vm1104_vm5, %v1857_v62 }
 0x991   : > { %3693 = vmatpush3.bf16.xpose.msra.mxu1 %v2065_v0  ;;  %3696 = vmatprep.mubr.msk.bf16.mxu1 %vm965_vm2, %v2051_v3 }
 0x992   : > { %3777 = vmatprep.subr.msk.bf16.mxu1 %vm965_vm2, %v2057_v4 }
 0x999   : > { %3695 = vmatpush3.bf16.xpose.msra.mxu1 %v2068_v6 }
 0x9a0   : > { %3697 = vmatmul.mubr.msk.bf16.vlgmr.msra.gmra.mrb[36].mxu1 %vm965_vm2, %v2053_v2 }
 0xa2e   : > { %v4652_v5 = vpop.f32.mrb[20].mxu0 }
 0xa2f   : > { %v4654_v7 = vpop.f32.mrb[21].mxu0 }
 0xa30   : > { %v3675_v8 = vpop.f32.mrb[22].mxu0 }
 0xa31   : > { %v4656_v9 = vpop.f32.mrb[23].mxu0 }
 0xa32   : > { %v3813_v12 = vpack.i.bf16 %v4656_v9, %v4654_v7 }
 0xa5b   : > { %v3690_v57 = vpop.f32.mrb[24].mxu0 }
 0xa5c   : > { %v2036_v11 = vpop.f32.mrb[25].mxu0  ;;  %v2120_v17 = vmul.f32 0.25, %v3690_v57 }
 0xa5d   : > { %v2118_v21 = vmul.f32 0.25, %v2036_v11  ;;  %v3691_v15 = vpop.f32.mrb[26].mxu0 }
 0xa5e   : > { %v2039_v24 = vpop.f32.mrb[27].mxu0  ;;  %v2126_v29 = vadd.f32 %v2120_v17, %v4430_v32 }
 0xa5f   : > { %v2119_v26 = vmul.f32 0.25, %v2039_v24  ;;  %v2124_v27 = vadd.f32 %v2118_v21, %v4430_v32 }
 0xa60   : > { %v2136_v44 = vsel %vm1104_vm5, %v2126_v29, -inf }
 0xa61   : > { %v2130_v28 = vsel %vm1104_vm5, %v2124_v27, -inf  ;;  %v2125_v63 = vadd.f32 %v2119_v26, %v4430_v32 }
 0xa62   : > { %2131 = vmax.xlane.f32.xlu0 %v2130_v28 }
 0xa63   : > { %v4664_v10 = vpop.f32.mrb[32].mxu1  ;;  %v2133_v30 = vsel %vm1104_vm5, %v2125_v63, -inf }
 0xa64   : > { %v4667_v23 = vpop.f32.mrb[33].mxu1  ;;  %2134 = vmax.xlane.f32.xlu1 %v2133_v30 }
 0xa65   : > { %v3828_v31 = vpack.i.bf16 %v4667_v23, %v4652_v5  ;;  %v3683_v39 = vpop.f32.mrb[34].mxu1 }
 0xa66   : > { %v4672_v45 = vpop.f32.mrb[35].mxu1  ;;  %2137 = vmax.xlane.f32.xlu0 %v2136_v44 }
 0xa67   : > { %v3843_v38 = vpack.i.bf16 %v4664_v10, %v4672_v45 }
 0xa73   : > { %v3698_v37 = vpop.f32.mrb[36].mxu1 }
 0xa74   : > { %v2123_v42 = vmul.f32 0.25, %v3698_v37  ;;  %v2104_v46 = vpop.f32.mrb[37].mxu1 }
 0xa75   : > { %v2121_v47 = vmul.f32 0.25, %v2104_v46  ;;  %v3699_v48 = vpop.f32.mrb[38].mxu1 }
 0xa76   : > { %v2107_v49 = vpop.f32.mrb[39].mxu1  ;;  %v2129_v51 = vadd.f32 %v2123_v42, %v4430_v32 }
 0xa77   : > { %v2122_v54 = vmul.f32 0.25, %v2107_v49  ;;  %v2127_v56 = vadd.f32 %v2121_v47, %v4430_v32 }
 0xa78   : > { %v2145_v61 = vsel %vm1104_vm5, %v2129_v51, -inf }
 0xa79   : > { %2146 = vmax.xlane.f32.xlu1 %v2145_v61  ;;  %v2139_v62 = vsel %vm1104_vm5, %v2127_v56, -inf  ;;  %v2128_v0 = vadd.f32 %v2122_v54, %v4430_v32 }
 0xa7a   : > { %2140 = vmax.xlane.f32.xlu0 %v2139_v62 }
 0xa7b   : > { %v2142_v3 = vsel %vm1104_vm5, %v2128_v0, -inf }
 0xa7e   : > { %2143 = vmax.xlane.f32.xlu0 %v2142_v3 }
 0xaef   : > { %v2132_v4 = vpop.xlane.xlu0 %2131 }
 0xaf0   : > { %v2148_v2 = vsub.f32 %v2124_v27, %v2132_v4 }
 0xaf1   : > { %v2135_v6 = vpop.xlane.xlu1 %2134 }
 0xaf2   : > { %v2149_v8 = vsub.f32 %v2125_v63, %v2135_v6  ;;  %v2154_v21 = vmul.f32 1.442695, %v2148_v2 }
 0xaf3   : > { %v2138_v57 = vpop.xlane.xlu0 %2137 }
 0xaf4   : > { %v2156_v11 = vmul.f32 1.442695, %v2149_v8  ;;  %v2150_v17 = vsub.f32 %v2126_v29, %v2138_v57 }
 0xaf6   : > { %3981 = vpow2.f32 %v2156_v11  ;;  %v2158_v15 = vmul.f32 1.442695, %v2150_v17 }
 0xaf8   : > { %3983 = vpow2.f32 %v2158_v15 }
 0xaf9   : > { %3985 = vpow2.f32 %v2154_v21 }
 0xb00   : > { %v3982_v24 = vpop.eup %3981 }
 0xb01   : > { %v2169_v26 = vsel %vm1104_vm5, %v3982_v24, 0.0 }
 0xb02   : > { %v3984_v32 = vpop.eup %3983  ;;  %2170 = vadd.xlane.f32.xlu1 %v2169_v26 }
 0xb03   : > { %v2172_v28 = vsel %vm1104_vm5, %v3984_v32, 0.0  ;;  %v3986_v30 = vpop.eup %3985 }
 0xb04   : > { %2173 = vadd.xlane.f32.xlu0 %v2172_v28  ;;  %v2166_v44 = vsel %vm1104_vm5, %v3986_v30, 0.0 }
 0xb06   : > { %v2147_v39 = vpop.xlane.xlu1 %2146 }
 0xb07   : > { %v2153_v27 = vsub.f32 %v2129_v51, %v2147_v39  ;;  %v2141_v63 = vpop.xlane.xlu0 %2140  ;;  %v4124_v39 = vmov 0.0  }
 0xb08   : > { %v2151_v29 = vsub.f32 %v2127_v56, %v2141_v63  ;;  %2167 = vadd.xlane.f32.xlu0 %v2166_v44  ;;  %v3867_v63 = vld [vmem:[%s4256_s28 + $0x10] sm:$0xff]   ;;  %v3868_v44 = vld [vmem:[%s4256_s28 + $0x18] sm:$0xff]  }
 0xb09   : > { %v2164_v37 = vmul.f32 1.442695, %v2153_v27  ;;  %v3866_v27 = vld [vmem:[%s4256_s28 + $0x8] sm:$0xff]  }
 0xb0a   : > { %v2160_v42 = vmul.f32 1.442695, %v2151_v29 }
 0xb0b   : > { %3987 = vpow2.f32 %v2164_v37  ;;  %v2144_v46 = vpop.xlane.xlu0 %2143 }
 0xb0c   : > { %v2152_v47 = vsub.f32 %v2128_v0, %v2144_v46  ;;  %3989 = vpow2.f32 %v2160_v42 }
 0xb0e   : > { %v2162_v48 = vmul.f32 1.442695, %v2152_v47 }
 0xb10   : > { %3991 = vpow2.f32 %v2162_v48 }
 0xb15   : > { %v3988_v49 = vpop.eup %3987 }
 0xb16   : > { %v2181_v54 = vsel %vm1104_vm5, %v3988_v49, 0.0  ;;  %v3990_v61 = vpop.eup %3989 }
 0xb17   : > { %2182 = vadd.xlane.f32.xlu1 %v2181_v54  ;;  %v2175_v51 = vsel %vm1104_vm5, %v3990_v61, 0.0 }
 0xb1a   : > { %v3992_v62 = vpop.eup %3991 }
 0xb1b   : > { %2176 = vadd.xlane.f32.xlu1 %v2175_v51  ;;  %v2178_v56 = vsel %vm1104_vm5, %v3992_v62, 0.0 }
 0xb1c   : > { %2179 = vadd.xlane.f32.xlu0 %v2178_v56 }
 0xb2c   : > { %2202 = vrot.lane.b32.xlu1 %v4390_v1, %s4123_s30 }
 0xb30   : > { %2262 = vrot.lane.b32.xlu1 %v4401_v13, %s4123_s30 }
 0xb32   : > { %2200 = vrot.lane.b32.xlu0 %v4383_v60, %s4123_s30 }
 0xb34   : > { %2264 = vrot.lane.b32.xlu1 %v4420_v25, %s4123_s30 }
 0xb36   : > { %3809 = vrot.lane.b32.xlu0 %v3808_v36, %s4122_s19 }
 0xb38   : > { %3814 = vrot.lane.b32.xlu1 %v3813_v12, %s4120_s29 }
 0xb3c   : > { %3824 = vrot.lane.b32.xlu1 %v3823_v53, %s4122_s19 }
 0xb8f   : > { %v2171_v1 = vpop.xlane.xlu1 %2170 }
 0xb90   : > { %3993 = vrcp.f32 %v2171_v1 }
 0xb91   : > { %v2174_v60 = vpop.xlane.xlu0 %2173 }
 0xb95   : > { %v2168_v13 = vpop.xlane.xlu0 %2167 }
 0xb96   : > { %3995 = vrcp.f32 %v2168_v13 }
 0xb97   : > { %3997 = vrcp.f32 %v2174_v60 }
 0xb9a   : > { %v3994_v25 = vpop.eup %3993 }
 0xb9b   : > { %v2191_v34 = vmul.f32 %v3994_v25, %v3982_v24 }
 0xba0   : > { %v3996_v0 = vpop.eup %3995 }
 0xba1   : > { %v2190_v3 = vmul.f32 %v3996_v0, %v3986_v30  ;;  %v3998_v52 = vpop.eup %3997  ;;  %v3865_v30 = vld [vmem:[%s4256_s28] sm:$0xff]  }
 0xba2   : > { %v2192_v12 = vmul.f32 %v3998_v52, %v3984_v32 }
 0xba3   : > { %v2196_v35 = vpack.c.bf16 %v2191_v34, %v2190_v3 }
 0xba4   : > { %v2183_v36 = vpop.xlane.xlu1 %2182  ;;  %v2197_v21 = vpack.c.bf16 %v2192_v12, %v2192_v12 }
 0xba5   : > { %3704 = vmatprep.mubr.msk.bf16.mxu0 %vm1104_vm5, %v2196_v35  ;;  %3999 = vrcp.f32 %v2183_v36 }
 0xba8   : > { %v2177_v7 = vpop.xlane.xlu1 %2176 }
 0xba9   : > { %4001 = vrcp.f32 %v2177_v7  ;;  %v2180_v9 = vpop.xlane.xlu0 %2179 }
 0xbaa   : > { %4003 = vrcp.f32 %v2180_v9 }
 0xbac   : > { %v2203_v33 = vpop.permute.xlu1 %2202 }
 0xbad   : > { %v2201_v53 = vpop.permute.xlu0 %2200  ;;  %v2212_v2 = vsel %vm1185_vm3, %v2203_v33, 0 }
 0xbae   : > { %3700 = vmatprep.subr.bf16.mxu0 %v2201_v53 }
 0xbaf   : > { %3701 = vmatpush3.bf16.msra.mxu0 %v2201_v53  ;;  %v4000_v6 = vpop.eup %3999 }
 0xbb0   : > { %v2263_v4 = vpop.permute.xlu1 %2262  ;;  %3778 = vmatprep.subr.msk.bf16.mxu0 %vm1185_vm3, %v2203_v33  ;;  %v2195_v11 = vmul.f32 %v4000_v6, %v3988_v49 }
 0xbb1   : > { %3708 = vmatprep.subr.bf16.mxu1 %v2263_v4  ;;  %v3810_v1 = vpop.permute.xlu0 %3809 }
 0xbb2   : > { %3709 = vmatpush3.bf16.msra.mxu1 %v2263_v4  ;;  %v2199_v28 = vpack.c.bf16 %v2195_v11, %v2195_v11  ;;  %v3812_v60 = vunpack.i.h.bf16 %v3810_v1  ;;  %v3811_v13 = vunpack.i.l.bf16 %v3810_v1 }
 0xbb3   : > { %v4002_v8 = vpop.eup %4001  ;;  %3703 = vmatpush3.bf16.msra.mxu0 %v2212_v2 }
 0xbb4   : > { %v4004_v57 = vpop.eup %4003  ;;  %v2265_v17 = vpop.permute.xlu1 %2264  ;;  %v2193_v15 = vmul.f32 %v4002_v8, %v3990_v61  ;;  %3716 = vmatprep.subr.bf16.mxu0 %v4124_v39  ;;  %v2397_v10 = vsel %vm965_vm2, %v4486_v18, %v3812_v60 }
 0xbb5   : > { %v2274_v24 = vsel %vm1185_vm3, %v2265_v17, 0  ;;  %3779 = vmatprep.subr.msk.bf16.mxu1 %vm1185_vm3, %v2265_v17  ;;  %v2194_v26 = vmul.f32 %v4004_v57, %v3992_v62 }
 0xbb6   : > { %3705 = vmatmul.mubr.msk.bf16.vlgmr.msra.gmra.mrb[28].mxu0 %vm1104_vm5, %v2197_v21  ;;  %3711 = vmatpush3.bf16.msra.mxu1 %v2274_v24 }
 0xbb7   : > { %v2198_v32 = vpack.c.bf16 %v2194_v26, %v2193_v15  ;;  %3717 = vmatpush3.bf16.msra.mxu0 %v3865_v30  ;;  %3724 = vmatprep.mubr.msk.bf16.mxu0 %vm4125_vm6, %v4124_v39 }
 0xbb8   : > { %3718 = vmatprep.subr.bf16.mxu0 %v4124_v39  ;;  %v3815_v56 = vpop.permute.xlu1 %3814 }
 0xbb9   : > { %3712 = vmatprep.mubr.msk.bf16.mxu1 %vm1104_vm5, %v2198_v32  ;;  %v3817_v25 = vunpack.i.h.bf16 %v3815_v56  ;;  %v3816_v0 = vunpack.i.l.bf16 %v3815_v56 }
 0xbba   : > { %3713 = vmatmul.mubr.msk.bf16.vlgmr.msra.gmra.mrb[40].mxu1 %vm1104_vm5, %v2199_v28 }
 0xbbb   : > { %2738 = vmatprep.mubr.bf16.mxu1 %v4115_v55  ;;  %3719 = vmatpush3.bf16.msra.mxu0 %v3866_v27  ;;  %v2404_v45 = vsel %vm2402_vm7, %v2397_v10, %v3817_v25 }
 0xbbc   : > { %3720 = vmatprep.subr.bf16.mxu0 %v4124_v39  ;;  %v3825_v5 = vpop.permute.xlu1 %3824 }
 0xbbd   : > { %v3826_v3 = vunpack.i.l.bf16 %v3825_v5 }
 0xbbf   : > { %3721 = vmatpush3.bf16.msra.mxu0 %v3867_v63  ;;  %v2398_v52 = vsel %vm965_vm2, %v4482_v14, %v3826_v3 }
 0xbc0   : > { %3722 = vmatprep.subr.bf16.mxu0 %v4124_v39 }
 0xbc3   : > { %3723 = vmatpush3.bf16.msra.mxu0 %v3868_v44 }
 0xc89   : > { %v3706_v29 = vpop.f32.mrb[28].mxu0 }
 0xc8a   : > { %v2248_v37 = vpop.f32.mrb[29].mxu0 }
 0xc8b   : > { %v3707_v42 = vpop.f32.mrb[30].mxu0 }
 0xc8c   : > { %v2251_v46 = vpop.f32.mrb[31].mxu0 }
 0xc8d   : > { %v3818_v47 = vpack.i.bf16 %v2251_v46, %v2248_v37  ;;  %v3714_v48 = vpop.f32.mrb[40].mxu1 }
 0xc8e   : > { %v2310_v49 = vpop.f32.mrb[41].mxu1 }
 0xc8f   : > { %v3833_v54 = vpack.i.bf16 %v2310_v49, %v3706_v29  ;;  %v3715_v61 = vpop.f32.mrb[42].mxu1  ;;  %3819 = vrot.lane.b32.xlu0 %v3818_v47, %s4118_s21 }
 0xc90   : > { %v2313_v62 = vpop.f32.mrb[43].mxu1 }
 0xc91   : > { %v3848_v51 = vpack.i.bf16 %v3714_v48, %v2313_v62  ;;  %3834 = vrot.lane.b32.xlu1 %v3833_v54, %s4118_s21  ;;  %v4065_v48 = vld [vmem:[#allocation2] sm:$0xff]  ;;  %v4066_v62 = vld [vmem:[#allocation2 + $0x8] sm:$0xff] }
 0xc93   : > { %3829 = vrot.lane.b32.xlu0 %v3828_v31, %s4120_s29  ;;  %v2396_v31 = vsel %vm965_vm2, %v4484_v16, %v3811_v13 }
 0xc95   : > { %3844 = vrot.lane.b32.xlu1 %v3843_v38, %s4120_s29  ;;  %v3827_v38 = vunpack.i.h.bf16 %v3825_v5 }
 0xc97   : > { %3839 = vrot.lane.b32.xlu0 %v3838_v59, %s4122_s19  ;;  %v2403_v59 = vsel %vm2402_vm7, %v2396_v31, %v3816_v0  ;;  %v2399_v16 = vsel %vm965_vm2, %v4490_v20, %v3827_v38  ;;  %v4067_v0 = vld [vmem:[#allocation2 + $0x10] sm:$0xff]  ;;  %v4068_v31 = vld [vmem:[#allocation2 + $0x18] sm:$0xff] }
 0xc9b   : > { %3849 = vrot.lane.b32.xlu0 %v3848_v51, %s4118_s21 }
 0xd01   : > { %v3820_v23 = vpop.permute.xlu0 %3819 }
 0xd02   : > { %v3822_v50 = vunpack.i.h.bf16 %v3820_v23  ;;  %v3821_v58 = vunpack.i.l.bf16 %v3820_v23 }
 0xd03   : > { %v3835_v36 = vpop.permute.xlu1 %3834 }
 0xd04   : > { %v2410_v34 = vsel %vm2409_vm8, %v2403_v59, %v3821_v58  ;;  %v2411_v35 = vsel %vm2409_vm8, %v2404_v45, %v3822_v50  ;;  %v3837_v53 = vunpack.i.h.bf16 %v3835_v36  ;;  %v3836_v12 = vunpack.i.l.bf16 %v3835_v36 }
 0xd05   : > { %v2416_v7 = vpack.c.bf16 %v2411_v35, %v2410_v34  ;;  %v3830_v9 = vpop.permute.xlu0 %3829  ;;  %v4069_v35 = vld [vmem:[#allocation2 + $0x20] sm:$0xff] }
 0xd06   : > { %v3832_v33 = vunpack.i.h.bf16 %v3830_v9  ;;  %v3831_v18 = vunpack.i.l.bf16 %v3830_v9 }
 0xd07   : > { %3725 = vmatmul.mubr.msk.bf16.vlgmr.msra.gmra.mrb[32].mxu0 %vm712_vm1, %v2416_v7  ;;  %v3845_v20 = vpop.permute.xlu1 %3844 }
 0xd08   : > { %v2406_v4 = vsel %vm2402_vm7, %v2399_v16, %v3832_v33  ;;  %v2405_v6 = vsel %vm2402_vm7, %v2398_v52, %v3831_v18  ;;  %3728 = vmatprep.mubr.msk.bf16.mxu0 %vm4125_vm6, %v4124_v39  ;;  %v3847_v24 = vunpack.i.h.bf16 %v3845_v20  ;;  %v3846_v26 = vunpack.i.l.bf16 %v3845_v20  ;;  %v4070_v33 = vld [vmem:[#allocation2 + $0x28] sm:$0xff] }
 0xd09   : > { %v3840_v2 = vpop.permute.xlu0 %3839  ;;  %v2412_v8 = vsel %vm2409_vm8, %v2405_v6, %v3836_v12  ;;  %v2413_v57 = vsel %vm2409_vm8, %v2406_v4, %v3837_v53 }
 0xd0a   : > { %v3842_v11 = vunpack.i.h.bf16 %v3840_v2  ;;  %v3841_v17 = vunpack.i.l.bf16 %v3840_v2  ;;  %v2417_v14 = vpack.c.bf16 %v2413_v57, %v2412_v8 }
 0xd0c   : > { %v2401_v21 = vsel %vm965_vm2, %v4488_v19, %v3842_v11  ;;  %v2400_v15 = vsel %vm965_vm2, %v4492_v22, %v3841_v17  ;;  %v3412_v22 = vld [vmem:[%s5035_s24] ss:$0 sm:$0xff]  ;;  %s5038_s24 = sld [smem:[#allocation11_spill]] (!%p3462_p5) }
 0xd0d   : > { %v3850_v32 = vpop.permute.xlu0 %3849  ;;  %v2407_v27 = vsel %vm2402_vm7, %v2400_v15, %v3846_v26  ;;  %v2408_v63 = vsel %vm2402_vm7, %v2401_v21, %v3847_v24 }
 0xd0e   : > { %v3852_v28 = vunpack.i.h.bf16 %v3850_v32  ;;  %v3851_v30 = vunpack.i.l.bf16 %v3850_v32 }
 0xd0f   : > { %3729 = vmatmul.mubr.msk.bf16.gmra.mrb[36].mxu0 %vm712_vm1, %v2417_v14 }
 0xd10   : > { %v2414_v44 = vsel %vm2409_vm8, %v2407_v27, %v3851_v30  ;;  %v2415_v29 = vsel %vm2409_vm8, %v2408_v63, %v3852_v28  ;;  %3732 = vmatprep.mubr.msk.bf16.mxu0 %vm4125_vm6, %v4124_v39 }
 0xd11   : > { %v2418_v19 = vpack.c.bf16 %v2415_v29, %v2414_v44 }
 0xd17   : > { %3733 = vmatmul.mubr.msk.bf16.gmra.mrb[40].mxu0 %vm712_vm1, %v2418_v19 }
 0xdda   : > { %v2501_v37 = vpop.f32.mrb[32].mxu0 }
 0xddb   : > { %v2502_v42 = vadd.f32 %v3412_v22, %v2501_v37  ;;  %v3726_v46 = vpop.f32.mrb[33].mxu0 }
 0xddc   : > { %v2504_v47 = vpop.f32.mrb[34].mxu0 }
 0xddd   : > { %v4778_v49 = vadd.f32 %v4065_v48, %v2502_v42  ;;  %v2505_v54 = vadd.f32 %v3412_v22, %v2504_v47  ;;  %v3727_v61 = vpop.f32.mrb[35].mxu0 }
 0xdde   : > { %v3871_v61 = vld [vmem:[%s4269_s25 + $0x4] ss:$8 sps:$4 sm:$0xff]  }
 0xddf   : > { %v4780_v51 = vadd.f32 %v4066_v62, %v2505_v54  ;;  %v2532_v39 = vsel %vm712_vm1, %v4778_v49, 0.0  ;;  %v3869_v62 = vld [vmem:[%s4269_s25] ss:$8 sps:$4 sm:$0xff]   ;;  %2706 = vmatprep.subr.bf16.mxu1 %v3871_v61 }
 0xde0   : > { %2533 = vadd.xlane.f32.xlu1 %v2532_v39  ;;  %2707 = vmatpush1.bf16.msra.mxu1 %v3869_v62  ;;  %v3874_v39 = vld [vmem:[%s4269_s25 + $0x14] ss:$8 sps:$4 sm:$0xff]  }
 0xde1   : > { %v2535_v56 = vsel %vm712_vm1, %v4780_v51, 0.0  ;;  %2708 = vmatprep.subr.bf16.mxu1 %v3874_v39  ;;  %v3881_v39 = vld [vmem:[%s4280_s15 + $0x40] sm:$0xff]  }
 0xde2   : > { %2536 = vadd.xlane.f32.xlu0 %v2535_v56  ;;  %v2509_v1 = vpop.f32.mrb[36].mxu0  ;;  %v3872_v56 = vld [vmem:[%s4269_s25 + $0x10] ss:$8 sps:$4 sm:$0xff]   ;;  %3549 = vmatprep.subr.bf16.mxu0 %v3881_v39 }
 0xde3   : > { %v2510_v60 = vadd.f32 %v3412_v22, %v2509_v1  ;;  %v3730_v13 = vpop.f32.mrb[37].mxu0  ;;  %v3877_v1 = vld [vmem:[%s4269_s25 + $0x24] ss:$8 sps:$4 sm:$0xff]  }
 0xde4   : > { %v2512_v25 = vpop.f32.mrb[38].mxu0  ;;  %2709 = vmatpush1.bf16.msra.mxu1 %v3872_v56  ;;  %v3880_v13 = vld [vmem:[%s4269_s25 + $0x34] ss:$8 sps:$4 sm:$0xff]   ;;  %v3882_v56 = vld [vmem:[%s4280_s15] sm:$0xff]  }
 0xde5   : > { %v4786_v5 = vadd.f32 %v4067_v0, %v2510_v60  ;;  %v2513_v23 = vadd.f32 %v3412_v22, %v2512_v25  ;;  %v3731_v10 = vpop.f32.mrb[39].mxu0  ;;  %v3875_v60 = vld [vmem:[%s4269_s25 + $0x20] ss:$8 sps:$4 sm:$0xff]   ;;  %2710 = vmatprep.subr.bf16.mxu1 %v3877_v1  ;;  %v3878_v25 = vld [vmem:[%s4269_s25 + $0x30] ss:$8 sps:$4 sm:$0xff]   ;;  %3550 = vmatpush3.bf16.msra.mxu0 %v3882_v56 }
 0xde6   : > { %v3884_v1 = vld [vmem:[%s4280_s15 + $0x8] sm:$0xff]  }
 0xde7   : > { %v4788_v50 = vadd.f32 %v4068_v31, %v2513_v23  ;;  %v2538_v58 = vsel %vm712_vm1, %v4786_v5, 0.0 }
 0xde8   : > { %2539 = vadd.xlane.f32.xlu0 %v2538_v58  ;;  %2711 = vmatpush1.bf16.msra.mxu1 %v3875_v60  ;;  %v3886_v60 = vld [vmem:[%s4280_s15 + $0x10] sm:$0xff]  }
 0xde9   : > { %v2541_v3 = vsel %vm712_vm1, %v4788_v50, 0.0  ;;  %2712 = vmatprep.subr.bf16.mxu1 %v3880_v13  ;;  %v3887_v13 = vld [vmem:[%s4280_s15 + $0x58] sm:$0xff]  }
 0xdea   : > { %v2517_v59 = vpop.f32.mrb[40].mxu0 }
 0xdeb   : > { %v2518_v45 = vadd.f32 %v3412_v22, %v2517_v59  ;;  %v3734_v38 = vpop.f32.mrb[41].mxu0 }
 0xdec   : > { %2542 = vadd.xlane.f32.xlu0 %v2541_v3  ;;  %v2520_v34 = vpop.f32.mrb[42].mxu0  ;;  %2713 = vmatpush1.bf16.msra.mxu1 %v3878_v25  ;;  %v3888_v25 = vld [vmem:[%s4280_s15 + $0x18] sm:$0xff]  }
 0xded   : > { %v4794_v36 = vadd.f32 %v4069_v35, %v2518_v45  ;;  %v2521_v7 = vadd.f32 %v3412_v22, %v2520_v34  ;;  %v3735_v9 = vpop.f32.mrb[43].mxu0 }
 0xdee   : > { %v3420_v9 = vld [vmem:[%s5036_s16] ss:$0 sm:$0xff]  ;;  %s5039_s16 = sld [smem:[#allocation12_spill]] (!%p3462_p5) }
 0xdef   : > { %v4796_v18 = vadd.f32 %v4070_v33, %v2521_v7  ;;  %v2544_v16 = vsel %vm712_vm1, %v4794_v36, 0.0 }
 0xdf0   : > { %2545 = vadd.xlane.f32.xlu1 %v2544_v16 }
 0xdf1   : > { %v2547_v52 = vsel %vm712_vm1, %v4796_v18, 0.0 }
 0xdf2   : > { %2548 = vadd.xlane.f32.xlu0 %v2547_v52 }
 0xe6d   : > { %v2534_v53 = vpop.xlane.xlu1 %2533 }
 0xe6e   : > { %v2550_v12 = vmul.f32 0.015625, %v2534_v53 }
 0xe6f   : > { %v2537_v4 = vpop.xlane.xlu0 %2536 }
 0xe70   : > { %v4803_v6 = vsub.f32 %v4778_v49, %v2550_v12  ;;  %v2551_v2 = vmul.f32 0.015625, %v2537_v4 }
 0xe72   : > { %v4806_v8 = vsub.f32 %v4780_v51, %v2551_v2  ;;  %v2562_v57 = vmul.f32 %v4803_v6, %v4803_v6 }
 0xe74   : > { %v2568_v20 = vsel %vm712_vm1, %v2562_v57, 0.0  ;;  %v2563_v11 = vmul.f32 %v4806_v8, %v4806_v8 }
 0xe75   : > { %v2540_v17 = vpop.xlane.xlu0 %2539  ;;  %2569 = vadd.xlane.f32.xlu1 %v2568_v20 }
 0xe76   : > { %v2552_v14 = vmul.f32 0.015625, %v2540_v17  ;;  %v2571_v21 = vsel %vm712_vm1, %v2563_v11, 0.0  ;;  %v3421_v17 = vld [vmem:[%s668_s20] ss:$0 sm:$0xff] }
 0xe77   : > { %2572 = vadd.xlane.f32.xlu0 %v2571_v21 }
 0xe78   : > { %v4815_v15 = vsub.f32 %v4786_v5, %v2552_v14 }
 0xe79   : > { %v2543_v24 = vpop.xlane.xlu0 %2542 }
 0xe7a   : > { %v2553_v26 = vmul.f32 0.015625, %v2543_v24  ;;  %v2564_v32 = vmul.f32 %v4815_v15, %v4815_v15 }
 0xe7c   : > { %v4820_v28 = vsub.f32 %v4788_v50, %v2553_v26  ;;  %v2574_v30 = vsel %vm712_vm1, %v2564_v32, 0.0 }
 0xe7d   : > { %2575 = vadd.xlane.f32.xlu1 %v2574_v30  ;;  %v2546_v27 = vpop.xlane.xlu1 %2545 }
 0xe7e   : > { %v2554_v63 = vmul.f32 0.015625, %v2546_v27  ;;  %v2565_v44 = vmul.f32 %v4820_v28, %v4820_v28 }
 0xe7f   : > { %v2549_v29 = vpop.xlane.xlu0 %2548 }
 0xe80   : > { %v4826_v19 = vsub.f32 %v4794_v36, %v2554_v63  ;;  %v2555_v22 = vmul.f32 0.015625, %v2549_v29  ;;  %v2577_v37 = vsel %vm712_vm1, %v2565_v44, 0.0 }
 0xe81   : > { %2578 = vadd.xlane.f32.xlu0 %v2577_v37 }
 0xe82   : > { %v4830_v42 = vsub.f32 %v4796_v18, %v2555_v22  ;;  %v2566_v46 = vmul.f32 %v4826_v19, %v4826_v19 }
 0xe84   : > { %v2580_v47 = vsel %vm712_vm1, %v2566_v46, 0.0  ;;  %v2567_v48 = vmul.f32 %v4830_v42, %v4830_v42 }
 0xe85   : > { %2581 = vadd.xlane.f32.xlu1 %v2580_v47 }
 0xe86   : > { %v2583_v54 = vsel %vm712_vm1, %v2567_v48, 0.0 }
 0xe87   : > { %2584 = vadd.xlane.f32.xlu0 %v2583_v54 }
 0xf02   : > { %v2570_v0 = vpop.xlane.xlu1 %2569 }
 0xf03   : > { %v2586_v23 = vmul.f32 0.015625, %v2570_v0  ;;  %v3889_v0 = vld [vmem:[%s4280_s15 + $0x60] sm:$0xff]  }
 0xf04   : > { %v2573_v10 = vpop.xlane.xlu0 %2572 }
 0xf05   : > { %v2592_v31 = vadd.f32 1e-05, %v2586_v23  ;;  %v2587_v58 = vmul.f32 0.015625, %v2573_v10  ;;  %v3890_v23 = vld [vmem:[%s4280_s15 + $0x20] sm:$0xff]   ;;  %v3891_v10 = vld [vmem:[%s4280_s15 + $0x68] sm:$0xff]  }
 0xf07   : > { %4005 = vrsqrt.f32 %v2592_v31  ;;  %v2593_v59 = vadd.f32 1e-05, %v2587_v58  ;;  %v3892_v31 = vld [vmem:[%s4280_s15 + $0x28] sm:$0xff]   ;;  %v3893_v58 = vld [vmem:[%s4280_s15 + $0x70] sm:$0xff]  }
 0xf09   : > { %4007 = vrsqrt.f32 %v2593_v59  ;;  %v3894_v59 = vld [vmem:[%s4280_s15 + $0x30] sm:$0xff]  }
 0xf0a   : > { %v2576_v45 = vpop.xlane.xlu1 %2575 }
 0xf0b   : > { %v2588_v38 = vmul.f32 0.015625, %v2576_v45  ;;  %v3895_v45 = vld [vmem:[%s4280_s15 + $0x78] sm:$0xff]  }
 0xf0d   : > { %v2594_v3 = vadd.f32 1e-05, %v2588_v38  ;;  %v3896_v38 = vld [vmem:[%s4280_s15 + $0x38] sm:$0xff]  }
 0xf0e   : > { %v2579_v34 = vpop.xlane.xlu0 %2578 }
 0xf0f   : > { %4009 = vrsqrt.f32 %v2594_v3  ;;  %v2589_v35 = vmul.f32 0.015625, %v2579_v34  ;;  %v2645_v3 = vld [vmem:[%s4274_s26] sm:$0x3] }
 0xf10   : > { %v2650_v34 = vrot.slane %v2645_v3, %v831_v40 }
 0xf11   : > { %v4006_v7 = vpop.eup %4005  ;;  %v2595_v33 = vadd.f32 1e-05, %v2589_v35  ;;  %v2654_v35 = vrot.slane %v2645_v3, %v835_v41 }
 0xf12   : > { %v2604_v16 = vmul.f32 %v4006_v7, %v4803_v6  ;;  %v2582_v52 = vpop.xlane.xlu1 %2581 }
 0xf13   : > { %v4008_v53 = vpop.eup %4007  ;;  %4011 = vrsqrt.f32 %v2595_v33  ;;  %v2590_v12 = vmul.f32 0.015625, %v2582_v52 }
 0xf14   : > { %v2616_v4 = vmul.f32 %v3420_v9, %v2604_v16  ;;  %v2605_v2 = vmul.f32 %v4008_v53, %v4806_v8  ;;  %v2585_v57 = vpop.xlane.xlu0 %2584 }
 0xf15   : > { %v2596_v20 = vadd.f32 1e-05, %v2590_v12  ;;  %v2591_v11 = vmul.f32 0.015625, %v2585_v57 }
 0xf16   : > { %v2617_v14 = vmul.f32 %v3420_v9, %v2605_v2  ;;  %v2628_v24 = vadd.f32 %v3421_v17, %v2616_v4 }
 0xf17   : > { %4013 = vrsqrt.f32 %v2596_v20  ;;  %v2597_v21 = vadd.f32 1e-05, %v2591_v11 }
 0xf18   : > { %v2629_v6 = vadd.f32 %v3421_v17, %v2617_v14 }
 0xf19   : > { %v4010_v26 = vpop.eup %4009  ;;  %4015 = vrsqrt.f32 %v2597_v21 }
 0xf1a   : > { %v2606_v32 = vmul.f32 %v4010_v26, %v4815_v15  ;;  %v2634_v30 = vpack.c.bf16 %v2629_v6, %v2628_v24 }
 0xf1c   : > { %3430 = vmatmul.mubr.msk.bf16.vlgmr.msra.gmra.mrb[44].mxu1 %vm712_vm1, %v2634_v30  ;;  %v2618_v63 = vmul.f32 %v3420_v9, %v2606_v32 }
 0xf1d   : > { %v4012_v8 = vpop.eup %4011  ;;  %2748 = vmatprep.mubr.bf16.mxu1 %v4115_v55 }
 0xf1e   : > { %v2607_v27 = vmul.f32 %v4012_v8, %v4820_v28  ;;  %v2630_v37 = vadd.f32 %v3421_v17, %v2618_v63 }
 0xf20   : > { %v2619_v44 = vmul.f32 %v3420_v9, %v2607_v27 }
 0xf21   : > { %v4014_v29 = vpop.eup %4013 }
 0xf22   : > { %v2608_v22 = vmul.f32 %v4014_v29, %v4826_v19  ;;  %v2631_v46 = vadd.f32 %v3421_v17, %v2619_v44 }
 0xf23   : > { %v4016_v47 = vpop.eup %4015 }
 0xf24   : > { %v2609_v15 = vmul.f32 %v4016_v47, %v4830_v42  ;;  %v2635_v48 = vpack.c.bf16 %v2631_v46, %v2630_v37  ;;  %v2620_v54 = vmul.f32 %v3420_v9, %v2608_v22  ;;  %v3883_v42 = vld [vmem:[%s4280_s15 + $0x48] sm:$0xff]  }
 0xf25   : > { %3551 = vmatprep.subr.bf16.mxu0 %v3883_v42 }
 0xf26   : > { %3431 = vmatmul.mubr.msk.bf16.gmra.mrb[48].mxu1 %vm712_vm1, %v2635_v48  ;;  %v2621_v28 = vmul.f32 %v3420_v9, %v2609_v15  ;;  %v2632_v62 = vadd.f32 %v3421_v17, %v2620_v54  ;;  %3552 = vmatpush3.bf16.msra.mxu0 %v3884_v1 }
 0xf27   : > { %2758 = vmatprep.mubr.bf16.mxu1 %v4115_v55  ;;  %v3885_v55 = vld [vmem:[%s4280_s15 + $0x50] sm:$0xff]  }
 0xf28   : > { %v2633_v61 = vadd.f32 %v3421_v17, %v2621_v28  ;;  %3553 = vmatprep.subr.bf16.mxu0 %v3885_v55 }
 0xf2a   : > { %v2636_v19 = vpack.c.bf16 %v2633_v61, %v2632_v62  ;;  %3554 = vmatpush3.bf16.msra.mxu0 %v3886_v60 }
 0xf2b   : > { %3555 = vmatprep.subr.bf16.mxu0 %v3887_v13 }
 0xf2e   : > { %3432 = vmatmul.mubr.msk.bf16.gmra.mrb[52].mxu1 %vm712_vm1, %v2636_v19  ;;  %3556 = vmatpush3.bf16.msra.mxu0 %v3888_v25 }
 0xf2f   : > { %3557 = vmatprep.subr.bf16.mxu0 %v3889_v0 }
 0xf32   : > { %3558 = vmatpush3.bf16.msra.mxu0 %v3890_v23 }
 0xf33   : > { %3559 = vmatprep.subr.bf16.mxu0 %v3891_v10 }
 0xf36   : > { %3560 = vmatpush3.bf16.msra.mxu0 %v3892_v31 }
 0xf37   : > { %3561 = vmatprep.subr.bf16.mxu0 %v3893_v58 }
 0xf3a   : > { %3562 = vmatpush3.bf16.msra.mxu0 %v3894_v59 }
 0xf3b   : > { %3563 = vmatprep.subr.bf16.mxu0 %v3895_v45 }
 0xf3e   : > { %3564 = vmatpush3.bf16.msra.mxu0 %v3896_v38 }
 0xfef   : > { %v2740_v7 = vpop.f32.mrb[44].mxu1 }
 0xff0   : > { %v4888_v9 = vadd.f32 %v2740_v7, %v2650_v34  ;;  %v2742_v33 = vpop.f32.mrb[45].mxu1 }
 0xff1   : > { %v4890_v16 = vadd.f32 %v2742_v33, %v2654_v35  ;;  %v2744_v52 = vpop.f32.mrb[46].mxu1 }
 0xff2   : > { %v3433_v53 = vmul.f32 -1.702, %v4888_v9  ;;  %v4893_v12 = vadd.f32 %v2744_v52, %v2650_v34  ;;  %v2746_v4 = vpop.f32.mrb[47].mxu1 }
 0xff3   : > { %v3434_v2 = vmul.f32 -1.702, %v4890_v16  ;;  %v4896_v57 = vadd.f32 %v2746_v4, %v2654_v35 }
 0xff4   : > { %v2793_v40 = vmul.f32 1.442695, %v3433_v53  ;;  %v3435_v43 = vmul.f32 -1.702, %v4893_v12 }
 0xff5   : > { %v2795_v41 = vmul.f32 1.442695, %v3434_v2  ;;  %v3436_v20 = vmul.f32 -1.702, %v4896_v57 }
 0xff6   : > { %4017 = vpow2.f32 %v2793_v40  ;;  %v2797_v11 = vmul.f32 1.442695, %v3435_v43 }
 0xff7   : > { %4019 = vpow2.f32 %v2795_v41  ;;  %v2799_v17 = vmul.f32 1.442695, %v3436_v20 }
 0xff8   : > { %4021 = vpow2.f32 %v2797_v11 }
 0xff9   : > { %4023 = vpow2.f32 %v2799_v17  ;;  %v2750_v14 = vpop.f32.mrb[48].mxu1 }
 0xffa   : > { %v4900_v21 = vadd.f32 %v2750_v14, %v2650_v34  ;;  %v2752_v24 = vpop.f32.mrb[49].mxu1 }
 0xffb   : > { %v4902_v6 = vadd.f32 %v2752_v24, %v2654_v35  ;;  %v2754_v26 = vpop.f32.mrb[50].mxu1 }
 0xffc   : > { %v3437_v32 = vmul.f32 -1.702, %v4900_v21  ;;  %v4905_v30 = vadd.f32 %v2754_v26, %v2650_v34  ;;  %v2756_v8 = vpop.f32.mrb[51].mxu1 }
 0xffd   : > { %v3438_v27 = vmul.f32 -1.702, %v4902_v6  ;;  %v4908_v63 = vadd.f32 %v2756_v8, %v2654_v35 }
 0xffe   : > { %v2801_v44 = vmul.f32 1.442695, %v3437_v32  ;;  %v3439_v29 = vmul.f32 -1.702, %v4905_v30 }
 0xfff   : > { %v2803_v22 = vmul.f32 1.442695, %v3438_v27  ;;  %v3440_v37 = vmul.f32 -1.702, %v4908_v63 }
0x1000   : > { %v4018_v46 = vpop.eup %4017  ;;  %4025 = vpow2.f32 %v2801_v44  ;;  %v2805_v47 = vmul.f32 1.442695, %v3439_v29 }
0x1001   : > { %v4020_v15 = vpop.eup %4019  ;;  %v2817_v48 = vadd.f32 1.0, %v4018_v46  ;;  %4027 = vpow2.f32 %v2803_v22  ;;  %v2760_v54 = vpop.f32.mrb[52].mxu1  ;;  %v2807_v42 = vmul.f32 1.442695, %v3440_v37 }
0x1002   : > { %v4022_v28 = vpop.eup %4021  ;;  %v2818_v61 = vadd.f32 1.0, %v4020_v15  ;;  %4029 = vpow2.f32 %v2805_v47  ;;  %v4912_v62 = vadd.f32 %v2760_v54, %v2650_v34  ;;  %v2762_v19 = vpop.f32.mrb[53].mxu1 }
0x1003   : > { %v4024_v39 = vpop.eup %4023  ;;  %4031 = vrcp.f32 %v2817_v48  ;;  %v2819_v56 = vadd.f32 1.0, %v4022_v28  ;;  %v4914_v1 = vadd.f32 %v2762_v19, %v2654_v35  ;;  %v2764_v55 = vpop.f32.mrb[54].mxu1 }
0x1004   : > { %4033 = vrcp.f32 %v2818_v61  ;;  %v2820_v60 = vadd.f32 1.0, %v4024_v39  ;;  %v3441_v13 = vmul.f32 -1.702, %v4912_v62  ;;  %v4917_v25 = vadd.f32 %v2764_v55, %v2650_v34  ;;  %v2766_v0 = vpop.f32.mrb[55].mxu1 }
0x1005   : > { %4035 = vrcp.f32 %v2819_v56  ;;  %v3442_v23 = vmul.f32 -1.702, %v4914_v1  ;;  %v4920_v10 = vadd.f32 %v2766_v0, %v2654_v35 }
0x1006   : > { %4037 = vrcp.f32 %v2820_v60  ;;  %v2809_v31 = vmul.f32 1.442695, %v3441_v13  ;;  %v3443_v58 = vmul.f32 -1.702, %v4917_v25 }
0x1007   : > { %4039 = vpow2.f32 %v2807_v42  ;;  %v2811_v59 = vmul.f32 1.442695, %v3442_v23  ;;  %v3444_v45 = vmul.f32 -1.702, %v4920_v10 }
0x1008   : > { %4041 = vpow2.f32 %v2809_v31  ;;  %v2813_v38 = vmul.f32 1.442695, %v3443_v58 }
0x1009   : > { %4043 = vpow2.f32 %v2811_v59  ;;  %v2815_v3 = vmul.f32 1.442695, %v3444_v45 }
0x100a   : > { %v4026_v34 = vpop.eup %4025  ;;  %4045 = vpow2.f32 %v2813_v38 }
0x100b   : > { %v4028_v7 = vpop.eup %4027  ;;  %v2821_v33 = vadd.f32 1.0, %v4026_v34  ;;  %4047 = vpow2.f32 %v2815_v3 }
0x100c   : > { %v4030_v52 = vpop.eup %4029  ;;  %v2822_v2 = vadd.f32 1.0, %v4028_v7 }
0x100d   : > { %v4032_v35 = vpop.eup %4031  ;;  %4049 = vrcp.f32 %v2821_v33  ;;  %v2823_v53 = vadd.f32 1.0, %v4030_v52 }
0x100e   : > { %v4034_v4 = vpop.eup %4033  ;;  %v2853_v41 = vmul.f32 %v4032_v35, %v4888_v9 }
0x100f   : > { %v4036_v40 = vpop.eup %4035  ;;  %4051 = vrcp.f32 %v2823_v53  ;;  %v2854_v17 = vmul.f32 %v4034_v4, %v4890_v16 }
0x1010   : > { %v4038_v43 = vpop.eup %4037  ;;  %v2855_v20 = vmul.f32 %v4036_v40, %v4893_v12  ;;  %4053 = vrcp.f32 %v2822_v2 }
0x1011   : > { %v4040_v11 = vpop.eup %4039  ;;  %v2856_v14 = vmul.f32 %v4038_v43, %v4896_v57 }
0x1012   : > { %v4042_v24 = vpop.eup %4041  ;;  %v2865_v26 = vpack.c.bf16 %v2855_v20, %v2853_v41  ;;  %v2824_v32 = vadd.f32 1.0, %v4040_v11 }
0x1013   : > { %v4044_v8 = vpop.eup %4043  ;;  %v2825_v27 = vadd.f32 1.0, %v4042_v24  ;;  %v2866_v44 = vpack.c.bf16 %v2856_v14, %v2854_v17 }
0x1014   : > { %v4046_v29 = vpop.eup %4045  ;;  %4055 = vrcp.f32 %v2824_v32  ;;  %v2826_v22 = vadd.f32 1.0, %v4044_v8 }
0x1015   : > { %v4048_v37 = vpop.eup %4047  ;;  %4057 = vrcp.f32 %v2825_v27  ;;  %v2827_v9 = vadd.f32 1.0, %v4046_v29  ;;  %3038 = vmatprep.mubr.bf16.mxu0 %v2866_v44 }
0x1016   : > { %4059 = vrcp.f32 %v2826_v22  ;;  %v2828_v12 = vadd.f32 1.0, %v4048_v37  ;;  %3039 = vmatmul.mubr.bf16.vlgmr.msra.gmra.mrb[44].mxu0 %v2865_v26  ;;  %v4126_v22 = vmov (!%p3462_p5), 0.0  }
0x1017   : > { %v4050_v16 = vpop.eup %4049  ;;  %4061 = vrcp.f32 %v2827_v9  ;;  %3736 = vmatprep.subr.bf16.mxu0 (!%p3462_p5), %v4126_v22 }
0x1018   : > { %4063 = vrcp.f32 %v2828_v12  ;;  %v2857_v46 = vmul.f32 %v4050_v16, %v4900_v21 }
0x1019   : > { %v4052_v57 = vpop.eup %4051 }
0x101a   : > { %v2859_v47 = vmul.f32 %v4052_v57, %v4905_v30  ;;  %v4054_v15 = vpop.eup %4053 }
0x101b   : > { %v2858_v61 = vmul.f32 %v4054_v15, %v4902_v6  ;;  %v3463_v15 = vld [vmem:[%s5038_s24] ss:$0 sm:$0xff] (!%p3462_p5) }
0x101c   : > { %v2867_v48 = vpack.c.bf16 %v2859_v47, %v2857_v46 }
0x101e   : > { %v4056_v54 = vpop.eup %4055 }
0x101f   : > { %v4058_v28 = vpop.eup %4057  ;;  %v2860_v19 = vmul.f32 %v4056_v54, %v4908_v63  ;;  %v3445_v63 = vld [vmem:[%s685_s3] ss:$0 sm:$0xff]  ;;  %s5037_s3 = sld [smem:[#allocation13_spill]] (!%p3462_p5) }
0x1020   : > { %v4060_v39 = vpop.eup %4059  ;;  %v2861_v60 = vmul.f32 %v4058_v28, %v4912_v62  ;;  %v3464_v54 = vld [vmem:[%s5039_s16] ss:$0 sm:$0xff] (!%p3462_p5) }
0x1021   : > { %v4062_v56 = vpop.eup %4061  ;;  %v2868_v42 = vpack.c.bf16 %v2860_v19, %v2858_v61  ;;  %v2862_v21 = vmul.f32 %v4060_v39, %v4914_v1 }
0x1022   : > { %v4064_v55 = vpop.eup %4063  ;;  %v2863_v13 = vmul.f32 %v4062_v56, %v4917_v25 }
0x1023   : > { %v2864_v30 = vmul.f32 %v4064_v55, %v4920_v10  ;;  %3046 = vmatprep.mubr.bf16.mxu0 %v2868_v42 }
0x1024   : > { %3047 = vmatmul.mubr.bf16.gmra.mrb[48].mxu0 %v2867_v48  ;;  %v2869_v0 = vpack.c.bf16 %v2863_v13, %v2861_v60 }
0x1025   : > { %v2870_v23 = vpack.c.bf16 %v2864_v30, %v2862_v21  ;;  %v4072_v37 = vld [vmem:[%s5037_s3 + $0x8] sm:$0xff] (!%p3462_p5)   ;;  %v4073_v9 = vld [vmem:[%s5037_s3 + $0x10] sm:$0xff] (!%p3462_p5)   ;;  %v4074_v12 = vld [vmem:[%s5037_s3 + $0x18] sm:$0xff] (!%p3462_p5)  }
0x1027   : > { %3054 = vmatprep.mubr.bf16.mxu0 %v2870_v23 }
0x102c   : > { %3055 = vmatmul.mubr.bf16.gmra.mrb[52].mxu0 %v2869_v0 }
0x102d   : > { %3744 = vmatprep.mubr.msk.bf16.mxu0 (!%p3462_p5), %vm4127_vm11, %v4126_v22 }
0x10e9   : > { %v3565_v6 = vpop.f32.mrb[44].mxu0 }
0x10ea   : > { %v3566_v31 = vpop.f32.mrb[45].mxu0 }
0x10eb   : > { %v3567_v62 = vadd.f32 %v3566_v31, %v3565_v6  ;;  %v3568_v58 = vpop.f32.mrb[46].mxu0 }
0x10ec   : > { %v3569_v25 = vpop.f32.mrb[47].mxu0 }
0x10ed   : > { %v3041_v59 = vadd.f32 %v3567_v62, %v3445_v63  ;;  %v3570_v1 = vadd.f32 %v3569_v25, %v3568_v58 }
0x10ef   : > { %v3063_v10 = vadd.f32 %v3041_v59, %v4778_v49  ;;  %v3044_v45 = vadd.f32 %v3570_v1, %v3445_v63 }
0x10f1   : > { %3069 = vst.msk [vmem:[#allocation2] sm:$0xff] %vm712_vm1, %v3063_v10  ;;  %v3064_v38 = vadd.f32 %v3044_v45, %v4780_v51 }
0x10f3   : > { %3070 = vst.msk [vmem:[#allocation2 + $0x8] sm:$0xff] %vm712_vm1, %v3064_v38 }
0x10f7   : > { %v3571_v3 = vpop.f32.mrb[48].mxu0 }
0x10f8   : > { %v3572_v34 = vpop.f32.mrb[49].mxu0 }
0x10f9   : > { %v3573_v7 = vadd.f32 %v3572_v34, %v3571_v3  ;;  %v3574_v33 = vpop.f32.mrb[50].mxu0 }
0x10fa   : > { %v3575_v52 = vpop.f32.mrb[51].mxu0 }
0x10fb   : > { %v3049_v35 = vadd.f32 %v3573_v7, %v3445_v63  ;;  %v3576_v53 = vadd.f32 %v3575_v52, %v3574_v33 }
0x10fd   : > { %v3065_v4 = vadd.f32 %v3049_v35, %v4786_v5  ;;  %v3052_v2 = vadd.f32 %v3576_v53, %v3445_v63 }
0x10ff   : > { %3071 = vst.msk [vmem:[#allocation2 + $0x10] sm:$0xff] %vm712_vm1, %v3065_v4  ;;  %v3066_v49 = vadd.f32 %v3052_v2, %v4788_v50  ;;  %v3577_v40 = vpop.f32.mrb[52].mxu0 }
0x1100   : > { %v3578_v43 = vpop.f32.mrb[53].mxu0 }
0x1101   : > { %3072 = vst.msk [vmem:[#allocation2 + $0x18] sm:$0xff] %vm712_vm1, %v3066_v49  ;;  %v3579_v51 = vadd.f32 %v3578_v43, %v3577_v40  ;;  %v3580_v41 = vpop.f32.mrb[54].mxu0  ;;  %v3080_v50 = vrot.slane (!%p3462_p5), %v3066_v49, 7 }
0x1102   : > { %v3581_v20 = vpop.f32.mrb[55].mxu0 }
0x1103   : > { %v3057_v11 = vadd.f32 %v3579_v51, %v3445_v63  ;;  %v3582_v17 = vadd.f32 %v3581_v20, %v3580_v41  ;;  %3078 = sbr.rel (%p3462_p5) target bundleno = 4886 (0x1316), region = 92  ;;  %v3083_v26 = vsel (!%p3462_p5), %vm3082_vm9, %v3063_v10, %v3080_v50 }
0x1104   : > { %v3087_v32 = vsel (!%p3462_p5), %vm3086_vm10, %v3083_v26, 0.0 }
0x1105   : > { %v3067_v14 = vadd.f32 %v3057_v11, %v4794_v36  ;;  %v3060_v24 = vadd.f32 %v3582_v17, %v3445_v63  ;;  %3088 = vadd.xlane.f32.xlu0 (!%p3462_p5), %v3087_v32 }
0x1107   : > { %3073 = vst.msk [vmem:[#allocation2 + $0x20] sm:$0xff] %vm712_vm1, %v3067_v14  ;;  %v3068_v5 = vadd.f32 %v3060_v24, %v4796_v18  ;;  %v4071_v18 = vld [vmem:[%s5037_s3] sm:$0xff] (!%p3462_p5)  }
0x1108   : > { %3737 = vmatpush3.bf16.msra.mxu0 (!%p3462_p5), %v4071_v18 }
0x1109   : > { %3074 = vst.msk [vmem:[#allocation2 + $0x28] sm:$0xff] %vm712_vm1, %v3068_v5  ;;  %3738 = vmatprep.subr.bf16.mxu0 (!%p3462_p5), %v4126_v22 }
0x110c   : > { %3739 = vmatpush3.bf16.msra.mxu0 %v4072_v37 }
0x110d   : > { %3740 = vmatprep.subr.bf16.mxu0 %v4126_v22 }
0x1110   : > { %3741 = vmatpush3.bf16.msra.mxu0 %v4073_v9 }
0x1111   : > { %3742 = vmatprep.subr.bf16.mxu0 %v4126_v22 }
0x1114   : > { %3743 = vmatpush3.bf16.msra.mxu0 %v4074_v12 }
0x1192   : > { %v3089_v8 = vpop.xlane.xlu0 %3088 }
0x1193   : > { %v3090_v27 = vmul.f32 0.015625, %v3089_v8 }
0x1195   : > { %v3091_v44 = vsub.f32 %v3083_v26, %v3090_v27 }
0x1197   : > { %v3092_v36 = vmul.f32 %v3091_v44, %v3091_v44 }
0x1199   : > { %v3093_v29 = vsel %vm3086_vm10, %v3092_v36, 0.0 }
0x119a   : > { %3094 = vadd.xlane.f32.xlu0 %v3093_v29 }
0x1227   : > { %v3095_v16 = vpop.xlane.xlu0 %3094 }
0x1228   : > { %v3096_v57 = vmul.f32 0.015625, %v3095_v16 }
0x122a   : > { %v3097_v46 = vadd.f32 1e-05, %v3096_v57 }
0x122c   : > { %4075 = vrsqrt.f32 %v3097_v46 }
0x1236   : > { %v4076_v47 = vpop.eup %4075 }
0x1237   : > { %v3099_v48 = vmul.f32 %v4076_v47, %v3091_v44 }
0x1239   : > { %v3106_v28 = vmul.f32 %v3463_v15, %v3099_v48 }
0x123b   : > { %v3113_v61 = vadd.f32 %v3464_v54, %v3106_v28 }
0x123d   : > { %v3114_v19 = vpack.c.bf16 %v3113_v61, %v3113_v61 }
0x123f   : > { %3745 = vmatmul.mubr.msk.bf16.vlgmr.msra.gmra.mrb[0].mxu0 %vm712_vm1, %v3114_v19 }
0x1312   : > { %v3184_v39 = vpop.f32.mrb[0].mxu0 }
0x1313   : > { %3191 = vst.msk [vmem:[#allocation3] sm:$0x3] %vm3190_vm12, %v3184_v39  ;;  %v3746_v56 = vpop.f32.mrb[1].mxu0 }
0x1314   : > { %v3187_v42 = vpop.f32.mrb[2].mxu0 }
0x1315   : > { %v3747_v55 = vpop.f32.mrb[3].mxu0 }
0x1316 PF: > { %p3784_p6 = scmp.eq.s32.totalorder %s4220_s22, 1  ;;  %s4128_s17 = smov [#allocation3]  }
0x1317   : > { %s3199_s13 = sshll.u32 %s4128_s17, 4  ;;  %s3200_s13 = int_to_ptr.vmem [resolvable:$true] %s3199_s13 }
0x1318   : > { %s4077_s26 = scalar_lea.vmem %s3200_s13, 32  ;;  %p4084_p10 = scmp.lt.s32.totalorder %s3200_s13, %s3200_s13 }
0x1319   : > { %p4078_p7 = scmp.ne.s32.totalorder %s3200_s13, %s4077_s26  ;;  %p4085_p11 = scmp.lt.s32.totalorder %s4077_s26, %s4077_s26 }
0x131b   : > { %p4079_p8 = pnand %p4078_p7, %p3784_p6  ;;  %p4086_p12 = por %p4085_p11, %p4084_p10 }
0x131d   : > { %p4080_p9 = pneg %p4079_p8 }
0x131f   : > { %p4087_p13 = pnand %p4086_p12, %p4080_p9 }
0x1321   : > { %4090 = shalt.err (!%p4087_p13)
}
0x1322   : > { %s5040_s15 = sld [smem:[#allocation14_spill]] }
0x1328   : > { %s4091_s21 = scalar_lea.hbm %s5040_s15, 32 }
0x1329   : > { %p4092_p0 = scmp.ne.s32.totalorder %s5040_s15, %s4091_s21  ;;  %p4097_p3 = scmp.lt.u32.totalorder %s4091_s21, %s5040_s15 }
0x132b   : > { %p4093_p1 = pnand %p4092_p0, %p3784_p6 }
0x132d   : > { %p4094_p2 = pneg %p4093_p1 }
0x132f   : > { %p4099_p4 = pnand %p4097_p3, %p4094_p2 }
0x1331   : > { %4102 = shalt.err (!%p4099_p4)
}
0x1332   : > { %3781 = dma.vmem_to_hbm [thread:$0]  (%p3784_p6), %s3200_s13, 32, %s5040_s15, [#allocation4]  }
0x1333   : > { %4108 = dma.done.wait (%p3784_p6), [#allocation4], 32  }
0x1334   : > { %4110 = vsyncadd (%p3784_p6), [#allocation4], 4294967264 }
0x1335 PF: > { %s5041_s0 = sld [smem:[#allocation6_spill]] }
0x133b   : > { %s27_s21 = sadd.s32 1, %s5041_s0  }
0x133c   : > { %p24_p5 = scmp.ge.s32.totalorder %s27_s21, 4  }
0x133e   :  { %26 = sbr.rel (!%p24_p5) target bundleno = 9 (0x9), region = 152 }
0x1345   :  { %3212 = vsyncpa [#allocation4], 1 }
0x1346   :  { %3214 = vsyncpa [#allocation4 + $0x1], 1 }

</bundles_post_ra>
